<compile_context>
chip_gen: v7x
topology: tpu7x:2x2x1
jax: 0.10.0
libtpu: 0.0.40
codegen_flags: <defaults>
</compile_context>

<pallas_src>
import jax
import jax.numpy as jnp
from jax.experimental import pallas as pl
from jax.experimental.pallas import tpu as pltpu

INPUT_DIM = 300
HIDDEN = 100
OUTPUT_DIM = 10
B = 2
T = 8

# Tile-aligned (padded) sizes used inside the kernel.
HP = 128                 # hidden padded to one lane tile
IN_PAD = 384             # 300 -> 3 * 128
GATES = 4 * HP           # 512: each gate occupies its own 128-lane slab
OUT_PAD = 128            # 10 -> 128 for a lane-dense unmasked output store


def _lstm_kernel(
    x_ref,      # (B, T, IN_PAD)   full padded input sequence (VMEM resident)
    wih1_ref,   # (IN_PAD, GATES)  layer-1 input projection
    whh1_ref,   # (HP, GATES)      layer-1 recurrent projection
    b1_ref,     # (1, GATES)       fused b_ih + b_hh, layer 1
    w2_ref,     # (2*HP, GATES)    stacked [W_ih2; W_hh2] -> layer 2 is 1 matmul
    b2_ref,     # (1, GATES)       fused b_ih + b_hh, layer 2
    wm_ref,     # (HP, OUT_PAD)    final linear weight
    bm_ref,     # (1, OUT_PAD)     final linear bias
    out_ref,    # (B, OUT_PAD)
):
    batch, seq, in_pad = x_ref.shape

    # ---- Prologue: hoist the layer-1 input projection out of the recurrence.
    # One (B*T, IN_PAD) @ (IN_PAD, GATES) MXU op, bias folded in once.
    x2d = x_ref[...].reshape(batch * seq, in_pad)
    g1_all = (
        jnp.dot(x2d, wih1_ref[...], preferred_element_type=jnp.float32)
        + b1_ref[...]
    ).reshape(batch, seq, GATES)

    # Hoist the layer-2 bias broadcast out of the time loop.
    b2 = jnp.broadcast_to(b2_ref[...], (batch, GATES))

    def gate_split(g):
        # PyTorch gate order i, f, g, o; each slab is 128-lane aligned.
        i_g = jax.nn.sigmoid(g[:, 0 * HP:1 * HP])
        f_g = jax.nn.sigmoid(g[:, 1 * HP:2 * HP])
        g_g = jnp.tanh(g[:, 2 * HP:3 * HP])
        o_g = jax.nn.sigmoid(g[:, 3 * HP:4 * HP])
        return i_g, f_g, g_g, o_g

    zeros = jnp.zeros((batch, HP), jnp.float32)
    h1, c1, h2, c2 = zeros, zeros, zeros, zeros

    # ---- Recurrence: fully unrolled (seq is a small compile-time constant).
    for t in range(seq):
        # Layer 1: only the recurrent h @ W_hh matmul sits on the serial path.
        g1 = g1_all[:, t, :] + jnp.dot(
            h1, whh1_ref[...], preferred_element_type=jnp.float32
        )
        i1, f1, gg1, o1 = gate_split(g1)
        c1 = f1 * c1 + i1 * gg1
        h1 = o1 * jnp.tanh(c1)

        # Layer 2: single fused (B, 2*HP) @ (2*HP, GATES) matmul.
        g2 = (
            jnp.dot(
                jnp.concatenate([h1, h2], axis=1),
                w2_ref[...],
                preferred_element_type=jnp.float32,
            )
            + b2
        )
        i2, f2, gg2, o2 = gate_split(g2)
        c2 = f2 * c2 + i2 * gg2
        h2 = o2 * jnp.tanh(c2)

    # ---- Epilogue: final Linear on the last hidden state, lane-dense store.
    out_ref[...] = (
        jnp.dot(h2, wm_ref[...], preferred_element_type=jnp.float32)
        + bm_ref[...]
    ).astype(out_ref.dtype)


def _pad_gate_blocks(w):
    """Pad each of the 4 gate blocks along the last dim from HIDDEN to HP."""
    k = w.shape[0]
    w = w.reshape(k, 4, HIDDEN)
    w = jnp.pad(w, ((0, 0), (0, 0), (0, HP - HIDDEN)))
    return w.reshape(k, 4 * HP)


def _prepare_kernel_params(params):
    """Zero-pad / stack PyTorch-shaped (pre-transposed) params to tile-aligned layout."""
    wih1, whh1, b1, wih2, whh2, b2, wm, bm = params
    wih1_p = jnp.pad(_pad_gate_blocks(wih1), ((0, IN_PAD - INPUT_DIM), (0, 0)))
    whh1_p = jnp.pad(_pad_gate_blocks(whh1), ((0, HP - HIDDEN), (0, 0)))
    b1_p = _pad_gate_blocks(b1)
    wih2_p = jnp.pad(_pad_gate_blocks(wih2), ((0, HP - HIDDEN), (0, 0)))
    whh2_p = jnp.pad(_pad_gate_blocks(whh2), ((0, HP - HIDDEN), (0, 0)))
    w2_p = jnp.concatenate([wih2_p, whh2_p], axis=0)       # (2*HP, GATES)
    b2_p = _pad_gate_blocks(b2)
    wm_p = jnp.pad(wm, ((0, HP - HIDDEN), (0, OUT_PAD - OUTPUT_DIM)))
    bm_p = jnp.pad(bm, ((0, 0), (0, OUT_PAD - OUTPUT_DIM)))
    return wih1_p, whh1_p, b1_p, w2_p, b2_p, wm_p, bm_p


@jax.jit
def lstm_model_forward(x, params):
    """x: (B, T, 300) float32 -> (B, OUTPUT_DIM) float32."""
    batch, seq, in_dim = x.shape
    x_p = jnp.pad(x, ((0, 0), (0, 0), (0, IN_PAD - in_dim)))
    kp = _prepare_kernel_params(params)
    out_p = pl.pallas_call(
        _lstm_kernel,
        out_shape=jax.ShapeDtypeStruct((batch, OUT_PAD), jnp.float32),
        compiler_params=pltpu.CompilerParams(
            vmem_limit_bytes=16 * 1024 * 1024,
        ),
    )(x_p, *kp)
    return out_p[:, :OUTPUT_DIM]


def init_params(key):
    """Deterministic init matching PyTorch LSTM/Linear parameter shapes.

    PyTorch shapes (pre-transpose):
      weight_ih_l0: (4H, 300), weight_hh_l0: (4H, H), bias_*_l0: (4H,)
      weight_ih_l1: (4H, H),   weight_hh_l1: (4H, H), bias_*_l1: (4H,)
      mlp.weight: (OUT, H), mlp.bias: (OUT,)
    We store transposed weights (in_dim, out_dim) and fused biases.
    """
    ks = jax.random.split(key, 10)
    bound = 1.0 / jnp.sqrt(HIDDEN)
    u = lambda k, shape: jax.random.uniform(k, shape, jnp.float32, -bound, bound)

    wih1 = u(ks[0], (INPUT_DIM, 4 * HIDDEN))
    whh1 = u(ks[1], (HIDDEN, 4 * HIDDEN))
    b1 = (u(ks[2], (4 * HIDDEN,)) + u(ks[3], (4 * HIDDEN,))).reshape(1, 4 * HIDDEN)
    wih2 = u(ks[4], (HIDDEN, 4 * HIDDEN))
    whh2 = u(ks[5], (HIDDEN, 4 * HIDDEN))
    b2 = (u(ks[6], (4 * HIDDEN,)) + u(ks[7], (4 * HIDDEN,))).reshape(1, 4 * HIDDEN)
    wm = u(ks[8], (HIDDEN, OUTPUT_DIM))
    bm = u(ks[9], (OUTPUT_DIM,)).reshape(1, OUTPUT_DIM)
    return (wih1, whh1, b1, wih2, whh2, b2, wm, bm)


def reference_forward(x, params):
    """Pure-JAX reference implementing the same 2-layer LSTM + Linear."""
    (wih1, whh1, b1, wih2, whh2, b2, wm, bm) = params
    batch = x.shape[0]
    h1 = jnp.zeros((batch, HIDDEN), jnp.float32)
    c1 = jnp.zeros((batch, HIDDEN), jnp.float32)
    h2 = jnp.zeros((batch, HIDDEN), jnp.float32)
    c2 = jnp.zeros((batch, HIDDEN), jnp.float32)

    def cell(x_in, w_ih, w_hh, b, h, c):
        g = x_in @ w_ih + h @ w_hh + b
        i = jax.nn.sigmoid(g[:, :HIDDEN])
        f = jax.nn.sigmoid(g[:, HIDDEN:2 * HIDDEN])
        gg = jnp.tanh(g[:, 2 * HIDDEN:3 * HIDDEN])
        o = jax.nn.sigmoid(g[:, 3 * HIDDEN:])
        c = f * c + i * gg
        h = o * jnp.tanh(c)
        return h, c

    for t in range(x.shape[1]):
        h1, c1 = cell(x[:, t, :], wih1, whh1, b1, h1, c1)
        h2, c2 = cell(h1, wih2, whh2, b2, h2, c2)
    return h2 @ wm + bm


if __name__ == "__main__":
    key = jax.random.PRNGKey(0)
    k_x, k_p = jax.random.split(key)
    x = jax.random.normal(k_x, (B, T, INPUT_DIM), jnp.float32)
    params = init_params(k_p)

    out = lstm_model_forward(x, params)
    out = jax.block_until_ready(out)

    ref = reference_forward(x, params)
    assert out.shape == (B, OUTPUT_DIM)
    max_diff = jnp.max(jnp.abs(out - ref))
    assert max_diff < 1e-4, f"max abs diff {max_diff}"
    print("KERNEL_OK")
</pallas_src>

<mosaic_0001>
module attributes {stable_mosaic.version = 11 : i64} {
  func.func @_lstm_kernel(%arg0: memref<2x8x384xf32, #tpu.memory_space<vmem>>, %arg1: memref<384x512xf32, #tpu.memory_space<vmem>>, %arg2: memref<128x512xf32, #tpu.memory_space<vmem>>, %arg3: memref<1x512xf32, #tpu.memory_space<vmem>>, %arg4: memref<256x512xf32, #tpu.memory_space<vmem>>, %arg5: memref<1x512xf32, #tpu.memory_space<vmem>>, %arg6: memref<128x128xf32, #tpu.memory_space<vmem>>, %arg7: memref<1x128xf32, #tpu.memory_space<vmem>>, %arg8: memref<2x128xf32, #tpu.memory_space<vmem>>) attributes {dimension_semantics = [], scalar_prefetch = 0 : i64, scratch_operands = 0 : i64, tpu.core_type = #tpu.core_type<tc>} {
    %c0 = arith.constant 0 : index
    %c0_0 = arith.constant 0 : index
    %c0_1 = arith.constant 0 : index
    %0 = vector.load %arg0[%c0, %c0_0, %c0_1] : memref<2x8x384xf32, #tpu.memory_space<vmem>>, vector<2x8x384xf32>
    %1 = vector.shape_cast %0 : vector<2x8x384xf32> to vector<16x384xf32>
    %c0_2 = arith.constant 0 : index
    %c0_3 = arith.constant 0 : index
    %2 = vector.load %arg1[%c0_2, %c0_3] : memref<384x512xf32, #tpu.memory_space<vmem>>, vector<384x512xf32>
    %cst = arith.constant dense<0.000000e+00> : vector<16x512xf32>
    %3 = tpu.matmul %1, %2, %cst {dimension_numbers = #tpu.dot_dimension_numbers<[1], [0], [0], [1], [0, 0, 1, 1], [], []>} : vector<16x384xf32>, vector<384x512xf32>, vector<16x512xf32> -> vector<16x512xf32>
    %c0_4 = arith.constant 0 : index
    %c0_5 = arith.constant 0 : index
    %4 = vector.load %arg3[%c0_4, %c0_5] : memref<1x512xf32, #tpu.memory_space<vmem>>, vector<1x512xf32>
    %5 = vector.broadcast %4 : vector<1x512xf32> to vector<16x512xf32>
    %6 = arith.addf %3, %5 : vector<16x512xf32>
    %7 = vector.shape_cast %6 : vector<16x512xf32> to vector<2x8x512xf32>
    %c0_6 = arith.constant 0 : index
    %c0_7 = arith.constant 0 : index
    %8 = vector.load %arg5[%c0_6, %c0_7] : memref<1x512xf32, #tpu.memory_space<vmem>>, vector<1x512xf32>
    %9 = vector.shape_cast %8 : vector<1x512xf32> to vector<1x512xf32>
    %10 = vector.broadcast %9 : vector<1x512xf32> to vector<2x512xf32>
    %cst_8 = arith.constant 0.000000e+00 : f32
    %11 = vector.broadcast %cst_8 : f32 to vector<2x128xf32>
    %12 = vector.extract_strided_slice %7 {offsets = [0, 0, 0], sizes = [2, 1, 512], strides = [1, 1, 1]} : vector<2x8x512xf32> to vector<2x1x512xf32>
    %13 = vector.shape_cast %12 : vector<2x1x512xf32> to vector<2x512xf32>
    %c0_9 = arith.constant 0 : index
    %c0_10 = arith.constant 0 : index
    %14 = vector.load %arg2[%c0_9, %c0_10] : memref<128x512xf32, #tpu.memory_space<vmem>>, vector<128x512xf32>
    %cst_11 = arith.constant dense<0.000000e+00> : vector<2x512xf32>
    %15 = tpu.matmul %11, %14, %cst_11 {dimension_numbers = #tpu.dot_dimension_numbers<[1], [0], [0], [1], [0, 0, 1, 1], [], []>} : vector<2x128xf32>, vector<128x512xf32>, vector<2x512xf32> -> vector<2x512xf32>
    %16 = arith.addf %13, %15 : vector<2x512xf32>
    %17 = vector.extract_strided_slice %16 {offsets = [0, 0], sizes = [2, 128], strides = [1, 1]} : vector<2x512xf32> to vector<2x128xf32>
    %18 = arith.negf %17 : vector<2x128xf32>
    %19 = math.exp %18 : vector<2x128xf32>
    %cst_12 = arith.constant 1.000000e+00 : f32
    %20 = vector.broadcast %cst_12 : f32 to vector<2x128xf32>
    %21 = arith.addf %20, %19 : vector<2x128xf32>
    %22 = arith.divf %20, %21 : vector<2x128xf32>
    %23 = vector.extract_strided_slice %16 {offsets = [0, 128], sizes = [2, 128], strides = [1, 1]} : vector<2x512xf32> to vector<2x128xf32>
    %24 = arith.negf %23 : vector<2x128xf32>
    %25 = math.exp %24 : vector<2x128xf32>
    %cst_13 = arith.constant 1.000000e+00 : f32
    %26 = vector.broadcast %cst_13 : f32 to vector<2x128xf32>
    %27 = arith.addf %26, %25 : vector<2x128xf32>
    %28 = arith.divf %26, %27 : vector<2x128xf32>
    %29 = vector.extract_strided_slice %16 {offsets = [0, 256], sizes = [2, 128], strides = [1, 1]} : vector<2x512xf32> to vector<2x128xf32>
    %30 = math.tanh %29 : vector<2x128xf32>
    %31 = vector.extract_strided_slice %16 {offsets = [0, 384], sizes = [2, 128], strides = [1, 1]} : vector<2x512xf32> to vector<2x128xf32>
    %32 = arith.negf %31 : vector<2x128xf32>
    %33 = math.exp %32 : vector<2x128xf32>
    %cst_14 = arith.constant 1.000000e+00 : f32
    %34 = vector.broadcast %cst_14 : f32 to vector<2x128xf32>
    %35 = arith.addf %34, %33 : vector<2x128xf32>
    %36 = arith.divf %34, %35 : vector<2x128xf32>
    %37 = arith.mulf %28, %11 : vector<2x128xf32>
    %38 = arith.mulf %22, %30 : vector<2x128xf32>
    %39 = arith.addf %37, %38 : vector<2x128xf32>
    %40 = math.tanh %39 : vector<2x128xf32>
    %41 = arith.mulf %36, %40 : vector<2x128xf32>
    %42 = tpu.concatenate %41, %11 in 1 : vector<2x128xf32>, vector<2x128xf32> -> vector<2x256xf32>
    %c0_15 = arith.constant 0 : index
    %c0_16 = arith.constant 0 : index
    %43 = vector.load %arg4[%c0_15, %c0_16] : memref<256x512xf32, #tpu.memory_space<vmem>>, vector<256x512xf32>
    %cst_17 = arith.constant dense<0.000000e+00> : vector<2x512xf32>
    %44 = tpu.matmul %42, %43, %cst_17 {dimension_numbers = #tpu.dot_dimension_numbers<[1], [0], [0], [1], [0, 0, 1, 1], [], []>} : vector<2x256xf32>, vector<256x512xf32>, vector<2x512xf32> -> vector<2x512xf32>
    %45 = arith.addf %44, %10 : vector<2x512xf32>
    %46 = vector.extract_strided_slice %45 {offsets = [0, 0], sizes = [2, 128], strides = [1, 1]} : vector<2x512xf32> to vector<2x128xf32>
    %47 = arith.negf %46 : vector<2x128xf32>
    %48 = math.exp %47 : vector<2x128xf32>
    %cst_18 = arith.constant 1.000000e+00 : f32
    %49 = vector.broadcast %cst_18 : f32 to vector<2x128xf32>
    %50 = arith.addf %49, %48 : vector<2x128xf32>
    %51 = arith.divf %49, %50 : vector<2x128xf32>
    %52 = vector.extract_strided_slice %45 {offsets = [0, 128], sizes = [2, 128], strides = [1, 1]} : vector<2x512xf32> to vector<2x128xf32>
    %53 = arith.negf %52 : vector<2x128xf32>
    %54 = math.exp %53 : vector<2x128xf32>
    %cst_19 = arith.constant 1.000000e+00 : f32
    %55 = vector.broadcast %cst_19 : f32 to vector<2x128xf32>
    %56 = arith.addf %55, %54 : vector<2x128xf32>
    %57 = arith.divf %55, %56 : vector<2x128xf32>
    %58 = vector.extract_strided_slice %45 {offsets = [0, 256], sizes = [2, 128], strides = [1, 1]} : vector<2x512xf32> to vector<2x128xf32>
    %59 = math.tanh %58 : vector<2x128xf32>
    %60 = vector.extract_strided_slice %45 {offsets = [0, 384], sizes = [2, 128], strides = [1, 1]} : vector<2x512xf32> to vector<2x128xf32>
    %61 = arith.negf %60 : vector<2x128xf32>
    %62 = math.exp %61 : vector<2x128xf32>
    %cst_20 = arith.constant 1.000000e+00 : f32
    %63 = vector.broadcast %cst_20 : f32 to vector<2x128xf32>
    %64 = arith.addf %63, %62 : vector<2x128xf32>
    %65 = arith.divf %63, %64 : vector<2x128xf32>
    %66 = arith.mulf %57, %11 : vector<2x128xf32>
    %67 = arith.mulf %51, %59 : vector<2x128xf32>
    %68 = arith.addf %66, %67 : vector<2x128xf32>
    %69 = math.tanh %68 : vector<2x128xf32>
    %70 = arith.mulf %65, %69 : vector<2x128xf32>
    %71 = vector.extract_strided_slice %7 {offsets = [0, 1, 0], sizes = [2, 1, 512], strides = [1, 1, 1]} : vector<2x8x512xf32> to vector<2x1x512xf32>
    %72 = vector.shape_cast %71 : vector<2x1x512xf32> to vector<2x512xf32>
    %c0_21 = arith.constant 0 : index
    %c0_22 = arith.constant 0 : index
    %73 = vector.load %arg2[%c0_21, %c0_22] : memref<128x512xf32, #tpu.memory_space<vmem>>, vector<128x512xf32>
    %cst_23 = arith.constant dense<0.000000e+00> : vector<2x512xf32>
    %74 = tpu.matmul %41, %73, %cst_23 {dimension_numbers = #tpu.dot_dimension_numbers<[1], [0], [0], [1], [0, 0, 1, 1], [], []>} : vector<2x128xf32>, vector<128x512xf32>, vector<2x512xf32> -> vector<2x512xf32>
    %75 = arith.addf %72, %74 : vector<2x512xf32>
    %76 = vector.extract_strided_slice %75 {offsets = [0, 0], sizes = [2, 128], strides = [1, 1]} : vector<2x512xf32> to vector<2x128xf32>
    %77 = arith.negf %76 : vector<2x128xf32>
    %78 = math.exp %77 : vector<2x128xf32>
    %cst_24 = arith.constant 1.000000e+00 : f32
    %79 = vector.broadcast %cst_24 : f32 to vector<2x128xf32>
    %80 = arith.addf %79, %78 : vector<2x128xf32>
    %81 = arith.divf %79, %80 : vector<2x128xf32>
    %82 = vector.extract_strided_slice %75 {offsets = [0, 128], sizes = [2, 128], strides = [1, 1]} : vector<2x512xf32> to vector<2x128xf32>
    %83 = arith.negf %82 : vector<2x128xf32>
    %84 = math.exp %83 : vector<2x128xf32>
    %cst_25 = arith.constant 1.000000e+00 : f32
    %85 = vector.broadcast %cst_25 : f32 to vector<2x128xf32>
    %86 = arith.addf %85, %84 : vector<2x128xf32>
    %87 = arith.divf %85, %86 : vector<2x128xf32>
    %88 = vector.extract_strided_slice %75 {offsets = [0, 256], sizes = [2, 128], strides = [1, 1]} : vector<2x512xf32> to vector<2x128xf32>
    %89 = math.tanh %88 : vector<2x128xf32>
    %90 = vector.extract_strided_slice %75 {offsets = [0, 384], sizes = [2, 128], strides = [1, 1]} : vector<2x512xf32> to vector<2x128xf32>
    %91 = arith.negf %90 : vector<2x128xf32>
    %92 = math.exp %91 : vector<2x128xf32>
    %cst_26 = arith.constant 1.000000e+00 : f32
    %93 = vector.broadcast %cst_26 : f32 to vector<2x128xf32>
    %94 = arith.addf %93, %92 : vector<2x128xf32>
    %95 = arith.divf %93, %94 : vector<2x128xf32>
    %96 = arith.mulf %87, %39 : vector<2x128xf32>
    %97 = arith.mulf %81, %89 : vector<2x128xf32>
    %98 = arith.addf %96, %97 : vector<2x128xf32>
    %99 = math.tanh %98 : vector<2x128xf32>
    %100 = arith.mulf %95, %99 : vector<2x128xf32>
    %101 = tpu.concatenate %100, %70 in 1 : vector<2x128xf32>, vector<2x128xf32> -> vector<2x256xf32>
    %c0_27 = arith.constant 0 : index
    %c0_28 = arith.constant 0 : index
    %102 = vector.load %arg4[%c0_27, %c0_28] : memref<256x512xf32, #tpu.memory_space<vmem>>, vector<256x512xf32>
    %cst_29 = arith.constant dense<0.000000e+00> : vector<2x512xf32>
    %103 = tpu.matmul %101, %102, %cst_29 {dimension_numbers = #tpu.dot_dimension_numbers<[1], [0], [0], [1], [0, 0, 1, 1], [], []>} : vector<2x256xf32>, vector<256x512xf32>, vector<2x512xf32> -> vector<2x512xf32>
    %104 = arith.addf %103, %10 : vector<2x512xf32>
    %105 = vector.extract_strided_slice %104 {offsets = [0, 0], sizes = [2, 128], strides = [1, 1]} : vector<2x512xf32> to vector<2x128xf32>
    %106 = arith.negf %105 : vector<2x128xf32>
    %107 = math.exp %106 : vector<2x128xf32>
    %cst_30 = arith.constant 1.000000e+00 : f32
    %108 = vector.broadcast %cst_30 : f32 to vector<2x128xf32>
    %109 = arith.addf %108, %107 : vector<2x128xf32>
    %110 = arith.divf %108, %109 : vector<2x128xf32>
    %111 = vector.extract_strided_slice %104 {offsets = [0, 128], sizes = [2, 128], strides = [1, 1]} : vector<2x512xf32> to vector<2x128xf32>
    %112 = arith.negf %111 : vector<2x128xf32>
    %113 = math.exp %112 : vector<2x128xf32>
    %cst_31 = arith.constant 1.000000e+00 : f32
    %114 = vector.broadcast %cst_31 : f32 to vector<2x128xf32>
    %115 = arith.addf %114, %113 : vector<2x128xf32>
    %116 = arith.divf %114, %115 : vector<2x128xf32>
    %117 = vector.extract_strided_slice %104 {offsets = [0, 256], sizes = [2, 128], strides = [1, 1]} : vector<2x512xf32> to vector<2x128xf32>
    %118 = math.tanh %117 : vector<2x128xf32>
    %119 = vector.extract_strided_slice %104 {offsets = [0, 384], sizes = [2, 128], strides = [1, 1]} : vector<2x512xf32> to vector<2x128xf32>
    %120 = arith.negf %119 : vector<2x128xf32>
    %121 = math.exp %120 : vector<2x128xf32>
    %cst_32 = arith.constant 1.000000e+00 : f32
    %122 = vector.broadcast %cst_32 : f32 to vector<2x128xf32>
    %123 = arith.addf %122, %121 : vector<2x128xf32>
    %124 = arith.divf %122, %123 : vector<2x128xf32>
    %125 = arith.mulf %116, %68 : vector<2x128xf32>
    %126 = arith.mulf %110, %118 : vector<2x128xf32>
    %127 = arith.addf %125, %126 : vector<2x128xf32>
    %128 = math.tanh %127 : vector<2x128xf32>
    %129 = arith.mulf %124, %128 : vector<2x128xf32>
    %130 = vector.extract_strided_slice %7 {offsets = [0, 2, 0], sizes = [2, 1, 512], strides = [1, 1, 1]} : vector<2x8x512xf32> to vector<2x1x512xf32>
    %131 = vector.shape_cast %130 : vector<2x1x512xf32> to vector<2x512xf32>
    %c0_33 = arith.constant 0 : index
    %c0_34 = arith.constant 0 : index
    %132 = vector.load %arg2[%c0_33, %c0_34] : memref<128x512xf32, #tpu.memory_space<vmem>>, vector<128x512xf32>
    %cst_35 = arith.constant dense<0.000000e+00> : vector<2x512xf32>
    %133 = tpu.matmul %100, %132, %cst_35 {dimension_numbers = #tpu.dot_dimension_numbers<[1], [0], [0], [1], [0, 0, 1, 1], [], []>} : vector<2x128xf32>, vector<128x512xf32>, vector<2x512xf32> -> vector<2x512xf32>
    %134 = arith.addf %131, %133 : vector<2x512xf32>
    %135 = vector.extract_strided_slice %134 {offsets = [0, 0], sizes = [2, 128], strides = [1, 1]} : vector<2x512xf32> to vector<2x128xf32>
    %136 = arith.negf %135 : vector<2x128xf32>
    %137 = math.exp %136 : vector<2x128xf32>
    %cst_36 = arith.constant 1.000000e+00 : f32
    %138 = vector.broadcast %cst_36 : f32 to vector<2x128xf32>
    %139 = arith.addf %138, %137 : vector<2x128xf32>
    %140 = arith.divf %138, %139 : vector<2x128xf32>
    %141 = vector.extract_strided_slice %134 {offsets = [0, 128], sizes = [2, 128], strides = [1, 1]} : vector<2x512xf32> to vector<2x128xf32>
    %142 = arith.negf %141 : vector<2x128xf32>
    %143 = math.exp %142 : vector<2x128xf32>
    %cst_37 = arith.constant 1.000000e+00 : f32
    %144 = vector.broadcast %cst_37 : f32 to vector<2x128xf32>
    %145 = arith.addf %144, %143 : vector<2x128xf32>
    %146 = arith.divf %144, %145 : vector<2x128xf32>
    %147 = vector.extract_strided_slice %134 {offsets = [0, 256], sizes = [2, 128], strides = [1, 1]} : vector<2x512xf32> to vector<2x128xf32>
    %148 = math.tanh %147 : vector<2x128xf32>
    %149 = vector.extract_strided_slice %134 {offsets = [0, 384], sizes = [2, 128], strides = [1, 1]} : vector<2x512xf32> to vector<2x128xf32>
    %150 = arith.negf %149 : vector<2x128xf32>
    %151 = math.exp %150 : vector<2x128xf32>
    %cst_38 = arith.constant 1.000000e+00 : f32
    %152 = vector.broadcast %cst_38 : f32 to vector<2x128xf32>
    %153 = arith.addf %152, %151 : vector<2x128xf32>
    %154 = arith.divf %152, %153 : vector<2x128xf32>
    %155 = arith.mulf %146, %98 : vector<2x128xf32>
    %156 = arith.mulf %140, %148 : vector<2x128xf32>
    %157 = arith.addf %155, %156 : vector<2x128xf32>
    %158 = math.tanh %157 : vector<2x128xf32>
    %159 = arith.mulf %154, %158 : vector<2x128xf32>
    %160 = tpu.concatenate %159, %129 in 1 : vector<2x128xf32>, vector<2x128xf32> -> vector<2x256xf32>
    %c0_39 = arith.constant 0 : index
    %c0_40 = arith.constant 0 : index
    %161 = vector.load %arg4[%c0_39, %c0_40] : memref<256x512xf32, #tpu.memory_space<vmem>>, vector<256x512xf32>
    %cst_41 = arith.constant dense<0.000000e+00> : vector<2x512xf32>
    %162 = tpu.matmul %160, %161, %cst_41 {dimension_numbers = #tpu.dot_dimension_numbers<[1], [0], [0], [1], [0, 0, 1, 1], [], []>} : vector<2x256xf32>, vector<256x512xf32>, vector<2x512xf32> -> vector<2x512xf32>
    %163 = arith.addf %162, %10 : vector<2x512xf32>
    %164 = vector.extract_strided_slice %163 {offsets = [0, 0], sizes = [2, 128], strides = [1, 1]} : vector<2x512xf32> to vector<2x128xf32>
    %165 = arith.negf %164 : vector<2x128xf32>
    %166 = math.exp %165 : vector<2x128xf32>
    %cst_42 = arith.constant 1.000000e+00 : f32
    %167 = vector.broadcast %cst_42 : f32 to vector<2x128xf32>
    %168 = arith.addf %167, %166 : vector<2x128xf32>
    %169 = arith.divf %167, %168 : vector<2x128xf32>
    %170 = vector.extract_strided_slice %163 {offsets = [0, 128], sizes = [2, 128], strides = [1, 1]} : vector<2x512xf32> to vector<2x128xf32>
    %171 = arith.negf %170 : vector<2x128xf32>
    %172 = math.exp %171 : vector<2x128xf32>
    %cst_43 = arith.constant 1.000000e+00 : f32
    %173 = vector.broadcast %cst_43 : f32 to vector<2x128xf32>
    %174 = arith.addf %173, %172 : vector<2x128xf32>
    %175 = arith.divf %173, %174 : vector<2x128xf32>
    %176 = vector.extract_strided_slice %163 {offsets = [0, 256], sizes = [2, 128], strides = [1, 1]} : vector<2x512xf32> to vector<2x128xf32>
    %177 = math.tanh %176 : vector<2x128xf32>
    %178 = vector.extract_strided_slice %163 {offsets = [0, 384], sizes = [2, 128], strides = [1, 1]} : vector<2x512xf32> to vector<2x128xf32>
    %179 = arith.negf %178 : vector<2x128xf32>
    %180 = math.exp %179 : vector<2x128xf32>
    %cst_44 = arith.constant 1.000000e+00 : f32
    %181 = vector.broadcast %cst_44 : f32 to vector<2x128xf32>
    %182 = arith.addf %181, %180 : vector<2x128xf32>
    %183 = arith.divf %181, %182 : vector<2x128xf32>
    %184 = arith.mulf %175, %127 : vector<2x128xf32>
    %185 = arith.mulf %169, %177 : vector<2x128xf32>
    %186 = arith.addf %184, %185 : vector<2x128xf32>
    %187 = math.tanh %186 : vector<2x128xf32>
    %188 = arith.mulf %183, %187 : vector<2x128xf32>
    %189 = vector.extract_strided_slice %7 {offsets = [0, 3, 0], sizes = [2, 1, 512], strides = [1, 1, 1]} : vector<2x8x512xf32> to vector<2x1x512xf32>
    %190 = vector.shape_cast %189 : vector<2x1x512xf32> to vector<2x512xf32>
    %c0_45 = arith.constant 0 : index
    %c0_46 = arith.constant 0 : index
    %191 = vector.load %arg2[%c0_45, %c0_46] : memref<128x512xf32, #tpu.memory_space<vmem>>, vector<128x512xf32>
    %cst_47 = arith.constant dense<0.000000e+00> : vector<2x512xf32>
    %192 = tpu.matmul %159, %191, %cst_47 {dimension_numbers = #tpu.dot_dimension_numbers<[1], [0], [0], [1], [0, 0, 1, 1], [], []>} : vector<2x128xf32>, vector<128x512xf32>, vector<2x512xf32> -> vector<2x512xf32>
    %193 = arith.addf %190, %192 : vector<2x512xf32>
    %194 = vector.extract_strided_slice %193 {offsets = [0, 0], sizes = [2, 128], strides = [1, 1]} : vector<2x512xf32> to vector<2x128xf32>
    %195 = arith.negf %194 : vector<2x128xf32>
    %196 = math.exp %195 : vector<2x128xf32>
    %cst_48 = arith.constant 1.000000e+00 : f32
    %197 = vector.broadcast %cst_48 : f32 to vector<2x128xf32>
    %198 = arith.addf %197, %196 : vector<2x128xf32>
    %199 = arith.divf %197, %198 : vector<2x128xf32>
    %200 = vector.extract_strided_slice %193 {offsets = [0, 128], sizes = [2, 128], strides = [1, 1]} : vector<2x512xf32> to vector<2x128xf32>
    %201 = arith.negf %200 : vector<2x128xf32>
    %202 = math.exp %201 : vector<2x128xf32>
    %cst_49 = arith.constant 1.000000e+00 : f32
    %203 = vector.broadcast %cst_49 : f32 to vector<2x128xf32>
    %204 = arith.addf %203, %202 : vector<2x128xf32>
    %205 = arith.divf %203, %204 : vector<2x128xf32>
    %206 = vector.extract_strided_slice %193 {offsets = [0, 256], sizes = [2, 128], strides = [1, 1]} : vector<2x512xf32> to vector<2x128xf32>
    %207 = math.tanh %206 : vector<2x128xf32>
    %208 = vector.extract_strided_slice %193 {offsets = [0, 384], sizes = [2, 128], strides = [1, 1]} : vector<2x512xf32> to vector<2x128xf32>
    %209 = arith.negf %208 : vector<2x128xf32>
    %210 = math.exp %209 : vector<2x128xf32>
    %cst_50 = arith.constant 1.000000e+00 : f32
    %211 = vector.broadcast %cst_50 : f32 to vector<2x128xf32>
    %212 = arith.addf %211, %210 : vector<2x128xf32>
    %213 = arith.divf %211, %212 : vector<2x128xf32>
    %214 = arith.mulf %205, %157 : vector<2x128xf32>
    %215 = arith.mulf %199, %207 : vector<2x128xf32>
    %216 = arith.addf %214, %215 : vector<2x128xf32>
    %217 = math.tanh %216 : vector<2x128xf32>
    %218 = arith.mulf %213, %217 : vector<2x128xf32>
    %219 = tpu.concatenate %218, %188 in 1 : vector<2x128xf32>, vector<2x128xf32> -> vector<2x256xf32>
    %c0_51 = arith.constant 0 : index
    %c0_52 = arith.constant 0 : index
    %220 = vector.load %arg4[%c0_51, %c0_52] : memref<256x512xf32, #tpu.memory_space<vmem>>, vector<256x512xf32>
    %cst_53 = arith.constant dense<0.000000e+00> : vector<2x512xf32>
    %221 = tpu.matmul %219, %220, %cst_53 {dimension_numbers = #tpu.dot_dimension_numbers<[1], [0], [0], [1], [0, 0, 1, 1], [], []>} : vector<2x256xf32>, vector<256x512xf32>, vector<2x512xf32> -> vector<2x512xf32>
    %222 = arith.addf %221, %10 : vector<2x512xf32>
    %223 = vector.extract_strided_slice %222 {offsets = [0, 0], sizes = [2, 128], strides = [1, 1]} : vector<2x512xf32> to vector<2x128xf32>
    %224 = arith.negf %223 : vector<2x128xf32>
    %225 = math.exp %224 : vector<2x128xf32>
    %cst_54 = arith.constant 1.000000e+00 : f32
    %226 = vector.broadcast %cst_54 : f32 to vector<2x128xf32>
    %227 = arith.addf %226, %225 : vector<2x128xf32>
    %228 = arith.divf %226, %227 : vector<2x128xf32>
    %229 = vector.extract_strided_slice %222 {offsets = [0, 128], sizes = [2, 128], strides = [1, 1]} : vector<2x512xf32> to vector<2x128xf32>
    %230 = arith.negf %229 : vector<2x128xf32>
    %231 = math.exp %230 : vector<2x128xf32>
    %cst_55 = arith.constant 1.000000e+00 : f32
    %232 = vector.broadcast %cst_55 : f32 to vector<2x128xf32>
    %233 = arith.addf %232, %231 : vector<2x128xf32>
    %234 = arith.divf %232, %233 : vector<2x128xf32>
    %235 = vector.extract_strided_slice %222 {offsets = [0, 256], sizes = [2, 128], strides = [1, 1]} : vector<2x512xf32> to vector<2x128xf32>
    %236 = math.tanh %235 : vector<2x128xf32>
    %237 = vector.extract_strided_slice %222 {offsets = [0, 384], sizes = [2, 128], strides = [1, 1]} : vector<2x512xf32> to vector<2x128xf32>
    %238 = arith.negf %237 : vector<2x128xf32>
    %239 = math.exp %238 : vector<2x128xf32>
    %cst_56 = arith.constant 1.000000e+00 : f32
    %240 = vector.broadcast %cst_56 : f32 to vector<2x128xf32>
    %241 = arith.addf %240, %239 : vector<2x128xf32>
    %242 = arith.divf %240, %241 : vector<2x128xf32>
    %243 = arith.mulf %234, %186 : vector<2x128xf32>
    %244 = arith.mulf %228, %236 : vector<2x128xf32>
    %245 = arith.addf %243, %244 : vector<2x128xf32>
    %246 = math.tanh %245 : vector<2x128xf32>
    %247 = arith.mulf %242, %246 : vector<2x128xf32>
    %248 = vector.extract_strided_slice %7 {offsets = [0, 4, 0], sizes = [2, 1, 512], strides = [1, 1, 1]} : vector<2x8x512xf32> to vector<2x1x512xf32>
    %249 = vector.shape_cast %248 : vector<2x1x512xf32> to vector<2x512xf32>
    %c0_57 = arith.constant 0 : index
    %c0_58 = arith.constant 0 : index
    %250 = vector.load %arg2[%c0_57, %c0_58] : memref<128x512xf32, #tpu.memory_space<vmem>>, vector<128x512xf32>
    %cst_59 = arith.constant dense<0.000000e+00> : vector<2x512xf32>
    %251 = tpu.matmul %218, %250, %cst_59 {dimension_numbers = #tpu.dot_dimension_numbers<[1], [0], [0], [1], [0, 0, 1, 1], [], []>} : vector<2x128xf32>, vector<128x512xf32>, vector<2x512xf32> -> vector<2x512xf32>
    %252 = arith.addf %249, %251 : vector<2x512xf32>
    %253 = vector.extract_strided_slice %252 {offsets = [0, 0], sizes = [2, 128], strides = [1, 1]} : vector<2x512xf32> to vector<2x128xf32>
    %254 = arith.negf %253 : vector<2x128xf32>
    %255 = math.exp %254 : vector<2x128xf32>
    %cst_60 = arith.constant 1.000000e+00 : f32
    %256 = vector.broadcast %cst_60 : f32 to vector<2x128xf32>
    %257 = arith.addf %256, %255 : vector<2x128xf32>
    %258 = arith.divf %256, %257 : vector<2x128xf32>
    %259 = vector.extract_strided_slice %252 {offsets = [0, 128], sizes = [2, 128], strides = [1, 1]} : vector<2x512xf32> to vector<2x128xf32>
    %260 = arith.negf %259 : vector<2x128xf32>
    %261 = math.exp %260 : vector<2x128xf32>
    %cst_61 = arith.constant 1.000000e+00 : f32
    %262 = vector.broadcast %cst_61 : f32 to vector<2x128xf32>
    %263 = arith.addf %262, %261 : vector<2x128xf32>
    %264 = arith.divf %262, %263 : vector<2x128xf32>
    %265 = vector.extract_strided_slice %252 {offsets = [0, 256], sizes = [2, 128], strides = [1, 1]} : vector<2x512xf32> to vector<2x128xf32>
    %266 = math.tanh %265 : vector<2x128xf32>
    %267 = vector.extract_strided_slice %252 {offsets = [0, 384], sizes = [2, 128], strides = [1, 1]} : vector<2x512xf32> to vector<2x128xf32>
    %268 = arith.negf %267 : vector<2x128xf32>
    %269 = math.exp %268 : vector<2x128xf32>
    %cst_62 = arith.constant 1.000000e+00 : f32
    %270 = vector.broadcast %cst_62 : f32 to vector<2x128xf32>
    %271 = arith.addf %270, %269 : vector<2x128xf32>
    %272 = arith.divf %270, %271 : vector<2x128xf32>
    %273 = arith.mulf %264, %216 : vector<2x128xf32>
    %274 = arith.mulf %258, %266 : vector<2x128xf32>
    %275 = arith.addf %273, %274 : vector<2x128xf32>
    %276 = math.tanh %275 : vector<2x128xf32>
    %277 = arith.mulf %272, %276 : vector<2x128xf32>
    %278 = tpu.concatenate %277, %247 in 1 : vector<2x128xf32>, vector<2x128xf32> -> vector<2x256xf32>
    %c0_63 = arith.constant 0 : index
    %c0_64 = arith.constant 0 : index
    %279 = vector.load %arg4[%c0_63, %c0_64] : memref<256x512xf32, #tpu.memory_space<vmem>>, vector<256x512xf32>
    %cst_65 = arith.constant dense<0.000000e+00> : vector<2x512xf32>
    %280 = tpu.matmul %278, %279, %cst_65 {dimension_numbers = #tpu.dot_dimension_numbers<[1], [0], [0], [1], [0, 0, 1, 1], [], []>} : vector<2x256xf32>, vector<256x512xf32>, vector<2x512xf32> -> vector<2x512xf32>
    %281 = arith.addf %280, %10 : vector<2x512xf32>
    %282 = vector.extract_strided_slice %281 {offsets = [0, 0], sizes = [2, 128], strides = [1, 1]} : vector<2x512xf32> to vector<2x128xf32>
    %283 = arith.negf %282 : vector<2x128xf32>
    %284 = math.exp %283 : vector<2x128xf32>
    %cst_66 = arith.constant 1.000000e+00 : f32
    %285 = vector.broadcast %cst_66 : f32 to vector<2x128xf32>
    %286 = arith.addf %285, %284 : vector<2x128xf32>
    %287 = arith.divf %285, %286 : vector<2x128xf32>
    %288 = vector.extract_strided_slice %281 {offsets = [0, 128], sizes = [2, 128], strides = [1, 1]} : vector<2x512xf32> to vector<2x128xf32>
    %289 = arith.negf %288 : vector<2x128xf32>
    %290 = math.exp %289 : vector<2x128xf32>
    %cst_67 = arith.constant 1.000000e+00 : f32
    %291 = vector.broadcast %cst_67 : f32 to vector<2x128xf32>
    %292 = arith.addf %291, %290 : vector<2x128xf32>
    %293 = arith.divf %291, %292 : vector<2x128xf32>
    %294 = vector.extract_strided_slice %281 {offsets = [0, 256], sizes = [2, 128], strides = [1, 1]} : vector<2x512xf32> to vector<2x128xf32>
    %295 = math.tanh %294 : vector<2x128xf32>
    %296 = vector.extract_strided_slice %281 {offsets = [0, 384], sizes = [2, 128], strides = [1, 1]} : vector<2x512xf32> to vector<2x128xf32>
    %297 = arith.negf %296 : vector<2x128xf32>
    %298 = math.exp %297 : vector<2x128xf32>
    %cst_68 = arith.constant 1.000000e+00 : f32
    %299 = vector.broadcast %cst_68 : f32 to vector<2x128xf32>
    %300 = arith.addf %299, %298 : vector<2x128xf32>
    %301 = arith.divf %299, %300 : vector<2x128xf32>
    %302 = arith.mulf %293, %245 : vector<2x128xf32>
    %303 = arith.mulf %287, %295 : vector<2x128xf32>
    %304 = arith.addf %302, %303 : vector<2x128xf32>
    %305 = math.tanh %304 : vector<2x128xf32>
    %306 = arith.mulf %301, %305 : vector<2x128xf32>
    %307 = vector.extract_strided_slice %7 {offsets = [0, 5, 0], sizes = [2, 1, 512], strides = [1, 1, 1]} : vector<2x8x512xf32> to vector<2x1x512xf32>
    %308 = vector.shape_cast %307 : vector<2x1x512xf32> to vector<2x512xf32>
    %c0_69 = arith.constant 0 : index
    %c0_70 = arith.constant 0 : index
    %309 = vector.load %arg2[%c0_69, %c0_70] : memref<128x512xf32, #tpu.memory_space<vmem>>, vector<128x512xf32>
    %cst_71 = arith.constant dense<0.000000e+00> : vector<2x512xf32>
    %310 = tpu.matmul %277, %309, %cst_71 {dimension_numbers = #tpu.dot_dimension_numbers<[1], [0], [0], [1], [0, 0, 1, 1], [], []>} : vector<2x128xf32>, vector<128x512xf32>, vector<2x512xf32> -> vector<2x512xf32>
    %311 = arith.addf %308, %310 : vector<2x512xf32>
    %312 = vector.extract_strided_slice %311 {offsets = [0, 0], sizes = [2, 128], strides = [1, 1]} : vector<2x512xf32> to vector<2x128xf32>
    %313 = arith.negf %312 : vector<2x128xf32>
    %314 = math.exp %313 : vector<2x128xf32>
    %cst_72 = arith.constant 1.000000e+00 : f32
    %315 = vector.broadcast %cst_72 : f32 to vector<2x128xf32>
    %316 = arith.addf %315, %314 : vector<2x128xf32>
    %317 = arith.divf %315, %316 : vector<2x128xf32>
    %318 = vector.extract_strided_slice %311 {offsets = [0, 128], sizes = [2, 128], strides = [1, 1]} : vector<2x512xf32> to vector<2x128xf32>
    %319 = arith.negf %318 : vector<2x128xf32>
    %320 = math.exp %319 : vector<2x128xf32>
    %cst_73 = arith.constant 1.000000e+00 : f32
    %321 = vector.broadcast %cst_73 : f32 to vector<2x128xf32>
    %322 = arith.addf %321, %320 : vector<2x128xf32>
    %323 = arith.divf %321, %322 : vector<2x128xf32>
    %324 = vector.extract_strided_slice %311 {offsets = [0, 256], sizes = [2, 128], strides = [1, 1]} : vector<2x512xf32> to vector<2x128xf32>
    %325 = math.tanh %324 : vector<2x128xf32>
    %326 = vector.extract_strided_slice %311 {offsets = [0, 384], sizes = [2, 128], strides = [1, 1]} : vector<2x512xf32> to vector<2x128xf32>
    %327 = arith.negf %326 : vector<2x128xf32>
    %328 = math.exp %327 : vector<2x128xf32>
    %cst_74 = arith.constant 1.000000e+00 : f32
    %329 = vector.broadcast %cst_74 : f32 to vector<2x128xf32>
    %330 = arith.addf %329, %328 : vector<2x128xf32>
    %331 = arith.divf %329, %330 : vector<2x128xf32>
    %332 = arith.mulf %323, %275 : vector<2x128xf32>
    %333 = arith.mulf %317, %325 : vector<2x128xf32>
    %334 = arith.addf %332, %333 : vector<2x128xf32>
    %335 = math.tanh %334 : vector<2x128xf32>
    %336 = arith.mulf %331, %335 : vector<2x128xf32>
    %337 = tpu.concatenate %336, %306 in 1 : vector<2x128xf32>, vector<2x128xf32> -> vector<2x256xf32>
    %c0_75 = arith.constant 0 : index
    %c0_76 = arith.constant 0 : index
    %338 = vector.load %arg4[%c0_75, %c0_76] : memref<256x512xf32, #tpu.memory_space<vmem>>, vector<256x512xf32>
    %cst_77 = arith.constant dense<0.000000e+00> : vector<2x512xf32>
    %339 = tpu.matmul %337, %338, %cst_77 {dimension_numbers = #tpu.dot_dimension_numbers<[1], [0], [0], [1], [0, 0, 1, 1], [], []>} : vector<2x256xf32>, vector<256x512xf32>, vector<2x512xf32> -> vector<2x512xf32>
    %340 = arith.addf %339, %10 : vector<2x512xf32>
    %341 = vector.extract_strided_slice %340 {offsets = [0, 0], sizes = [2, 128], strides = [1, 1]} : vector<2x512xf32> to vector<2x128xf32>
    %342 = arith.negf %341 : vector<2x128xf32>
    %343 = math.exp %342 : vector<2x128xf32>
    %cst_78 = arith.constant 1.000000e+00 : f32
    %344 = vector.broadcast %cst_78 : f32 to vector<2x128xf32>
    %345 = arith.addf %344, %343 : vector<2x128xf32>
    %346 = arith.divf %344, %345 : vector<2x128xf32>
    %347 = vector.extract_strided_slice %340 {offsets = [0, 128], sizes = [2, 128], strides = [1, 1]} : vector<2x512xf32> to vector<2x128xf32>
    %348 = arith.negf %347 : vector<2x128xf32>
    %349 = math.exp %348 : vector<2x128xf32>
    %cst_79 = arith.constant 1.000000e+00 : f32
    %350 = vector.broadcast %cst_79 : f32 to vector<2x128xf32>
    %351 = arith.addf %350, %349 : vector<2x128xf32>
    %352 = arith.divf %350, %351 : vector<2x128xf32>
    %353 = vector.extract_strided_slice %340 {offsets = [0, 256], sizes = [2, 128], strides = [1, 1]} : vector<2x512xf32> to vector<2x128xf32>
    %354 = math.tanh %353 : vector<2x128xf32>
    %355 = vector.extract_strided_slice %340 {offsets = [0, 384], sizes = [2, 128], strides = [1, 1]} : vector<2x512xf32> to vector<2x128xf32>
    %356 = arith.negf %355 : vector<2x128xf32>
    %357 = math.exp %356 : vector<2x128xf32>
    %cst_80 = arith.constant 1.000000e+00 : f32
    %358 = vector.broadcast %cst_80 : f32 to vector<2x128xf32>
    %359 = arith.addf %358, %357 : vector<2x128xf32>
    %360 = arith.divf %358, %359 : vector<2x128xf32>
    %361 = arith.mulf %352, %304 : vector<2x128xf32>
    %362 = arith.mulf %346, %354 : vector<2x128xf32>
    %363 = arith.addf %361, %362 : vector<2x128xf32>
    %364 = math.tanh %363 : vector<2x128xf32>
    %365 = arith.mulf %360, %364 : vector<2x128xf32>
    %366 = vector.extract_strided_slice %7 {offsets = [0, 6, 0], sizes = [2, 1, 512], strides = [1, 1, 1]} : vector<2x8x512xf32> to vector<2x1x512xf32>
    %367 = vector.shape_cast %366 : vector<2x1x512xf32> to vector<2x512xf32>
    %c0_81 = arith.constant 0 : index
    %c0_82 = arith.constant 0 : index
    %368 = vector.load %arg2[%c0_81, %c0_82] : memref<128x512xf32, #tpu.memory_space<vmem>>, vector<128x512xf32>
    %cst_83 = arith.constant dense<0.000000e+00> : vector<2x512xf32>
    %369 = tpu.matmul %336, %368, %cst_83 {dimension_numbers = #tpu.dot_dimension_numbers<[1], [0], [0], [1], [0, 0, 1, 1], [], []>} : vector<2x128xf32>, vector<128x512xf32>, vector<2x512xf32> -> vector<2x512xf32>
    %370 = arith.addf %367, %369 : vector<2x512xf32>
    %371 = vector.extract_strided_slice %370 {offsets = [0, 0], sizes = [2, 128], strides = [1, 1]} : vector<2x512xf32> to vector<2x128xf32>
    %372 = arith.negf %371 : vector<2x128xf32>
    %373 = math.exp %372 : vector<2x128xf32>
    %cst_84 = arith.constant 1.000000e+00 : f32
    %374 = vector.broadcast %cst_84 : f32 to vector<2x128xf32>
    %375 = arith.addf %374, %373 : vector<2x128xf32>
    %376 = arith.divf %374, %375 : vector<2x128xf32>
    %377 = vector.extract_strided_slice %370 {offsets = [0, 128], sizes = [2, 128], strides = [1, 1]} : vector<2x512xf32> to vector<2x128xf32>
    %378 = arith.negf %377 : vector<2x128xf32>
    %379 = math.exp %378 : vector<2x128xf32>
    %cst_85 = arith.constant 1.000000e+00 : f32
    %380 = vector.broadcast %cst_85 : f32 to vector<2x128xf32>
    %381 = arith.addf %380, %379 : vector<2x128xf32>
    %382 = arith.divf %380, %381 : vector<2x128xf32>
    %383 = vector.extract_strided_slice %370 {offsets = [0, 256], sizes = [2, 128], strides = [1, 1]} : vector<2x512xf32> to vector<2x128xf32>
    %384 = math.tanh %383 : vector<2x128xf32>
    %385 = vector.extract_strided_slice %370 {offsets = [0, 384], sizes = [2, 128], strides = [1, 1]} : vector<2x512xf32> to vector<2x128xf32>
    %386 = arith.negf %385 : vector<2x128xf32>
    %387 = math.exp %386 : vector<2x128xf32>
    %cst_86 = arith.constant 1.000000e+00 : f32
    %388 = vector.broadcast %cst_86 : f32 to vector<2x128xf32>
    %389 = arith.addf %388, %387 : vector<2x128xf32>
    %390 = arith.divf %388, %389 : vector<2x128xf32>
    %391 = arith.mulf %382, %334 : vector<2x128xf32>
    %392 = arith.mulf %376, %384 : vector<2x128xf32>
    %393 = arith.addf %391, %392 : vector<2x128xf32>
    %394 = math.tanh %393 : vector<2x128xf32>
    %395 = arith.mulf %390, %394 : vector<2x128xf32>
    %396 = tpu.concatenate %395, %365 in 1 : vector<2x128xf32>, vector<2x128xf32> -> vector<2x256xf32>
    %c0_87 = arith.constant 0 : index
    %c0_88 = arith.constant 0 : index
    %397 = vector.load %arg4[%c0_87, %c0_88] : memref<256x512xf32, #tpu.memory_space<vmem>>, vector<256x512xf32>
    %cst_89 = arith.constant dense<0.000000e+00> : vector<2x512xf32>
    %398 = tpu.matmul %396, %397, %cst_89 {dimension_numbers = #tpu.dot_dimension_numbers<[1], [0], [0], [1], [0, 0, 1, 1], [], []>} : vector<2x256xf32>, vector<256x512xf32>, vector<2x512xf32> -> vector<2x512xf32>
    %399 = arith.addf %398, %10 : vector<2x512xf32>
    %400 = vector.extract_strided_slice %399 {offsets = [0, 0], sizes = [2, 128], strides = [1, 1]} : vector<2x512xf32> to vector<2x128xf32>
    %401 = arith.negf %400 : vector<2x128xf32>
    %402 = math.exp %401 : vector<2x128xf32>
    %cst_90 = arith.constant 1.000000e+00 : f32
    %403 = vector.broadcast %cst_90 : f32 to vector<2x128xf32>
    %404 = arith.addf %403, %402 : vector<2x128xf32>
    %405 = arith.divf %403, %404 : vector<2x128xf32>
    %406 = vector.extract_strided_slice %399 {offsets = [0, 128], sizes = [2, 128], strides = [1, 1]} : vector<2x512xf32> to vector<2x128xf32>
    %407 = arith.negf %406 : vector<2x128xf32>
    %408 = math.exp %407 : vector<2x128xf32>
    %cst_91 = arith.constant 1.000000e+00 : f32
    %409 = vector.broadcast %cst_91 : f32 to vector<2x128xf32>
    %410 = arith.addf %409, %408 : vector<2x128xf32>
    %411 = arith.divf %409, %410 : vector<2x128xf32>
    %412 = vector.extract_strided_slice %399 {offsets = [0, 256], sizes = [2, 128], strides = [1, 1]} : vector<2x512xf32> to vector<2x128xf32>
    %413 = math.tanh %412 : vector<2x128xf32>
    %414 = vector.extract_strided_slice %399 {offsets = [0, 384], sizes = [2, 128], strides = [1, 1]} : vector<2x512xf32> to vector<2x128xf32>
    %415 = arith.negf %414 : vector<2x128xf32>
    %416 = math.exp %415 : vector<2x128xf32>
    %cst_92 = arith.constant 1.000000e+00 : f32
    %417 = vector.broadcast %cst_92 : f32 to vector<2x128xf32>
    %418 = arith.addf %417, %416 : vector<2x128xf32>
    %419 = arith.divf %417, %418 : vector<2x128xf32>
    %420 = arith.mulf %411, %363 : vector<2x128xf32>
    %421 = arith.mulf %405, %413 : vector<2x128xf32>
    %422 = arith.addf %420, %421 : vector<2x128xf32>
    %423 = math.tanh %422 : vector<2x128xf32>
    %424 = arith.mulf %419, %423 : vector<2x128xf32>
    %425 = vector.extract_strided_slice %7 {offsets = [0, 7, 0], sizes = [2, 1, 512], strides = [1, 1, 1]} : vector<2x8x512xf32> to vector<2x1x512xf32>
    %426 = vector.shape_cast %425 : vector<2x1x512xf32> to vector<2x512xf32>
    %c0_93 = arith.constant 0 : index
    %c0_94 = arith.constant 0 : index
    %427 = vector.load %arg2[%c0_93, %c0_94] : memref<128x512xf32, #tpu.memory_space<vmem>>, vector<128x512xf32>
    %cst_95 = arith.constant dense<0.000000e+00> : vector<2x512xf32>
    %428 = tpu.matmul %395, %427, %cst_95 {dimension_numbers = #tpu.dot_dimension_numbers<[1], [0], [0], [1], [0, 0, 1, 1], [], []>} : vector<2x128xf32>, vector<128x512xf32>, vector<2x512xf32> -> vector<2x512xf32>
    %429 = arith.addf %426, %428 : vector<2x512xf32>
    %430 = vector.extract_strided_slice %429 {offsets = [0, 0], sizes = [2, 128], strides = [1, 1]} : vector<2x512xf32> to vector<2x128xf32>
    %431 = arith.negf %430 : vector<2x128xf32>
    %432 = math.exp %431 : vector<2x128xf32>
    %cst_96 = arith.constant 1.000000e+00 : f32
    %433 = vector.broadcast %cst_96 : f32 to vector<2x128xf32>
    %434 = arith.addf %433, %432 : vector<2x128xf32>
    %435 = arith.divf %433, %434 : vector<2x128xf32>
    %436 = vector.extract_strided_slice %429 {offsets = [0, 128], sizes = [2, 128], strides = [1, 1]} : vector<2x512xf32> to vector<2x128xf32>
    %437 = arith.negf %436 : vector<2x128xf32>
    %438 = math.exp %437 : vector<2x128xf32>
    %cst_97 = arith.constant 1.000000e+00 : f32
    %439 = vector.broadcast %cst_97 : f32 to vector<2x128xf32>
    %440 = arith.addf %439, %438 : vector<2x128xf32>
    %441 = arith.divf %439, %440 : vector<2x128xf32>
    %442 = vector.extract_strided_slice %429 {offsets = [0, 256], sizes = [2, 128], strides = [1, 1]} : vector<2x512xf32> to vector<2x128xf32>
    %443 = math.tanh %442 : vector<2x128xf32>
    %444 = vector.extract_strided_slice %429 {offsets = [0, 384], sizes = [2, 128], strides = [1, 1]} : vector<2x512xf32> to vector<2x128xf32>
    %445 = arith.negf %444 : vector<2x128xf32>
    %446 = math.exp %445 : vector<2x128xf32>
    %cst_98 = arith.constant 1.000000e+00 : f32
    %447 = vector.broadcast %cst_98 : f32 to vector<2x128xf32>
    %448 = arith.addf %447, %446 : vector<2x128xf32>
    %449 = arith.divf %447, %448 : vector<2x128xf32>
    %450 = arith.mulf %441, %393 : vector<2x128xf32>
    %451 = arith.mulf %435, %443 : vector<2x128xf32>
    %452 = arith.addf %450, %451 : vector<2x128xf32>
    %453 = math.tanh %452 : vector<2x128xf32>
    %454 = arith.mulf %449, %453 : vector<2x128xf32>
    %455 = tpu.concatenate %454, %424 in 1 : vector<2x128xf32>, vector<2x128xf32> -> vector<2x256xf32>
    %c0_99 = arith.constant 0 : index
    %c0_100 = arith.constant 0 : index
    %456 = vector.load %arg4[%c0_99, %c0_100] : memref<256x512xf32, #tpu.memory_space<vmem>>, vector<256x512xf32>
    %cst_101 = arith.constant dense<0.000000e+00> : vector<2x512xf32>
    %457 = tpu.matmul %455, %456, %cst_101 {dimension_numbers = #tpu.dot_dimension_numbers<[1], [0], [0], [1], [0, 0, 1, 1], [], []>} : vector<2x256xf32>, vector<256x512xf32>, vector<2x512xf32> -> vector<2x512xf32>
    %458 = arith.addf %457, %10 : vector<2x512xf32>
    %459 = vector.extract_strided_slice %458 {offsets = [0, 0], sizes = [2, 128], strides = [1, 1]} : vector<2x512xf32> to vector<2x128xf32>
    %460 = arith.negf %459 : vector<2x128xf32>
    %461 = math.exp %460 : vector<2x128xf32>
    %cst_102 = arith.constant 1.000000e+00 : f32
    %462 = vector.broadcast %cst_102 : f32 to vector<2x128xf32>
    %463 = arith.addf %462, %461 : vector<2x128xf32>
    %464 = arith.divf %462, %463 : vector<2x128xf32>
    %465 = vector.extract_strided_slice %458 {offsets = [0, 128], sizes = [2, 128], strides = [1, 1]} : vector<2x512xf32> to vector<2x128xf32>
    %466 = arith.negf %465 : vector<2x128xf32>
    %467 = math.exp %466 : vector<2x128xf32>
    %cst_103 = arith.constant 1.000000e+00 : f32
    %468 = vector.broadcast %cst_103 : f32 to vector<2x128xf32>
    %469 = arith.addf %468, %467 : vector<2x128xf32>
    %470 = arith.divf %468, %469 : vector<2x128xf32>
    %471 = vector.extract_strided_slice %458 {offsets = [0, 256], sizes = [2, 128], strides = [1, 1]} : vector<2x512xf32> to vector<2x128xf32>
    %472 = math.tanh %471 : vector<2x128xf32>
    %473 = vector.extract_strided_slice %458 {offsets = [0, 384], sizes = [2, 128], strides = [1, 1]} : vector<2x512xf32> to vector<2x128xf32>
    %474 = arith.negf %473 : vector<2x128xf32>
    %475 = math.exp %474 : vector<2x128xf32>
    %cst_104 = arith.constant 1.000000e+00 : f32
    %476 = vector.broadcast %cst_104 : f32 to vector<2x128xf32>
    %477 = arith.addf %476, %475 : vector<2x128xf32>
    %478 = arith.divf %476, %477 : vector<2x128xf32>
    %479 = arith.mulf %470, %422 : vector<2x128xf32>
    %480 = arith.mulf %464, %472 : vector<2x128xf32>
    %481 = arith.addf %479, %480 : vector<2x128xf32>
    %482 = math.tanh %481 : vector<2x128xf32>
    %483 = arith.mulf %478, %482 : vector<2x128xf32>
    %c0_105 = arith.constant 0 : index
    %c0_106 = arith.constant 0 : index
    %484 = vector.load %arg6[%c0_105, %c0_106] : memref<128x128xf32, #tpu.memory_space<vmem>>, vector<128x128xf32>
    %cst_107 = arith.constant dense<0.000000e+00> : vector<2x128xf32>
    %485 = tpu.matmul %483, %484, %cst_107 {dimension_numbers = #tpu.dot_dimension_numbers<[1], [0], [0], [1], [0, 0, 1, 1], [], []>} : vector<2x128xf32>, vector<128x128xf32>, vector<2x128xf32> -> vector<2x128xf32>
    %c0_108 = arith.constant 0 : index
    %c0_109 = arith.constant 0 : index
    %486 = vector.load %arg7[%c0_108, %c0_109] : memref<1x128xf32, #tpu.memory_space<vmem>>, vector<1x128xf32>
    %487 = vector.broadcast %486 : vector<1x128xf32> to vector<2x128xf32>
    %488 = arith.addf %485, %487 : vector<2x128xf32>
    %c0_110 = arith.constant 0 : index
    %c0_111 = arith.constant 0 : index
    %489 = vector.load %arg8[%c0_110, %c0_111] : memref<2x128xf32, #tpu.memory_space<vmem>>, vector<2x128xf32>
    tpu.vector_store %arg8[%c0_110, %c0_111], %488 {strides = array<i32>} : memref<2x128xf32, #tpu.memory_space<vmem>>, vector<2x128xf32>,
    return
  }
}

</mosaic_0001>

<bundles_post_ra>
// kernel: lstm_model_forward.1
= control target key start
LH: loop header
LB: loop body
LE: loop exit
PB: predicated region body
PF: predicated region fallthrough
CT: control target
= control target key end

     0   :  { %s8906_s0 = inlined_call_operand.vmem [shape: f32[2,8,384], index: 0, kind: input, shape index: {}]   ;;  %s8907_s1 = inlined_call_operand.vmem [shape: f32[384,512], index: 1, kind: input, shape index: {}]   ;;  %s8908_s2 = inlined_call_operand.vmem [shape: f32[128,512], index: 2, kind: input, shape index: {}]   ;;  %s8909_s3 = inlined_call_operand.vmem [shape: f32[1,512], index: 3, kind: input, shape index: {}]   ;;  %s8910_s4 = inlined_call_operand.vmem [shape: f32[256,512], index: 4, kind: input, shape index: {}]   ;;  %s8911_s5 = inlined_call_operand.vmem [shape: f32[1,512], index: 5, kind: input, shape index: {}]   ;;  %s8912_s6 = inlined_call_operand.vmem [shape: f32[128,128], index: 6, kind: input, shape index: {}]   ;;  %s8913_s7 = inlined_call_operand.vmem [shape: f32[1,128], index: 7, kind: input, shape index: {}]   ;;  %s8914_s8 = inlined_call_operand.hbm [shape: f32[2,128], index: 8, kind: output, shape index: {}]  }
   0x1   :  { %v37_v0 = vld [vmem:[%s8907_s1 + $0x8] sm:$0xff]  ;;  %v39_v2 = vld [vmem:[%s8907_s1 + $0x18] sm:$0xff]  ;;  %v36_v5 = vld [vmem:[%s8907_s1] sm:$0xff] }
   0x2   :  { %v41_v1 = vld [vmem:[%s8907_s1 + $0x28] sm:$0xff]  ;;  %v43_v4 = vld [vmem:[%s8907_s1 + $0x38] sm:$0xff]  ;;  %v40_v6 = vld [vmem:[%s8907_s1 + $0x20] sm:$0xff] }
   0x3   :  { %v4220_v3 = vpack.c.bf16 %v41_v1, %v37_v0  ;;  %v4316_v7 = vpack.c.bf16 %v43_v4, %v39_v2  ;;  %v4222_v8 = vpack.c.bf16 %v40_v6, %v36_v5  ;;  %v38_v9 = vld [vmem:[%s8907_s1 + $0x10] sm:$0xff]  ;;  %v45_v11 = vld [vmem:[%s8907_s1 + $0x48] sm:$0xff]  ;;  %v47_v14 = vld [vmem:[%s8907_s1 + $0x58] sm:$0xff] }
   0x4   :  { %v42_v10 = vld [vmem:[%s8907_s1 + $0x30] sm:$0xff]  ;;  %v49_v13 = vld [vmem:[%s8907_s1 + $0x68] sm:$0xff]  ;;  %v51_v15 = vld [vmem:[%s8907_s1 + $0x78] sm:$0xff] }
   0x5   :  { %4221 = vmatprep.subr.bf16.mxu0 %v4220_v3  ;;  %v4318_v12 = vpack.c.bf16 %v42_v10, %v38_v9  ;;  %4317 = vmatprep.subr.bf16.mxu1 %v4316_v7  ;;  %v4224_v16 = vpack.c.bf16 %v49_v13, %v45_v11  ;;  %v4320_v17 = vpack.c.bf16 %v51_v15, %v47_v14  ;;  %v44_v18 = vld [vmem:[%s8907_s1 + $0x40] sm:$0xff]  ;;  %v46_v20 = vld [vmem:[%s8907_s1 + $0x50] sm:$0xff]  ;;  %v53_v23 = vld [vmem:[%s8907_s1 + $0x88] sm:$0xff] }
   0x6   :  { %4223 = vmatpush1.bf16.msra.mxu0 %v4222_v8  ;;  %v48_v19 = vld [vmem:[%s8907_s1 + $0x60] sm:$0xff]  ;;  %v50_v22 = vld [vmem:[%s8907_s1 + $0x70] sm:$0xff]  ;;  %v57_v24 = vld [vmem:[%s8907_s1 + $0xa8] sm:$0xff] }
   0x7   :  { %4319 = vmatpush1.bf16.msra.mxu1 %v4318_v12  ;;  %v4226_v21 = vpack.c.bf16 %v48_v19, %v44_v18  ;;  %4225 = vmatprep.subr.bf16.mxu0 %v4224_v16  ;;  %v4322_v25 = vpack.c.bf16 %v50_v22, %v46_v20  ;;  %v4228_v26 = vpack.c.bf16 %v57_v24, %v53_v23  ;;  %v55_v27 = vld [vmem:[%s8907_s1 + $0x98] sm:$0xff]  ;;  %v52_v29 = vld [vmem:[%s8907_s1 + $0x80] sm:$0xff]  ;;  %v54_v32 = vld [vmem:[%s8907_s1 + $0x90] sm:$0xff] }
   0x8   :  { %4321 = vmatprep.subr.bf16.mxu1 %v4320_v17  ;;  %v59_v28 = vld [vmem:[%s8907_s1 + $0xb8] sm:$0xff]  ;;  %v56_v31 = vld [vmem:[%s8907_s1 + $0xa0] sm:$0xff]  ;;  %v58_v33 = vld [vmem:[%s8907_s1 + $0xb0] sm:$0xff] }
   0x9   :  { %v4324_v30 = vpack.c.bf16 %v59_v28, %v55_v27  ;;  %v4230_v34 = vpack.c.bf16 %v56_v31, %v52_v29  ;;  %v61_v35 = vld [vmem:[%s8907_s1 + $0xc8] sm:$0xff]  ;;  %v63_v37 = vld [vmem:[%s8907_s1 + $0xd8] sm:$0xff]  ;;  %v4326_v38 = vpack.c.bf16 %v58_v33, %v54_v32  ;;  %v60_v41 = vld [vmem:[%s8907_s1 + $0xc0] sm:$0xff] }
   0xa   :  { %4227 = vmatpush1.bf16.msra.mxu0 %v4226_v21  ;;  %v65_v36 = vld [vmem:[%s8907_s1 + $0xe8] sm:$0xff]  ;;  %v67_v40 = vld [vmem:[%s8907_s1 + $0xf8] sm:$0xff]  ;;  %v64_v42 = vld [vmem:[%s8907_s1 + $0xe0] sm:$0xff] }
   0xb   :  { %4323 = vmatpush1.bf16.msra.mxu1 %v4322_v25  ;;  %4229 = vmatprep.subr.bf16.mxu0 %v4228_v26  ;;  %v4232_v39 = vpack.c.bf16 %v65_v36, %v61_v35  ;;  %v4328_v43 = vpack.c.bf16 %v67_v40, %v63_v37  ;;  %v62_v44 = vld [vmem:[%s8907_s1 + $0xd0] sm:$0xff]  ;;  %v69_v46 = vld [vmem:[%s8907_s1 + $0x108] sm:$0xff]  ;;  %v71_v48 = vld [vmem:[%s8907_s1 + $0x118] sm:$0xff]  ;;  %v4234_v50 = vpack.c.bf16 %v64_v42, %v60_v41 }
   0xc   :  { %4325 = vmatprep.subr.bf16.mxu1 %v4324_v30  ;;  %v66_v45 = vld [vmem:[%s8907_s1 + $0xf0] sm:$0xff]  ;;  %v73_v47 = vld [vmem:[%s8907_s1 + $0x128] sm:$0xff]  ;;  %v75_v49 = vld [vmem:[%s8907_s1 + $0x138] sm:$0xff] }
   0xd   :  { %v4330_v51 = vpack.c.bf16 %v66_v45, %v62_v44  ;;  %v4236_v52 = vpack.c.bf16 %v73_v47, %v69_v46  ;;  %v68_v53 = vld [vmem:[%s8907_s1 + $0x100] sm:$0xff]  ;;  %v70_v55 = vld [vmem:[%s8907_s1 + $0x110] sm:$0xff]  ;;  %v4332_v56 = vpack.c.bf16 %v75_v49, %v71_v48  ;;  %v77_v58 = vld [vmem:[%s8907_s1 + $0x148] sm:$0xff] }
   0xe   :  { %4231 = vmatpush1.bf16.msra.mxu0 %v4230_v34  ;;  %v72_v54 = vld [vmem:[%s8907_s1 + $0x120] sm:$0xff]  ;;  %v74_v57 = vld [vmem:[%s8907_s1 + $0x130] sm:$0xff]  ;;  %v81_v59 = vld [vmem:[%s8907_s1 + $0x168] sm:$0xff] }
   0xf   :  { %4327 = vmatpush1.bf16.msra.mxu1 %v4326_v38  ;;  %4233 = vmatprep.subr.bf16.mxu0 %v4232_v39  ;;  %v79_v60 = vld [vmem:[%s8907_s1 + $0x158] sm:$0xff]  ;;  %v4238_v62 = vpack.c.bf16 %v72_v54, %v68_v53  ;;  %v4334_v63 = vpack.c.bf16 %v74_v57, %v70_v55  ;;  %v4240_v0 = vpack.c.bf16 %v81_v59, %v77_v58  ;;  %v76_v1 = vld [vmem:[%s8907_s1 + $0x140] sm:$0xff]  ;;  %v78_v3 = vld [vmem:[%s8907_s1 + $0x150] sm:$0xff] }
  0x10   :  { %4329 = vmatprep.subr.bf16.mxu1 %v4328_v43  ;;  %v83_v61 = vld [vmem:[%s8907_s1 + $0x178] sm:$0xff]  ;;  %v80_v2 = vld [vmem:[%s8907_s1 + $0x160] sm:$0xff]  ;;  %v82_v5 = vld [vmem:[%s8907_s1 + $0x170] sm:$0xff] }
  0x11   :  { %v4336_v4 = vpack.c.bf16 %v83_v61, %v79_v60  ;;  %v85_v6 = vld [vmem:[%s8907_s1 + $0x188] sm:$0xff]  ;;  %v87_v8 = vld [vmem:[%s8907_s1 + $0x198] sm:$0xff]  ;;  %v4242_v10 = vpack.c.bf16 %v80_v2, %v76_v1  ;;  %v4338_v11 = vpack.c.bf16 %v82_v5, %v78_v3  ;;  %v84_v13 = vld [vmem:[%s8907_s1 + $0x180] sm:$0xff] }
  0x12   :  { %4235 = vmatpush1.bf16.msra.mxu0 %v4234_v50  ;;  %v89_v7 = vld [vmem:[%s8907_s1 + $0x1a8] sm:$0xff]  ;;  %v91_v9 = vld [vmem:[%s8907_s1 + $0x1b8] sm:$0xff]  ;;  %v88_v14 = vld [vmem:[%s8907_s1 + $0x1a0] sm:$0xff] }
  0x13   :  { %4331 = vmatpush1.bf16.msra.mxu1 %v4330_v51  ;;  %4237 = vmatprep.subr.bf16.mxu0 %v4236_v52  ;;  %v4244_v12 = vpack.c.bf16 %v89_v7, %v85_v6  ;;  %v86_v15 = vld [vmem:[%s8907_s1 + $0x190] sm:$0xff]  ;;  %v4340_v16 = vpack.c.bf16 %v91_v9, %v87_v8  ;;  %v93_v18 = vld [vmem:[%s8907_s1 + $0x1c8] sm:$0xff]  ;;  %v95_v20 = vld [vmem:[%s8907_s1 + $0x1d8] sm:$0xff]  ;;  %v4246_v22 = vpack.c.bf16 %v88_v14, %v84_v13 }
  0x14   :  { %4333 = vmatprep.subr.bf16.mxu1 %v4332_v56  ;;  %v90_v17 = vld [vmem:[%s8907_s1 + $0x1b0] sm:$0xff]  ;;  %v97_v19 = vld [vmem:[%s8907_s1 + $0x1e8] sm:$0xff]  ;;  %v99_v21 = vld [vmem:[%s8907_s1 + $0x1f8] sm:$0xff] }
  0x15   :  { %v4342_v23 = vpack.c.bf16 %v90_v17, %v86_v15  ;;  %v4248_v24 = vpack.c.bf16 %v97_v19, %v93_v18  ;;  %v92_v25 = vld [vmem:[%s8907_s1 + $0x1c0] sm:$0xff]  ;;  %v94_v27 = vld [vmem:[%s8907_s1 + $0x1d0] sm:$0xff]  ;;  %v4344_v28 = vpack.c.bf16 %v99_v21, %v95_v20  ;;  %v101_v30 = vld [vmem:[%s8907_s1 + $0x208] sm:$0xff] }
  0x16   :  { %4239 = vmatpush1.bf16.msra.mxu0 %v4238_v62  ;;  %v96_v26 = vld [vmem:[%s8907_s1 + $0x1e0] sm:$0xff]  ;;  %v98_v29 = vld [vmem:[%s8907_s1 + $0x1f0] sm:$0xff]  ;;  %v105_v31 = vld [vmem:[%s8907_s1 + $0x228] sm:$0xff] }
  0x17   :  { %4335 = vmatpush1.bf16.msra.mxu1 %v4334_v63  ;;  %4241 = vmatprep.subr.bf16.mxu0 %v4240_v0  ;;  %v103_v32 = vld [vmem:[%s8907_s1 + $0x218] sm:$0xff]  ;;  %v4250_v34 = vpack.c.bf16 %v96_v26, %v92_v25  ;;  %v4346_v35 = vpack.c.bf16 %v98_v29, %v94_v27  ;;  %v4252_v36 = vpack.c.bf16 %v105_v31, %v101_v30  ;;  %v100_v37 = vld [vmem:[%s8907_s1 + $0x200] sm:$0xff]  ;;  %v102_v39 = vld [vmem:[%s8907_s1 + $0x210] sm:$0xff] }
  0x18   :  { %4337 = vmatprep.subr.bf16.mxu1 %v4336_v4  ;;  %v107_v33 = vld [vmem:[%s8907_s1 + $0x238] sm:$0xff]  ;;  %v104_v38 = vld [vmem:[%s8907_s1 + $0x220] sm:$0xff]  ;;  %v106_v41 = vld [vmem:[%s8907_s1 + $0x230] sm:$0xff] }
  0x19   :  { %v4348_v40 = vpack.c.bf16 %v107_v33, %v103_v32  ;;  %v109_v42 = vld [vmem:[%s8907_s1 + $0x248] sm:$0xff]  ;;  %v111_v44 = vld [vmem:[%s8907_s1 + $0x258] sm:$0xff]  ;;  %v4254_v46 = vpack.c.bf16 %v104_v38, %v100_v37  ;;  %v4350_v47 = vpack.c.bf16 %v106_v41, %v102_v39  ;;  %v108_v49 = vld [vmem:[%s8907_s1 + $0x240] sm:$0xff] }
  0x1a   :  { %4243 = vmatpush1.bf16.msra.mxu0 %v4242_v10  ;;  %v113_v43 = vld [vmem:[%s8907_s1 + $0x268] sm:$0xff]  ;;  %v115_v45 = vld [vmem:[%s8907_s1 + $0x278] sm:$0xff]  ;;  %v112_v50 = vld [vmem:[%s8907_s1 + $0x260] sm:$0xff] }
  0x1b   :  { %4339 = vmatpush1.bf16.msra.mxu1 %v4338_v11  ;;  %4245 = vmatprep.subr.bf16.mxu0 %v4244_v12  ;;  %v4256_v48 = vpack.c.bf16 %v113_v43, %v109_v42  ;;  %v110_v51 = vld [vmem:[%s8907_s1 + $0x250] sm:$0xff]  ;;  %v4352_v52 = vpack.c.bf16 %v115_v45, %v111_v44  ;;  %v117_v54 = vld [vmem:[%s8907_s1 + $0x288] sm:$0xff]  ;;  %v119_v56 = vld [vmem:[%s8907_s1 + $0x298] sm:$0xff]  ;;  %v4258_v58 = vpack.c.bf16 %v112_v50, %v108_v49 }
  0x1c   :  { %4341 = vmatprep.subr.bf16.mxu1 %v4340_v16  ;;  %v114_v53 = vld [vmem:[%s8907_s1 + $0x270] sm:$0xff]  ;;  %v121_v55 = vld [vmem:[%s8907_s1 + $0x2a8] sm:$0xff]  ;;  %v123_v57 = vld [vmem:[%s8907_s1 + $0x2b8] sm:$0xff] }
  0x1d   :  { %v4354_v59 = vpack.c.bf16 %v114_v53, %v110_v51  ;;  %v4260_v60 = vpack.c.bf16 %v121_v55, %v117_v54  ;;  %v116_v61 = vld [vmem:[%s8907_s1 + $0x280] sm:$0xff]  ;;  %v118_v63 = vld [vmem:[%s8907_s1 + $0x290] sm:$0xff]  ;;  %v4356_v0 = vpack.c.bf16 %v123_v57, %v119_v56  ;;  %v125_v2 = vld [vmem:[%s8907_s1 + $0x2c8] sm:$0xff] }
  0x1e   :  { %4247 = vmatpush1.bf16.msra.mxu0 %v4246_v22  ;;  %v120_v62 = vld [vmem:[%s8907_s1 + $0x2a0] sm:$0xff]  ;;  %v122_v1 = vld [vmem:[%s8907_s1 + $0x2b0] sm:$0xff]  ;;  %v129_v3 = vld [vmem:[%s8907_s1 + $0x2e8] sm:$0xff] }
  0x1f   :  { %4343 = vmatpush1.bf16.msra.mxu1 %v4342_v23  ;;  %4249 = vmatprep.subr.bf16.mxu0 %v4248_v24  ;;  %v127_v4 = vld [vmem:[%s8907_s1 + $0x2d8] sm:$0xff]  ;;  %v4262_v6 = vpack.c.bf16 %v120_v62, %v116_v61  ;;  %v124_v7 = vld [vmem:[%s8907_s1 + $0x2c0] sm:$0xff]  ;;  %v4358_v8 = vpack.c.bf16 %v122_v1, %v118_v63  ;;  %v4264_v9 = vpack.c.bf16 %v129_v3, %v125_v2  ;;  %v126_v11 = vld [vmem:[%s8907_s1 + $0x2d0] sm:$0xff] }
  0x20   :  { %4345 = vmatprep.subr.bf16.mxu1 %v4344_v28  ;;  %v131_v5 = vld [vmem:[%s8907_s1 + $0x2f8] sm:$0xff]  ;;  %v128_v10 = vld [vmem:[%s8907_s1 + $0x2e0] sm:$0xff]  ;;  %v130_v12 = vld [vmem:[%s8907_s1 + $0x2f0] sm:$0xff] }
  0x21   :  { %v4360_v13 = vpack.c.bf16 %v131_v5, %v127_v4  ;;  %v133_v14 = vld [vmem:[%s8907_s1 + $0x308] sm:$0xff]  ;;  %v135_v17 = vld [vmem:[%s8907_s1 + $0x318] sm:$0xff]  ;;  %v4266_v19 = vpack.c.bf16 %v128_v10, %v124_v7  ;;  %v4362_v20 = vpack.c.bf16 %v130_v12, %v126_v11  ;;  %v132_v22 = vld [vmem:[%s8907_s1 + $0x300] sm:$0xff] }
  0x22   :  { %4251 = vmatpush1.bf16.msra.mxu0 %v4250_v34  ;;  %v137_v15 = vld [vmem:[%s8907_s1 + $0x328] sm:$0xff]  ;;  %v139_v18 = vld [vmem:[%s8907_s1 + $0x338] sm:$0xff]  ;;  %v136_v23 = vld [vmem:[%s8907_s1 + $0x320] sm:$0xff] }
  0x23   :  { %4347 = vmatpush1.bf16.msra.mxu1 %v4346_v35  ;;  %4253 = vmatprep.subr.bf16.mxu0 %v4252_v36  ;;  %v31_v16 = vld [vmem:[%s8906_s0 + $0x8] sm:$0xff]  ;;  %v4268_v21 = vpack.c.bf16 %v137_v15, %v133_v14  ;;  %v134_v24 = vld [vmem:[%s8907_s1 + $0x310] sm:$0xff]  ;;  %v4364_v25 = vpack.c.bf16 %v139_v18, %v135_v17  ;;  %v143_v29 = vld [vmem:[%s8907_s1 + $0x358] sm:$0xff]  ;;  %v4270_v31 = vpack.c.bf16 %v136_v23, %v132_v22 }
  0x24   :  { %4349 = vmatprep.subr.bf16.mxu1 %v4348_v40  ;;  %314 = vmatprep.mubr.f32.mxu0 %v31_v16  ;;  %v138_v26 = vld [vmem:[%s8907_s1 + $0x330] sm:$0xff]  ;;  %v141_v27 = vld [vmem:[%s8907_s1 + $0x348] sm:$0xff]  ;;  %v147_v30 = vld [vmem:[%s8907_s1 + $0x378] sm:$0xff] }
  0x25   :  { %468 = vmatprep.mubr.f32.mxu1 %v31_v16  ;;  %v145_v28 = vld [vmem:[%s8907_s1 + $0x368] sm:$0xff]  ;;  %v4366_v32 = vpack.c.bf16 %v138_v26, %v134_v24  ;;  %v140_v34 = vld [vmem:[%s8907_s1 + $0x340] sm:$0xff]  ;;  %v142_v36 = vld [vmem:[%s8907_s1 + $0x350] sm:$0xff]  ;;  %v4368_v37 = vpack.c.bf16 %v147_v30, %v143_v29 }
  0x26   :  { %4255 = vmatpush1.bf16.msra.mxu0 %v4254_v46  ;;  %v4272_v33 = vpack.c.bf16 %v145_v28, %v141_v27  ;;  %v144_v35 = vld [vmem:[%s8907_s1 + $0x360] sm:$0xff]  ;;  %v146_v38 = vld [vmem:[%s8907_s1 + $0x370] sm:$0xff]  ;;  %v149_v39 = vld [vmem:[%s8907_s1 + $0x388] sm:$0xff] }
  0x27   :  { %4351 = vmatpush1.bf16.msra.mxu1 %v4350_v47  ;;  %4257 = vmatprep.subr.bf16.mxu0 %v4256_v48  ;;  %v153_v40 = vld [vmem:[%s8907_s1 + $0x3a8] sm:$0xff]  ;;  %v151_v41 = vld [vmem:[%s8907_s1 + $0x398] sm:$0xff]  ;;  %v4274_v43 = vpack.c.bf16 %v144_v35, %v140_v34  ;;  %v4370_v44 = vpack.c.bf16 %v146_v38, %v142_v36  ;;  %v148_v46 = vld [vmem:[%s8907_s1 + $0x380] sm:$0xff] }
  0x28   :  { %4353 = vmatprep.subr.bf16.mxu1 %v4352_v52  ;;  %v155_v42 = vld [vmem:[%s8907_s1 + $0x3b8] sm:$0xff]  ;;  %v4276_v45 = vpack.c.bf16 %v153_v40, %v149_v39  ;;  %v152_v47 = vld [vmem:[%s8907_s1 + $0x3a0] sm:$0xff]  ;;  %v150_v48 = vld [vmem:[%s8907_s1 + $0x390] sm:$0xff] }
  0x29   :  { %v4372_v49 = vpack.c.bf16 %v155_v42, %v151_v41  ;;  %v154_v50 = vld [vmem:[%s8907_s1 + $0x3b0] sm:$0xff]  ;;  %v157_v51 = vld [vmem:[%s8907_s1 + $0x3c8] sm:$0xff]  ;;  %v159_v53 = vld [vmem:[%s8907_s1 + $0x3d8] sm:$0xff]  ;;  %v4278_v55 = vpack.c.bf16 %v152_v47, %v148_v46 }
  0x2a   :  { %4259 = vmatpush1.bf16.msra.mxu0 %v4258_v58  ;;  %v161_v52 = vld [vmem:[%s8907_s1 + $0x3e8] sm:$0xff]  ;;  %v163_v54 = vld [vmem:[%s8907_s1 + $0x3f8] sm:$0xff]  ;;  %v4374_v56 = vpack.c.bf16 %v154_v50, %v150_v48  ;;  %v156_v58 = vld [vmem:[%s8907_s1 + $0x3c0] sm:$0xff] }
  0x2b   :  { %4355 = vmatpush1.bf16.msra.mxu1 %v4354_v59  ;;  %4261 = vmatprep.subr.bf16.mxu0 %v4260_v60  ;;  %v4280_v57 = vpack.c.bf16 %v161_v52, %v157_v51  ;;  %v160_v59 = vld [vmem:[%s8907_s1 + $0x3e0] sm:$0xff]  ;;  %v158_v60 = vld [vmem:[%s8907_s1 + $0x3d0] sm:$0xff]  ;;  %v4376_v61 = vpack.c.bf16 %v163_v54, %v159_v53  ;;  %v165_v63 = vld [vmem:[%s8907_s1 + $0x408] sm:$0xff]  ;;  %v8915_v52 = vmov 0.0  }
  0x2c   :  { %4357 = vmatprep.subr.bf16.mxu1 %v4356_v0  ;;  %v162_v62 = vld [vmem:[%s8907_s1 + $0x3f0] sm:$0xff]  ;;  %v169_v0 = vld [vmem:[%s8907_s1 + $0x428] sm:$0xff]  ;;  %v167_v1 = vld [vmem:[%s8907_s1 + $0x418] sm:$0xff]  ;;  %v4282_v3 = vpack.c.bf16 %v160_v59, %v156_v58 }
  0x2d   :  { %v171_v2 = vld [vmem:[%s8907_s1 + $0x438] sm:$0xff]  ;;  %v4378_v4 = vpack.c.bf16 %v162_v62, %v158_v60  ;;  %v4284_v5 = vpack.c.bf16 %v169_v0, %v165_v63  ;;  %v168_v7 = vld [vmem:[%s8907_s1 + $0x420] sm:$0xff]  ;;  %v170_v10 = vld [vmem:[%s8907_s1 + $0x430] sm:$0xff] }
  0x2e   :  { %4263 = vmatpush1.bf16.msra.mxu0 %v4262_v6  ;;  %v164_v6 = vld [vmem:[%s8907_s1 + $0x400] sm:$0xff]  ;;  %v173_v11 = vld [vmem:[%s8907_s1 + $0x448] sm:$0xff]  ;;  %v179_v14 = vld [vmem:[%s8907_s1 + $0x478] sm:$0xff] }
  0x2f   :  { %4359 = vmatpush1.bf16.msra.mxu1 %v4358_v8  ;;  %4265 = vmatprep.subr.bf16.mxu0 %v4264_v9  ;;  %v166_v8 = vld [vmem:[%s8907_s1 + $0x410] sm:$0xff]  ;;  %v4380_v9 = vpack.c.bf16 %v171_v2, %v167_v1  ;;  %v177_v12 = vld [vmem:[%s8907_s1 + $0x468] sm:$0xff]  ;;  %v30_v15 = vld [vmem:[%s8906_s0] sm:$0xff]  ;;  %v4286_v16 = vpack.c.bf16 %v168_v7, %v164_v6 }
  0x30   :  { %4361 = vmatprep.subr.bf16.mxu1 %v4360_v13  ;;  %v175_v13 = vld [vmem:[%s8907_s1 + $0x458] sm:$0xff]  ;;  %v4382_v17 = vpack.c.bf16 %v170_v10, %v166_v8  ;;  %v4288_v18 = vpack.c.bf16 %v177_v12, %v173_v11  ;;  %v178_v23 = vld [vmem:[%s8907_s1 + $0x470] sm:$0xff]  ;;  %v181_v24 = vld [vmem:[%s8907_s1 + $0x488] sm:$0xff] }
  0x31   :  { %v4384_v22 = vpack.c.bf16 %v179_v14, %v175_v13  ;;  %v183_v26 = vld [vmem:[%s8907_s1 + $0x498] sm:$0xff]  ;;  %v34_v28 = vld [vmem:[%s8906_s0 + $0x20] sm:$0xff]  ;;  %v182_v35 = vld [vmem:[%s8907_s1 + $0x490] sm:$0xff] }
  0x32   :  { %4267 = vmatpush1.bf16.msra.mxu0 %v4266_v19  ;;  %v172_v19 = vld [vmem:[%s8907_s1 + $0x440] sm:$0xff]  ;;  %v187_v27 = vld [vmem:[%s8907_s1 + $0x4b8] sm:$0xff]  ;;  %v189_v38 = vld [vmem:[%s8907_s1 + $0x4c8] sm:$0xff] }
  0x33   :  { %4363 = vmatpush1.bf16.msra.mxu1 %v4362_v20  ;;  %4269 = vmatprep.subr.bf16.mxu0 %v4268_v21  ;;  %v176_v20 = vld [vmem:[%s8907_s1 + $0x460] sm:$0xff]  ;;  %v174_v21 = vld [vmem:[%s8907_s1 + $0x450] sm:$0xff]  ;;  %v33_v30 = vld [vmem:[%s8906_s0 + $0x18] sm:$0xff]  ;;  %v4388_v36 = vpack.c.bf16 %v187_v27, %v183_v26 }
  0x34   :  { %4365 = vmatprep.subr.bf16.mxu1 %v4364_v25  ;;  %v185_v25 = vld [vmem:[%s8907_s1 + $0x4a8] sm:$0xff]  ;;  %v4290_v29 = vpack.c.bf16 %v176_v20, %v172_v19  ;;  %v184_v34 = vld [vmem:[%s8907_s1 + $0x4a0] sm:$0xff]  ;;  %v191_v40 = vld [vmem:[%s8907_s1 + $0x4d8] sm:$0xff] }
  0x35   :  { %v193_v39 = vld [vmem:[%s8907_s1 + $0x4e8] sm:$0xff]  ;;  %v195_v41 = vld [vmem:[%s8907_s1 + $0x4f8] sm:$0xff]  ;;  %v192_v46 = vld [vmem:[%s8907_s1 + $0x4e0] sm:$0xff] }
  0x36   :  { %4271 = vmatpush1.bf16.msra.mxu0 %v4270_v31  ;;  %v4386_v31 = vpack.c.bf16 %v178_v23, %v174_v21  ;;  %v190_v47 = vld [vmem:[%s8907_s1 + $0x4d0] sm:$0xff]  ;;  %v4392_v48 = vpack.c.bf16 %v195_v41, %v191_v40  ;;  %v197_v50 = vld [vmem:[%s8907_s1 + $0x508] sm:$0xff]  ;;  %v199_v53 = vld [vmem:[%s8907_s1 + $0x518] sm:$0xff] }
  0x37   :  { %4367 = vmatpush1.bf16.msra.mxu1 %v4366_v32  ;;  %4273 = vmatprep.subr.bf16.mxu0 %v4272_v33  ;;  %v4292_v32 = vpack.c.bf16 %v185_v25, %v181_v24  ;;  %v180_v33 = vld [vmem:[%s8907_s1 + $0x480] sm:$0xff]  ;;  %v201_v51 = vld [vmem:[%s8907_s1 + $0x528] sm:$0xff]  ;;  %v203_v54 = vld [vmem:[%s8907_s1 + $0x538] sm:$0xff] }
  0x38   :  { %4369 = vmatprep.subr.bf16.mxu1 %v4368_v37  ;;  %v186_v37 = vld [vmem:[%s8907_s1 + $0x4b0] sm:$0xff]  ;;  %v4294_v42 = vpack.c.bf16 %v184_v34, %v180_v33  ;;  %v196_v58 = vld [vmem:[%s8907_s1 + $0x500] sm:$0xff]  ;;  %v205_v63 = vld [vmem:[%s8907_s1 + $0x548] sm:$0xff] }
  0x39   :  { %v200_v59 = vld [vmem:[%s8907_s1 + $0x520] sm:$0xff]  ;;  %v198_v60 = vld [vmem:[%s8907_s1 + $0x510] sm:$0xff]  ;;  %v209_v0 = vld [vmem:[%s8907_s1 + $0x568] sm:$0xff] }
  0x3a   :  { %4275 = vmatpush1.bf16.msra.mxu0 %v4274_v43  ;;  %v4390_v43 = vpack.c.bf16 %v186_v37, %v182_v35  ;;  %v202_v62 = vld [vmem:[%s8907_s1 + $0x530] sm:$0xff]  ;;  %v207_v1 = vld [vmem:[%s8907_s1 + $0x558] sm:$0xff]  ;;  %v204_v6 = vld [vmem:[%s8907_s1 + $0x540] sm:$0xff] }
  0x3b   :  { %4371 = vmatpush1.bf16.msra.mxu1 %v4370_v44  ;;  %4277 = vmatprep.subr.bf16.mxu0 %v4276_v45  ;;  %v4296_v44 = vpack.c.bf16 %v193_v39, %v189_v38  ;;  %v188_v45 = vld [vmem:[%s8907_s1 + $0x4c0] sm:$0xff]  ;;  %v211_v2 = vld [vmem:[%s8907_s1 + $0x578] sm:$0xff]  ;;  %v206_v8 = vld [vmem:[%s8907_s1 + $0x550] sm:$0xff] }
  0x3c   :  { %4373 = vmatprep.subr.bf16.mxu1 %v4372_v49  ;;  %v194_v49 = vld [vmem:[%s8907_s1 + $0x4f0] sm:$0xff]  ;;  %v208_v7 = vld [vmem:[%s8907_s1 + $0x560] sm:$0xff]  ;;  %v213_v11 = vld [vmem:[%s8907_s1 + $0x588] sm:$0xff] }
  0x3d   :  { %v210_v10 = vld [vmem:[%s8907_s1 + $0x570] sm:$0xff]  ;;  %v217_v12 = vld [vmem:[%s8907_s1 + $0x5a8] sm:$0xff]  ;;  %v215_v13 = vld [vmem:[%s8907_s1 + $0x598] sm:$0xff] }
  0x3e   :  { %4279 = vmatpush1.bf16.msra.mxu0 %v4278_v55  ;;  %v4298_v55 = vpack.c.bf16 %v192_v46, %v188_v45  ;;  %v219_v14 = vld [vmem:[%s8907_s1 + $0x5b8] sm:$0xff]  ;;  %v216_v19 = vld [vmem:[%s8907_s1 + $0x5a0] sm:$0xff]  ;;  %v214_v20 = vld [vmem:[%s8907_s1 + $0x590] sm:$0xff] }
  0x3f   :  { %4375 = vmatpush1.bf16.msra.mxu1 %v4374_v56  ;;  %4281 = vmatprep.subr.bf16.mxu0 %v4280_v57  ;;  %v4394_v56 = vpack.c.bf16 %v194_v49, %v190_v47  ;;  %v4300_v57 = vpack.c.bf16 %v201_v51, %v197_v50  ;;  %v4404_v21 = vpack.c.bf16 %v219_v14, %v215_v13  ;;  %v221_v23 = vld [vmem:[%s8907_s1 + $0x5c8] sm:$0xff]  ;;  %v223_v25 = vld [vmem:[%s8907_s1 + $0x5d8] sm:$0xff] }
  0x40   :  { %4377 = vmatprep.subr.bf16.mxu1 %v4376_v61  ;;  %v4396_v61 = vpack.c.bf16 %v203_v54, %v199_v53  ;;  %v225_v24 = vld [vmem:[%s8907_s1 + $0x5e8] sm:$0xff]  ;;  %v227_v26 = vld [vmem:[%s8907_s1 + $0x5f8] sm:$0xff] }
  0x42   :  { %4283 = vmatpush1.bf16.msra.mxu0 %v4282_v3  ;;  %v4302_v3 = vpack.c.bf16 %v200_v59, %v196_v58 }
  0x43   :  { %4379 = vmatpush1.bf16.msra.mxu1 %v4378_v4  ;;  %4285 = vmatprep.subr.bf16.mxu0 %v4284_v5  ;;  %v4398_v4 = vpack.c.bf16 %v202_v62, %v198_v60  ;;  %v4304_v5 = vpack.c.bf16 %v209_v0, %v205_v63 }
  0x44   :  { %4381 = vmatprep.subr.bf16.mxu1 %v4380_v9  ;;  %v4400_v9 = vpack.c.bf16 %v211_v2, %v207_v1 }
  0x45   :  { %315 = vmatmul.mubr.f32.vlgmr.msra.gmra.mrb[0].mxu0 %v30_v15 }
  0x46   :  { %4287 = vmatpush1.bf16.msra.mxu0 %v4286_v16  ;;  %469 = vmatmul.mubr.f32.vlgmr.msra.gmra.mrb[0].mxu1 %v30_v15  ;;  %v4306_v15 = vpack.c.bf16 %v208_v7, %v204_v6  ;;  %v4402_v16 = vpack.c.bf16 %v210_v10, %v206_v8 }
  0x47   :  { %4383 = vmatpush1.bf16.msra.mxu1 %v4382_v17  ;;  %4289 = vmatprep.subr.bf16.mxu0 %v4288_v18  ;;  %v4308_v17 = vpack.c.bf16 %v217_v12, %v213_v11  ;;  %v212_v18 = vld [vmem:[%s8907_s1 + $0x580] sm:$0xff] }
  0x48   :  { %4385 = vmatprep.subr.bf16.mxu1 %v4384_v22  ;;  %320 = vmatprep.mubr.f32.mxu0 %v34_v28  ;;  %v218_v22 = vld [vmem:[%s8907_s1 + $0x5b0] sm:$0xff] }
  0x49   :  { %474 = vmatprep.mubr.f32.mxu1 %v34_v28  ;;  %321 = vmatmul.mubr.f32.gmra.mrb[2].mxu0 %v33_v30 }
  0x4a   :  { %4291 = vmatpush1.bf16.msra.mxu0 %v4290_v29  ;;  %475 = vmatmul.mubr.f32.gmra.mrb[2].mxu1 %v33_v30 }
  0x4b   :  { %4387 = vmatpush1.bf16.msra.mxu1 %v4386_v31  ;;  %4293 = vmatprep.subr.bf16.mxu0 %v4292_v32 }
  0x4c   :  { %4389 = vmatprep.subr.bf16.mxu1 %v4388_v36  ;;  %391 = vmatprep.mubr.f32.mxu0 %v8915_v52 }
  0x4d   :  { %545 = vmatprep.mubr.f32.mxu1 %v8915_v52 }
  0x4e   :  { %4295 = vmatpush1.bf16.msra.mxu0 %v4294_v42 }
  0x4f   :  { %4391 = vmatpush1.bf16.msra.mxu1 %v4390_v43  ;;  %4297 = vmatprep.subr.bf16.mxu0 %v4296_v44 }
  0x50   :  { %4393 = vmatprep.subr.bf16.mxu1 %v4392_v48 }
  0x52   :  { %4299 = vmatpush1.bf16.msra.mxu0 %v4298_v55 }
  0x53   :  { %4395 = vmatpush1.bf16.msra.mxu1 %v4394_v56  ;;  %4301 = vmatprep.subr.bf16.mxu0 %v4300_v57 }
  0x54   :  { %4397 = vmatprep.subr.bf16.mxu1 %v4396_v61 }
  0x56   :  { %4303 = vmatpush1.bf16.msra.mxu0 %v4302_v3 }
  0x57   :  { %4399 = vmatpush1.bf16.msra.mxu1 %v4398_v4  ;;  %4305 = vmatprep.subr.bf16.mxu0 %v4304_v5 }
  0x58   :  { %4401 = vmatprep.subr.bf16.mxu1 %v4400_v9 }
  0x59   :  { %13 = vsyncpa [#allocation3], 0  ;;  %v4310_v27 = vpack.c.bf16 %v216_v19, %v212_v18  ;;  %v4406_v28 = vpack.c.bf16 %v218_v22, %v214_v20  ;;  %v4312_v29 = vpack.c.bf16 %v225_v24, %v221_v23  ;;  %v220_v30 = vld [vmem:[%s8907_s1 + $0x5c0] sm:$0xff]  ;;  %v222_v32 = vld [vmem:[%s8907_s1 + $0x5d0] sm:$0xff]  ;;  %v4408_v33 = vpack.c.bf16 %v227_v26, %v223_v25  ;;  %s6403_s24 = smov [#allocation2]  }
  0x5a   :  { %4307 = vmatpush1.bf16.msra.mxu0 %v4306_v15  ;;  %v224_v31 = vld [vmem:[%s8907_s1 + $0x5e0] sm:$0xff]  ;;  %v226_v34 = vld [vmem:[%s8907_s1 + $0x5f0] sm:$0xff]  ;;  %v581_v35 = vld [vmem:[%s8908_s2 + $0x8] sm:$0xff]  ;;  %vm861_vm0 = vcmask 1041409   ;;  %vm1381_vm1 = vcmask 1042434   ;;  %vm1785_vm2 = vcmask 1043459  }
  0x5b   :  { %4403 = vmatpush1.bf16.msra.mxu1 %v4402_v16  ;;  %4309 = vmatprep.subr.bf16.mxu0 %v4308_v17  ;;  %v585_v36 = vld [vmem:[%s8908_s2 + $0x28] sm:$0xff]  ;;  %v583_v37 = vld [vmem:[%s8908_s2 + $0x18] sm:$0xff]  ;;  %v4314_v39 = vpack.c.bf16 %v224_v31, %v220_v30  ;;  %v4410_v40 = vpack.c.bf16 %v226_v34, %v222_v32  ;;  %v580_v42 = vld [vmem:[%s8908_s2] sm:$0xff]  ;;  %vm2190_vm3 = vcmask 1044484   ;;  %vm2595_vm4 = vcmask 1045509   ;;  %s4086_s25 = sshll.u32 %s6403_s24, 4  ;;  %s4087_s25 = int_to_ptr.vmem [resolvable:$true] %s4086_s25 }
  0x5c   :  { %4405 = vmatprep.subr.bf16.mxu1 %v4404_v21  ;;  %v587_v38 = vld [vmem:[%s8908_s2 + $0x38] sm:$0xff]  ;;  %v7051_v41 = vpack.c.bf16 %v585_v36, %v581_v35  ;;  %v584_v43 = vld [vmem:[%s8908_s2 + $0x20] sm:$0xff]  ;;  %v582_v45 = vld [vmem:[%s8908_s2 + $0x10] sm:$0xff]  ;;  %vm3000_vm5 = vcmask 1046534   ;;  %vm3405_vm6 = vcmask 1047559   ;;  %vm3812_vm7 = vcmask 1040384   ;;  %p6381_p1 = scmp.lt.s32.totalorder %s4087_s25, %s4087_s25 }
  0x5d   :  { %v7059_v44 = vpack.c.bf16 %v587_v38, %v583_v37  ;;  %v586_v46 = vld [vmem:[%s8908_s2 + $0x30] sm:$0xff]  ;;  %v589_v47 = vld [vmem:[%s8908_s2 + $0x48] sm:$0xff]  ;;  %v591_v49 = vld [vmem:[%s8908_s2 + $0x58] sm:$0xff]  ;;  %v7082_v53 = vpack.c.bf16 %v584_v43, %v580_v42  ;;  %vm6402_vm8 = vmmov 0  }
  0x5e   :  { %4311 = vmatpush1.bf16.msra.mxu0 %v4310_v27  ;;  %9066 = vst [vmem:[#allocation5_spill] sm:$0xff] %v7051_v41  ;;  %v593_v48 = vld [vmem:[%s8908_s2 + $0x68] sm:$0xff]  ;;  %v595_v50 = vld [vmem:[%s8908_s2 + $0x78] sm:$0xff]  ;;  %v32_v51 = vld [vmem:[%s8906_s0 + $0x10] sm:$0xff]  ;;  %v7085_v54 = vpack.c.bf16 %v586_v46, %v582_v45 }
  0x5f   :  { %4407 = vmatpush1.bf16.msra.mxu1 %v4406_v28  ;;  %4313 = vmatprep.subr.bf16.mxu0 %v4312_v29  ;;  %9067 = vst [vmem:[#allocation6_spill] sm:$0xff] %v7059_v44  ;;  %v588_v55 = vld [vmem:[%s8908_s2 + $0x40] sm:$0xff]  ;;  %v590_v57 = vld [vmem:[%s8908_s2 + $0x50] sm:$0xff]  ;;  %v7097_v58 = vpack.c.bf16 %v593_v48, %v589_v47  ;;  %v7099_v59 = vpack.c.bf16 %v595_v50, %v591_v49  ;;  %v597_v61 = vld [vmem:[%s8908_s2 + $0x88] sm:$0xff] }
  0x60   :  { %4409 = vmatprep.subr.bf16.mxu1 %v4408_v33  ;;  %v592_v56 = vld [vmem:[%s8908_s2 + $0x60] sm:$0xff]  ;;  %v594_v60 = vld [vmem:[%s8908_s2 + $0x70] sm:$0xff]  ;;  %v601_v62 = vld [vmem:[%s8908_s2 + $0xa8] sm:$0xff] }
  0x61   :  { %v599_v63 = vld [vmem:[%s8908_s2 + $0x98] sm:$0xff]  ;;  %v35_v1 = vld [vmem:[%s8906_s0 + $0x28] sm:$0xff]  ;;  %v7120_v2 = vpack.c.bf16 %v592_v56, %v588_v55  ;;  %v7124_v3 = vpack.c.bf16 %v594_v60, %v590_v57  ;;  %v7126_v4 = vpack.c.bf16 %v601_v62, %v597_v61  ;;  %v596_v5 = vld [vmem:[%s8908_s2 + $0x80] sm:$0xff]  ;;  %s6376_s0 = scalar_lea.vmem %s4087_s25, 32 }
  0x62   :  { %4315 = vmatpush1.bf16.msra.mxu0 %v4314_v39  ;;  %v603_v0 = vld [vmem:[%s8908_s2 + $0xb8] sm:$0xff]  ;;  %v600_v6 = vld [vmem:[%s8908_s2 + $0xa0] sm:$0xff]  ;;  %v598_v7 = vld [vmem:[%s8908_s2 + $0x90] sm:$0xff]  ;;  %p6377_p0 = scmp.ne.s32.totalorder %s4087_s25, %s6376_s0  ;;  %p6382_p2 = scmp.lt.s32.totalorder %s6376_s0, %s6376_s0 }
  0x63   :  { %4411 = vmatpush1.bf16.msra.mxu1 %v4410_v40  ;;  %4413 = vmatprep.subr.bf16.mxu0 %v7051_v41  ;;  %v7139_v8 = vpack.c.bf16 %v603_v0, %v599_v63  ;;  %v602_v9 = vld [vmem:[%s8908_s2 + $0xb0] sm:$0xff]  ;;  %v605_v10 = vld [vmem:[%s8908_s2 + $0xc8] sm:$0xff]  ;;  %v607_v12 = vld [vmem:[%s8908_s2 + $0xd8] sm:$0xff]  ;;  %v7158_v14 = vpack.c.bf16 %v600_v6, %v596_v5 }
  0x64   :  { %4445 = vmatprep.subr.bf16.mxu1 %v7059_v44  ;;  %v609_v11 = vld [vmem:[%s8908_s2 + $0xe8] sm:$0xff]  ;;  %v611_v13 = vld [vmem:[%s8908_s2 + $0xf8] sm:$0xff]  ;;  %v7162_v15 = vpack.c.bf16 %v602_v9, %v598_v7  ;;  %v604_v17 = vld [vmem:[%s8908_s2 + $0xc0] sm:$0xff]  ;;  %p6383_p3 = por %p6382_p2, %p6381_p1 }
  0x65   :  { %392 = vmatmul.mubr.f32.vlgmr.msra.gmra.mrb[0].mxu0 %v32_v51  ;;  %v7164_v16 = vpack.c.bf16 %v609_v11, %v605_v10  ;;  %v608_v18 = vld [vmem:[%s8908_s2 + $0xe0] sm:$0xff]  ;;  %v606_v19 = vld [vmem:[%s8908_s2 + $0xd0] sm:$0xff]  ;;  %v7176_v20 = vpack.c.bf16 %v611_v13, %v607_v12  ;;  %v613_v22 = vld [vmem:[%s8908_s2 + $0x108] sm:$0xff] }
  0x66   :  { %546 = vmatmul.mubr.f32.vlgmr.msra.gmra.mrb[0].mxu1 %v32_v51  ;;  %4415 = vmatpush1.bf16.msra.mxu0 %v7082_v53  ;;  %v610_v21 = vld [vmem:[%s8908_s2 + $0xf0] sm:$0xff]  ;;  %v617_v23 = vld [vmem:[%s8908_s2 + $0x128] sm:$0xff]  ;;  %v615_v24 = vld [vmem:[%s8908_s2 + $0x118] sm:$0xff]  ;;  %v7196_v26 = vpack.c.bf16 %v608_v18, %v604_v17  ;;  %p6384_p4 = pnand %p6383_p3, %p6377_p0 }
  0x67   :  { %4447 = vmatpush1.bf16.msra.mxu1 %v7085_v54  ;;  %397 = vmatprep.mubr.f32.mxu0 %v8915_v52  ;;  %v619_v25 = vld [vmem:[%s8908_s2 + $0x138] sm:$0xff]  ;;  %v7200_v27 = vpack.c.bf16 %v610_v21, %v606_v19  ;;  %v7202_v28 = vpack.c.bf16 %v617_v23, %v613_v22  ;;  %v612_v29 = vld [vmem:[%s8908_s2 + $0x100] sm:$0xff]  ;;  %v614_v31 = vld [vmem:[%s8908_s2 + $0x110] sm:$0xff] }
  0x68   :  { %4417 = vmatprep.subr.bf16.mxu0 %v7097_v58  ;;  %4449 = vmatprep.subr.bf16.mxu1 %v7099_v59  ;;  %v616_v30 = vld [vmem:[%s8908_s2 + $0x120] sm:$0xff]  ;;  %v7214_v32 = vpack.c.bf16 %v619_v25, %v615_v24  ;;  %v618_v33 = vld [vmem:[%s8908_s2 + $0x130] sm:$0xff]  ;;  %v621_v34 = vld [vmem:[%s8908_s2 + $0x148] sm:$0xff] }
  0x69   :  { %398 = vmatmul.mubr.f32.gmra.mrb[2].mxu0 %v35_v1  ;;  %551 = vmatprep.mubr.f32.mxu1 %v8915_v52  ;;  %v625_v35 = vld [vmem:[%s8908_s2 + $0x168] sm:$0xff]  ;;  %v623_v36 = vld [vmem:[%s8908_s2 + $0x158] sm:$0xff]  ;;  %v7232_v38 = vpack.c.bf16 %v616_v30, %v612_v29  ;;  %v7236_v39 = vpack.c.bf16 %v618_v33, %v614_v31  ;;  %v620_v42 = vld [vmem:[%s8908_s2 + $0x140] sm:$0xff] }
  0x6a   :  { %4419 = vmatpush1.bf16.msra.mxu0 %v7120_v2  ;;  %552 = vmatmul.mubr.f32.gmra.mrb[2].mxu1 %v35_v1  ;;  %v627_v37 = vld [vmem:[%s8908_s2 + $0x178] sm:$0xff]  ;;  %v7238_v40 = vpack.c.bf16 %v625_v35, %v621_v34  ;;  %v624_v43 = vld [vmem:[%s8908_s2 + $0x160] sm:$0xff]  ;;  %v622_v45 = vld [vmem:[%s8908_s2 + $0x150] sm:$0xff] }
  0x6b   :  { %4451 = vmatpush1.bf16.msra.mxu1 %v7124_v3  ;;  %4421 = vmatprep.subr.bf16.mxu0 %v7126_v4  ;;  %v7250_v46 = vpack.c.bf16 %v627_v37, %v623_v36  ;;  %v626_v47 = vld [vmem:[%s8908_s2 + $0x170] sm:$0xff]  ;;  %v629_v48 = vld [vmem:[%s8908_s2 + $0x188] sm:$0xff]  ;;  %v631_v50 = vld [vmem:[%s8908_s2 + $0x198] sm:$0xff]  ;;  %v7268_v55 = vpack.c.bf16 %v624_v43, %v620_v42 }
  0x6c   :  { %4453 = vmatprep.subr.bf16.mxu1 %v7139_v8  ;;  %708 = vmatprep.mubr.f32.mxu0 %v8915_v52  ;;  %v633_v49 = vld [vmem:[%s8908_s2 + $0x1a8] sm:$0xff]  ;;  %v635_v51 = vld [vmem:[%s8908_s2 + $0x1b8] sm:$0xff]  ;;  %v7272_v56 = vpack.c.bf16 %v626_v47, %v622_v45  ;;  %v628_v60 = vld [vmem:[%s8908_s2 + $0x180] sm:$0xff] }
  0x6d   :  { %779 = vmatprep.mubr.f32.mxu1 %v8915_v52  ;;  %v7274_v57 = vpack.c.bf16 %v633_v49, %v629_v48  ;;  %v632_v61 = vld [vmem:[%s8908_s2 + $0x1a0] sm:$0xff]  ;;  %v630_v62 = vld [vmem:[%s8908_s2 + $0x190] sm:$0xff]  ;;  %v7286_v63 = vpack.c.bf16 %v635_v51, %v631_v50  ;;  %v637_v1 = vld [vmem:[%s8908_s2 + $0x1c8] sm:$0xff] }
  0x6e   :  { %4423 = vmatpush1.bf16.msra.mxu0 %v7158_v14  ;;  %v634_v0 = vld [vmem:[%s8908_s2 + $0x1b0] sm:$0xff]  ;;  %v641_v5 = vld [vmem:[%s8908_s2 + $0x1e8] sm:$0xff]  ;;  %v639_v6 = vld [vmem:[%s8908_s2 + $0x1d8] sm:$0xff]  ;;  %v7304_v9 = vpack.c.bf16 %v632_v61, %v628_v60 }
  0x6f   :  { %4455 = vmatpush1.bf16.msra.mxu1 %v7162_v15  ;;  %4425 = vmatprep.subr.bf16.mxu0 %v7164_v16  ;;  %v643_v7 = vld [vmem:[%s8908_s2 + $0x1f8] sm:$0xff]  ;;  %v7308_v10 = vpack.c.bf16 %v634_v0, %v630_v62  ;;  %v7310_v11 = vpack.c.bf16 %v641_v5, %v637_v1  ;;  %v636_v12 = vld [vmem:[%s8908_s2 + $0x1c0] sm:$0xff]  ;;  %v638_v18 = vld [vmem:[%s8908_s2 + $0x1d0] sm:$0xff] }
  0x70   :  { %4457 = vmatprep.subr.bf16.mxu1 %v7176_v20  ;;  %v640_v13 = vld [vmem:[%s8908_s2 + $0x1e0] sm:$0xff]  ;;  %v7319_v17 = vpack.c.bf16 %v643_v7, %v639_v6  ;;  %v642_v19 = vld [vmem:[%s8908_s2 + $0x1f0] sm:$0xff]  ;;  %v865_v23 = vld [vmem:[%s8910_s4 + $0x8] sm:$0xff] }
  0x71   :  { %v7328_v21 = vpack.c.bf16 %v640_v13, %v636_v12  ;;  %v7332_v22 = vpack.c.bf16 %v642_v19, %v638_v18  ;;  %v869_v24 = vld [vmem:[%s8910_s4 + $0x28] sm:$0xff]  ;;  %v867_v25 = vld [vmem:[%s8910_s4 + $0x18] sm:$0xff]  ;;  %v864_v31 = vld [vmem:[%s8910_s4] sm:$0xff] }
  0x72   :  { %4427 = vmatpush1.bf16.msra.mxu0 %v7196_v26  ;;  %v7350_v29 = vpack.c.bf16 %v869_v24, %v865_v23  ;;  %v871_v30 = vld [vmem:[%s8910_s4 + $0x38] sm:$0xff]  ;;  %v868_v33 = vld [vmem:[%s8910_s4 + $0x20] sm:$0xff]  ;;  %v866_v36 = vld [vmem:[%s8910_s4 + $0x10] sm:$0xff] }
  0x73   :  { %4459 = vmatpush1.bf16.msra.mxu1 %v7200_v27  ;;  %4429 = vmatprep.subr.bf16.mxu0 %v7202_v28  ;;  %v7361_v34 = vpack.c.bf16 %v871_v30, %v867_v25  ;;  %v7363_v35 = vpack.c.bf16 %v868_v33, %v864_v31  ;;  %v870_v37 = vld [vmem:[%s8910_s4 + $0x30] sm:$0xff]  ;;  %v873_v42 = vld [vmem:[%s8910_s4 + $0x48] sm:$0xff]  ;;  %v875_v47 = vld [vmem:[%s8910_s4 + $0x58] sm:$0xff] }
  0x74   :  { %4461 = vmatprep.subr.bf16.mxu1 %v7214_v32  ;;  %v7375_v43 = vpack.c.bf16 %v870_v37, %v866_v36  ;;  %v877_v45 = vld [vmem:[%s8910_s4 + $0x68] sm:$0xff]  ;;  %v879_v48 = vld [vmem:[%s8910_s4 + $0x78] sm:$0xff]  ;;  %v872_v51 = vld [vmem:[%s8910_s4 + $0x40] sm:$0xff] }
  0x75   :  { %9068 = vst [vmem:[#allocation7_spill] sm:$0xff] %v7363_v35  ;;  %v7388_v49 = vpack.c.bf16 %v877_v45, %v873_v42  ;;  %v7390_v50 = vpack.c.bf16 %v879_v48, %v875_v47  ;;  %v876_v60 = vld [vmem:[%s8910_s4 + $0x60] sm:$0xff]  ;;  %v874_v61 = vld [vmem:[%s8910_s4 + $0x50] sm:$0xff]  ;;  %v881_v1 = vld [vmem:[%s8910_s4 + $0x88] sm:$0xff] }
  0x76   :  { %4431 = vmatpush1.bf16.msra.mxu0 %v7232_v38  ;;  %9069 = vst [vmem:[#allocation8_spill] sm:$0xff] %v7375_v43  ;;  %v7402_v62 = vpack.c.bf16 %v876_v60, %v872_v51  ;;  %v878_v0 = vld [vmem:[%s8910_s4 + $0x70] sm:$0xff]  ;;  %v885_v5 = vld [vmem:[%s8910_s4 + $0xa8] sm:$0xff]  ;;  %v883_v12 = vld [vmem:[%s8910_s4 + $0x98] sm:$0xff] }
  0x77   :  { %4463 = vmatpush1.bf16.msra.mxu1 %v7236_v39  ;;  %4433 = vmatprep.subr.bf16.mxu0 %v7238_v40  ;;  %9070 = vst [vmem:[#allocation9_spill] sm:$0xff] %v7388_v49  ;;  %9071 = vst [vmem:[#allocation10_spill] sm:$0xff] %v7390_v50  ;;  %v7415_v6 = vpack.c.bf16 %v878_v0, %v874_v61  ;;  %v7417_v7 = vpack.c.bf16 %v885_v5, %v881_v1  ;;  %v887_v13 = vld [vmem:[%s8910_s4 + $0xb8] sm:$0xff]  ;;  %v880_v18 = vld [vmem:[%s8910_s4 + $0x80] sm:$0xff] }
  0x78   :  { %4465 = vmatprep.subr.bf16.mxu1 %v7250_v46  ;;  %9072 = vst [vmem:[#allocation11_spill] sm:$0xff] %v7402_v62  ;;  %v7428_v19 = vpack.c.bf16 %v887_v13, %v883_v12  ;;  %v884_v23 = vld [vmem:[%s8910_s4 + $0xa0] sm:$0xff]  ;;  %v882_v24 = vld [vmem:[%s8910_s4 + $0x90] sm:$0xff]  ;;  %v889_v31 = vld [vmem:[%s8910_s4 + $0xc8] sm:$0xff] }
  0x79   :  { %9073 = vst [vmem:[#allocation12_spill] sm:$0xff] %v7415_v6  ;;  %9074 = vst [vmem:[#allocation13_spill] sm:$0xff] %v7417_v7  ;;  %v886_v25 = vld [vmem:[%s8910_s4 + $0xb0] sm:$0xff]  ;;  %v7440_v30 = vpack.c.bf16 %v884_v23, %v880_v18  ;;  %v893_v33 = vld [vmem:[%s8910_s4 + $0xe8] sm:$0xff] }
  0x7a   :  { %4435 = vmatpush1.bf16.msra.mxu0 %v7268_v55  ;;  %9075 = vst [vmem:[#allocation14_spill] sm:$0xff] %v7428_v19  ;;  %v891_v36 = vld [vmem:[%s8910_s4 + $0xd8] sm:$0xff]  ;;  %v7453_v37 = vpack.c.bf16 %v886_v25, %v882_v24  ;;  %v7455_v42 = vpack.c.bf16 %v893_v33, %v889_v31  ;;  %v888_v48 = vld [vmem:[%s8910_s4 + $0xc0] sm:$0xff]  ;;  %v890_v60 = vld [vmem:[%s8910_s4 + $0xd0] sm:$0xff] }
  0x7b   :  { %4467 = vmatpush1.bf16.msra.mxu1 %v7272_v56  ;;  %4437 = vmatprep.subr.bf16.mxu0 %v7274_v57  ;;  %9076 = vst [vmem:[#allocation15_spill] sm:$0xff] %v7440_v30  ;;  %v895_v45 = vld [vmem:[%s8910_s4 + $0xf8] sm:$0xff]  ;;  %v892_v51 = vld [vmem:[%s8910_s4 + $0xe0] sm:$0xff]  ;;  %v894_v0 = vld [vmem:[%s8910_s4 + $0xf0] sm:$0xff] }
  0x7c   :  { %4469 = vmatprep.subr.bf16.mxu1 %v7286_v63  ;;  %9077 = vst [vmem:[#allocation16_spill] sm:$0xff] %v7453_v37  ;;  %9078 = vst [vmem:[#allocation17_spill] sm:$0xff] %v7455_v42  ;;  %v7461_v47 = vpack.c.bf16 %v895_v45, %v891_v36  ;;  %v7476_v61 = vpack.c.bf16 %v892_v51, %v888_v48  ;;  %v7481_v1 = vpack.c.bf16 %v894_v0, %v890_v60  ;;  %v897_v5 = vld [vmem:[%s8910_s4 + $0x108] sm:$0xff]  ;;  %v899_v13 = vld [vmem:[%s8910_s4 + $0x118] sm:$0xff] }
  0x7d   :  { %v901_v12 = vld [vmem:[%s8910_s4 + $0x128] sm:$0xff]  ;;  %v903_v23 = vld [vmem:[%s8910_s4 + $0x138] sm:$0xff]  ;;  %v896_v24 = vld [vmem:[%s8910_s4 + $0x100] sm:$0xff] }
  0x7e   :  { %4439 = vmatpush1.bf16.msra.mxu0 %v7304_v9  ;;  %9079 = vst [vmem:[#allocation18_spill] sm:$0xff] %v7461_v47  ;;  %9080 = vst [vmem:[#allocation19_spill] sm:$0xff] %v7476_v61  ;;  %v7494_v18 = vpack.c.bf16 %v901_v12, %v897_v5  ;;  %v900_v25 = vld [vmem:[%s8910_s4 + $0x120] sm:$0xff]  ;;  %v7505_v31 = vpack.c.bf16 %v903_v23, %v899_v13  ;;  %v898_v36 = vld [vmem:[%s8910_s4 + $0x110] sm:$0xff] }
  0x7f   :  { %4471 = vmatpush1.bf16.msra.mxu1 %v7308_v10  ;;  %4441 = vmatprep.subr.bf16.mxu0 %v7310_v11  ;;  %9081 = vst [vmem:[#allocation20_spill] sm:$0xff] %v7481_v1  ;;  %v7507_v33 = vpack.c.bf16 %v900_v25, %v896_v24  ;;  %v902_v45 = vld [vmem:[%s8910_s4 + $0x130] sm:$0xff]  ;;  %v905_v51 = vld [vmem:[%s8910_s4 + $0x148] sm:$0xff]  ;;  %v907_v0 = vld [vmem:[%s8910_s4 + $0x158] sm:$0xff] }
  0x80   :  { %4473 = vmatprep.subr.bf16.mxu1 %v7319_v17  ;;  %9082 = vst [vmem:[#allocation21_spill] sm:$0xff] %v7494_v18  ;;  %9083 = vst [vmem:[#allocation22_spill] sm:$0xff] %v7505_v31  ;;  %v7516_v48 = vpack.c.bf16 %v902_v45, %v898_v36  ;;  %v909_v60 = vld [vmem:[%s8910_s4 + $0x168] sm:$0xff]  ;;  %v911_v12 = vld [vmem:[%s8910_s4 + $0x178] sm:$0xff] }
  0x81   :  { %9084 = vst [vmem:[#allocation23_spill] sm:$0xff] %v7507_v33  ;;  %v7530_v5 = vpack.c.bf16 %v909_v60, %v905_v51  ;;  %v904_v13 = vld [vmem:[%s8910_s4 + $0x140] sm:$0xff]  ;;  %v7541_v24 = vpack.c.bf16 %v911_v12, %v907_v0  ;;  %v906_v36 = vld [vmem:[%s8910_s4 + $0x150] sm:$0xff]  ;;  %v913_v60 = vld [vmem:[%s8910_s4 + $0x188] sm:$0xff] }
  0x82   :  { %4443 = vmatpush1.bf16.msra.mxu0 %v7328_v21  ;;  %9085 = vst [vmem:[#allocation24_spill] sm:$0xff] %v7516_v48  ;;  %v908_v23 = vld [vmem:[%s8910_s4 + $0x160] sm:$0xff]  ;;  %v910_v45 = vld [vmem:[%s8910_s4 + $0x170] sm:$0xff]  ;;  %v917_v0 = vld [vmem:[%s8910_s4 + $0x1a8] sm:$0xff] }
  0x83   :  { %4475 = vmatpush1.bf16.msra.mxu1 %v7332_v22  ;;  %4477 = vmatprep.subr.bf16.mxu0 %v7350_v29  ;;  %9086 = vst [vmem:[#allocation25_spill] sm:$0xff] %v7530_v5  ;;  %9087 = vst [vmem:[#allocation26_spill] sm:$0xff] %v7541_v24  ;;  %v7543_v25 = vpack.c.bf16 %v908_v23, %v904_v13  ;;  %v7552_v51 = vpack.c.bf16 %v910_v45, %v906_v36  ;;  %v915_v12 = vld [vmem:[%s8910_s4 + $0x198] sm:$0xff]  ;;  %v912_v36 = vld [vmem:[%s8910_s4 + $0x180] sm:$0xff] }
  0x84   :  { %4541 = vmatprep.subr.bf16.mxu1 %v7361_v34  ;;  %v7566_v13 = vpack.c.bf16 %v917_v0, %v913_v60  ;;  %v919_v23 = vld [vmem:[%s8910_s4 + $0x1b8] sm:$0xff]  ;;  %v916_v45 = vld [vmem:[%s8910_s4 + $0x1a0] sm:$0xff]  ;;  %v914_v60 = vld [vmem:[%s8910_s4 + $0x190] sm:$0xff] }
  0x85   :  { %709 = vmatmul.mubr.f32.vlgmr.msra.gmra.mrb[4].mxu0 %v8915_v52  ;;  %9088 = vst [vmem:[#allocation27_spill] sm:$0xff] %v7543_v25  ;;  %9089 = vst [vmem:[#allocation28_spill] sm:$0xff] %v7552_v51  ;;  %v918_v0 = vld [vmem:[%s8910_s4 + $0x1b0] sm:$0xff] }
  0x86   :  { %780 = vmatmul.mubr.f32.vlgmr.msra.gmra.mrb[4].mxu1 %v8915_v52  ;;  %1056 = vmatprep.mubr.f32.mxu0 %v8915_v52  ;;  %9090 = vst [vmem:[#allocation29_spill] sm:$0xff] %v7566_v13 }
  0x87   :  { %1127 = vmatprep.mubr.f32.mxu1 %v8915_v52  ;;  %4479 = vmatpush1.bf16.msra.mxu0 %v7363_v35  ;;  %v7577_v52 = vpack.c.bf16 %v919_v23, %v915_v12  ;;  %v921_v12 = vld [vmem:[%s8910_s4 + $0x1c8] sm:$0xff] }
  0x88   :  { %4543 = vmatpush1.bf16.msra.mxu1 %v7375_v43  ;;  %4481 = vmatprep.subr.bf16.mxu0 %v7388_v49  ;;  %v925_v23 = vld [vmem:[%s8910_s4 + $0x1e8] sm:$0xff] }
  0x89   :  { %4545 = vmatprep.subr.bf16.mxu1 %v7390_v50  ;;  %9091 = vst [vmem:[#allocation30_spill] sm:$0xff] %v7577_v52 }
  0x8b   :  { %4483 = vmatpush1.bf16.msra.mxu0 %v7402_v62 }
  0x8c   :  { %4547 = vmatpush1.bf16.msra.mxu1 %v7415_v6  ;;  %4485 = vmatprep.subr.bf16.mxu0 %v7417_v7 }
  0x8d   :  { %4549 = vmatprep.subr.bf16.mxu1 %v7428_v19 }
  0x8f   :  { %4487 = vmatpush1.bf16.msra.mxu0 %v7440_v30 }
  0x90   :  { %4551 = vmatpush1.bf16.msra.mxu1 %v7453_v37  ;;  %4489 = vmatprep.subr.bf16.mxu0 %v7455_v42 }
  0x91   :  { %4553 = vmatprep.subr.bf16.mxu1 %v7461_v47 }
  0x93   :  { %4491 = vmatpush1.bf16.msra.mxu0 %v7476_v61 }
  0x94   :  { %4555 = vmatpush1.bf16.msra.mxu1 %v7481_v1  ;;  %4493 = vmatprep.subr.bf16.mxu0 %v7494_v18 }
  0x95   :  { %4557 = vmatprep.subr.bf16.mxu1 %v7505_v31 }
  0x97   :  { %4495 = vmatpush1.bf16.msra.mxu0 %v7507_v33  ;;  %v988_v33 = vld [vmem:[%s8910_s4 + $0x3e0] sm:$0xff] }
  0x98   :  { %4559 = vmatpush1.bf16.msra.mxu1 %v7516_v48  ;;  %4497 = vmatprep.subr.bf16.mxu0 %v7530_v5  ;;  %v970_v5 = vld [vmem:[%s8910_s4 + $0x350] sm:$0xff] }
  0x99   :  { %4561 = vmatprep.subr.bf16.mxu1 %v7541_v24 }
  0x9b   :  { %4499 = vmatpush1.bf16.msra.mxu0 %v7543_v25  ;;  %v7579_v25 = vpack.c.bf16 %v916_v45, %v912_v36  ;;  %v923_v36 = vld [vmem:[%s8910_s4 + $0x1d8] sm:$0xff]  ;;  %v7602_v45 = vpack.c.bf16 %v925_v23, %v921_v12  ;;  %v922_v12 = vld [vmem:[%s8910_s4 + $0x1d0] sm:$0xff] }
  0x9c   :  { %4563 = vmatpush1.bf16.msra.mxu1 %v7552_v51  ;;  %4501 = vmatprep.subr.bf16.mxu0 %v7566_v13  ;;  %v7588_v51 = vpack.c.bf16 %v918_v0, %v914_v60  ;;  %v927_v60 = vld [vmem:[%s8910_s4 + $0x1f8] sm:$0xff]  ;;  %v920_v0 = vld [vmem:[%s8910_s4 + $0x1c0] sm:$0xff]  ;;  %v926_v23 = vld [vmem:[%s8910_s4 + $0x1f0] sm:$0xff] }
  0x9d   :  { %9092 = vst [vmem:[#allocation31_spill] sm:$0xff] %v7579_v25  ;;  %4565 = vmatprep.subr.bf16.mxu1 %v7577_v52  ;;  %9094 = vst [vmem:[#allocation33_spill] sm:$0xff] %v7602_v45  ;;  %v7613_v52 = vpack.c.bf16 %v927_v60, %v923_v36  ;;  %v933_v36 = vld [vmem:[%s8910_s4 + $0x228] sm:$0xff]  ;;  %v931_v60 = vld [vmem:[%s8910_s4 + $0x218] sm:$0xff] }
  0x9e   :  { %9093 = vst [vmem:[#allocation32_spill] sm:$0xff] %v7588_v51 }
  0x9f   :  { %4503 = vmatpush1.bf16.msra.mxu0 %v7579_v25  ;;  %v924_v25 = vld [vmem:[%s8910_s4 + $0x1e0] sm:$0xff]  ;;  %9095 = vst [vmem:[#allocation34_spill] sm:$0xff] %v7613_v52 }
  0xa0   :  { %4567 = vmatpush1.bf16.msra.mxu1 %v7588_v51  ;;  %v7615_v13 = vpack.c.bf16 %v924_v25, %v920_v0  ;;  %4505 = vmatprep.subr.bf16.mxu0 %v7602_v45  ;;  %v7624_v51 = vpack.c.bf16 %v926_v23, %v922_v12  ;;  %v929_v25 = vld [vmem:[%s8910_s4 + $0x208] sm:$0xff]  ;;  %v935_v12 = vld [vmem:[%s8910_s4 + $0x238] sm:$0xff]  ;;  %v928_v23 = vld [vmem:[%s8910_s4 + $0x200] sm:$0xff] }
  0xa1   :  { %4569 = vmatprep.subr.bf16.mxu1 %v7613_v52  ;;  %v7638_v0 = vpack.c.bf16 %v933_v36, %v929_v25  ;;  %v7649_v52 = vpack.c.bf16 %v935_v12, %v931_v60  ;;  %v930_v25 = vld [vmem:[%s8910_s4 + $0x210] sm:$0xff]  ;;  %v941_v60 = vld [vmem:[%s8910_s4 + $0x268] sm:$0xff]  ;;  %v939_v12 = vld [vmem:[%s8910_s4 + $0x258] sm:$0xff] }
  0xa2   :  { %9096 = vst [vmem:[#allocation35_spill] sm:$0xff] %v7615_v13  ;;  %9097 = vst [vmem:[#allocation36_spill] sm:$0xff] %v7624_v51  ;;  %v934_v36 = vld [vmem:[%s8910_s4 + $0x230] sm:$0xff] }
  0xa3   :  { %4507 = vmatpush1.bf16.msra.mxu0 %v7615_v13  ;;  %9098 = vst [vmem:[#allocation37_spill] sm:$0xff] %v7638_v0  ;;  %v932_v13 = vld [vmem:[%s8910_s4 + $0x220] sm:$0xff]  ;;  %9099 = vst [vmem:[#allocation38_spill] sm:$0xff] %v7649_v52 }
  0xa4   :  { %4571 = vmatpush1.bf16.msra.mxu1 %v7624_v51  ;;  %v7651_v45 = vpack.c.bf16 %v932_v13, %v928_v23  ;;  %4509 = vmatprep.subr.bf16.mxu0 %v7638_v0  ;;  %v7660_v51 = vpack.c.bf16 %v934_v36, %v930_v25  ;;  %v937_v13 = vld [vmem:[%s8910_s4 + $0x248] sm:$0xff]  ;;  %v943_v25 = vld [vmem:[%s8910_s4 + $0x278] sm:$0xff]  ;;  %v936_v36 = vld [vmem:[%s8910_s4 + $0x240] sm:$0xff] }
  0xa5   :  { %4573 = vmatprep.subr.bf16.mxu1 %v7649_v52  ;;  %v7674_v23 = vpack.c.bf16 %v941_v60, %v937_v13  ;;  %v7685_v52 = vpack.c.bf16 %v943_v25, %v939_v12  ;;  %v938_v13 = vld [vmem:[%s8910_s4 + $0x250] sm:$0xff]  ;;  %v949_v12 = vld [vmem:[%s8910_s4 + $0x2a8] sm:$0xff]  ;;  %v947_v25 = vld [vmem:[%s8910_s4 + $0x298] sm:$0xff] }
  0xa6   :  { %9100 = vst [vmem:[#allocation39_spill] sm:$0xff] %v7651_v45  ;;  %9101 = vst [vmem:[#allocation40_spill] sm:$0xff] %v7660_v51  ;;  %v942_v60 = vld [vmem:[%s8910_s4 + $0x270] sm:$0xff] }
  0xa7   :  { %4511 = vmatpush1.bf16.msra.mxu0 %v7651_v45  ;;  %9102 = vst [vmem:[#allocation41_spill] sm:$0xff] %v7674_v23  ;;  %v940_v45 = vld [vmem:[%s8910_s4 + $0x260] sm:$0xff]  ;;  %9103 = vst [vmem:[#allocation42_spill] sm:$0xff] %v7685_v52 }
  0xa8   :  { %4575 = vmatpush1.bf16.msra.mxu1 %v7660_v51  ;;  %v7687_v0 = vpack.c.bf16 %v940_v45, %v936_v36  ;;  %4513 = vmatprep.subr.bf16.mxu0 %v7674_v23  ;;  %v7696_v51 = vpack.c.bf16 %v942_v60, %v938_v13  ;;  %v945_v45 = vld [vmem:[%s8910_s4 + $0x288] sm:$0xff]  ;;  %v951_v13 = vld [vmem:[%s8910_s4 + $0x2b8] sm:$0xff]  ;;  %v944_v60 = vld [vmem:[%s8910_s4 + $0x280] sm:$0xff] }
  0xa9   :  { %4577 = vmatprep.subr.bf16.mxu1 %v7685_v52  ;;  %v7710_v36 = vpack.c.bf16 %v949_v12, %v945_v45  ;;  %v7721_v52 = vpack.c.bf16 %v951_v13, %v947_v25  ;;  %v946_v45 = vld [vmem:[%s8910_s4 + $0x290] sm:$0xff]  ;;  %v957_v25 = vld [vmem:[%s8910_s4 + $0x2e8] sm:$0xff]  ;;  %v955_v13 = vld [vmem:[%s8910_s4 + $0x2d8] sm:$0xff] }
  0xaa   :  { %9104 = vst [vmem:[#allocation43_spill] sm:$0xff] %v7687_v0  ;;  %9105 = vst [vmem:[#allocation44_spill] sm:$0xff] %v7696_v51  ;;  %v950_v12 = vld [vmem:[%s8910_s4 + $0x2b0] sm:$0xff] }
  0xab   :  { %4515 = vmatpush1.bf16.msra.mxu0 %v7687_v0  ;;  %9106 = vst [vmem:[#allocation45_spill] sm:$0xff] %v7710_v36  ;;  %v948_v0 = vld [vmem:[%s8910_s4 + $0x2a0] sm:$0xff]  ;;  %9107 = vst [vmem:[#allocation46_spill] sm:$0xff] %v7721_v52 }
  0xac   :  { %4579 = vmatpush1.bf16.msra.mxu1 %v7696_v51  ;;  %v7723_v23 = vpack.c.bf16 %v948_v0, %v944_v60  ;;  %4517 = vmatprep.subr.bf16.mxu0 %v7710_v36  ;;  %v7732_v51 = vpack.c.bf16 %v950_v12, %v946_v45  ;;  %v953_v0 = vld [vmem:[%s8910_s4 + $0x2c8] sm:$0xff]  ;;  %v959_v45 = vld [vmem:[%s8910_s4 + $0x2f8] sm:$0xff]  ;;  %v952_v12 = vld [vmem:[%s8910_s4 + $0x2c0] sm:$0xff] }
  0xad   :  { %4581 = vmatprep.subr.bf16.mxu1 %v7721_v52  ;;  %v7746_v60 = vpack.c.bf16 %v957_v25, %v953_v0  ;;  %v7757_v52 = vpack.c.bf16 %v959_v45, %v955_v13  ;;  %v954_v0 = vld [vmem:[%s8910_s4 + $0x2d0] sm:$0xff]  ;;  %v965_v13 = vld [vmem:[%s8910_s4 + $0x328] sm:$0xff]  ;;  %v963_v45 = vld [vmem:[%s8910_s4 + $0x318] sm:$0xff] }
  0xae   :  { %9108 = vst [vmem:[#allocation47_spill] sm:$0xff] %v7723_v23  ;;  %9109 = vst [vmem:[#allocation48_spill] sm:$0xff] %v7732_v51  ;;  %v958_v25 = vld [vmem:[%s8910_s4 + $0x2f0] sm:$0xff] }
  0xaf   :  { %4519 = vmatpush1.bf16.msra.mxu0 %v7723_v23  ;;  %9110 = vst [vmem:[#allocation49_spill] sm:$0xff] %v7746_v60  ;;  %v956_v23 = vld [vmem:[%s8910_s4 + $0x2e0] sm:$0xff]  ;;  %9111 = vst [vmem:[#allocation50_spill] sm:$0xff] %v7757_v52 }
  0xb0   :  { %4583 = vmatpush1.bf16.msra.mxu1 %v7732_v51  ;;  %v7759_v36 = vpack.c.bf16 %v956_v23, %v952_v12  ;;  %4521 = vmatprep.subr.bf16.mxu0 %v7746_v60  ;;  %v7768_v51 = vpack.c.bf16 %v958_v25, %v954_v0  ;;  %v961_v23 = vld [vmem:[%s8910_s4 + $0x308] sm:$0xff]  ;;  %v967_v0 = vld [vmem:[%s8910_s4 + $0x338] sm:$0xff]  ;;  %v960_v25 = vld [vmem:[%s8910_s4 + $0x300] sm:$0xff] }
  0xb1   :  { %4585 = vmatprep.subr.bf16.mxu1 %v7757_v52  ;;  %v7782_v12 = vpack.c.bf16 %v965_v13, %v961_v23  ;;  %v7793_v52 = vpack.c.bf16 %v967_v0, %v963_v45  ;;  %v962_v23 = vld [vmem:[%s8910_s4 + $0x310] sm:$0xff]  ;;  %v971_v45 = vld [vmem:[%s8910_s4 + $0x358] sm:$0xff] }
  0xb2   :  { %9112 = vst [vmem:[#allocation51_spill] sm:$0xff] %v7759_v36  ;;  %9113 = vst [vmem:[#allocation52_spill] sm:$0xff] %v7768_v51  ;;  %v966_v13 = vld [vmem:[%s8910_s4 + $0x330] sm:$0xff]  ;;  %v975_v0 = vld [vmem:[%s8910_s4 + $0x378] sm:$0xff] }
  0xb3   :  { %4523 = vmatpush1.bf16.msra.mxu0 %v7759_v36  ;;  %9114 = vst [vmem:[#allocation53_spill] sm:$0xff] %v7782_v12  ;;  %v964_v36 = vld [vmem:[%s8910_s4 + $0x320] sm:$0xff]  ;;  %9115 = vst [vmem:[#allocation54_spill] sm:$0xff] %v7793_v52  ;;  %v7807_v24 = vpack.c.bf16 %v966_v13, %v962_v23  ;;  %v7822_v23 = vpack.c.bf16 %v975_v0, %v971_v45  ;;  %v981_v45 = vld [vmem:[%s8910_s4 + $0x3a8] sm:$0xff] }
  0xb4   :  { %4587 = vmatpush1.bf16.msra.mxu1 %v7768_v51  ;;  %v7795_v60 = vpack.c.bf16 %v964_v36, %v960_v25  ;;  %v969_v51 = vld [vmem:[%s8910_s4 + $0x348] sm:$0xff]  ;;  %4525 = vmatprep.subr.bf16.mxu0 %v7782_v12  ;;  %v968_v13 = vld [vmem:[%s8910_s4 + $0x340] sm:$0xff] }
  0xb5   :  { %9117 = vst [vmem:[#allocation56_spill] sm:$0xff] %v7807_v24  ;;  %v973_v36 = vld [vmem:[%s8910_s4 + $0x368] sm:$0xff]  ;;  %4589 = vmatprep.subr.bf16.mxu1 %v7793_v52  ;;  %9119 = vst [vmem:[#allocation58_spill] sm:$0xff] %v7822_v23  ;;  %v972_v12 = vld [vmem:[%s8910_s4 + $0x360] sm:$0xff] }
  0xb6   :  { %9116 = vst [vmem:[#allocation55_spill] sm:$0xff] %v7795_v60  ;;  %v7820_v25 = vpack.c.bf16 %v973_v36, %v969_v51  ;;  %v7834_v52 = vpack.c.bf16 %v972_v12, %v968_v13  ;;  %v974_v51 = vld [vmem:[%s8910_s4 + $0x370] sm:$0xff]  ;;  %v977_v36 = vld [vmem:[%s8910_s4 + $0x388] sm:$0xff]  ;;  %v979_v13 = vld [vmem:[%s8910_s4 + $0x398] sm:$0xff] }
  0xb7   :  { %4527 = vmatpush1.bf16.msra.mxu0 %v7795_v60  ;;  %v7847_v0 = vpack.c.bf16 %v974_v51, %v970_v5  ;;  %v7849_v12 = vpack.c.bf16 %v981_v45, %v977_v36  ;;  %v976_v60 = vld [vmem:[%s8910_s4 + $0x380] sm:$0xff]  ;;  %v978_v51 = vld [vmem:[%s8910_s4 + $0x390] sm:$0xff] }
  0xb8   :  { %9118 = vst [vmem:[#allocation57_spill] sm:$0xff] %v7820_v25  ;;  %4591 = vmatpush1.bf16.msra.mxu1 %v7807_v24  ;;  %9120 = vst [vmem:[#allocation59_spill] sm:$0xff] %v7834_v52  ;;  %4529 = vmatprep.subr.bf16.mxu0 %v7820_v25  ;;  %v983_v24 = vld [vmem:[%s8910_s4 + $0x3b8] sm:$0xff]  ;;  %v980_v5 = vld [vmem:[%s8910_s4 + $0x3a0] sm:$0xff] }
  0xb9   :  { %4593 = vmatprep.subr.bf16.mxu1 %v7822_v23  ;;  %9121 = vst [vmem:[#allocation60_spill] sm:$0xff] %v7847_v0  ;;  %9122 = vst [vmem:[#allocation61_spill] sm:$0xff] %v7849_v12  ;;  %v7860_v48 = vpack.c.bf16 %v983_v24, %v979_v13  ;;  %v982_v36 = vld [vmem:[%s8910_s4 + $0x3b0] sm:$0xff]  ;;  %v7872_v45 = vpack.c.bf16 %v980_v5, %v976_v60  ;;  %v985_v24 = vld [vmem:[%s8910_s4 + $0x3c8] sm:$0xff] }
  0xba   :  { %v989_v13 = vld [vmem:[%s8910_s4 + $0x3e8] sm:$0xff]  ;;  %v987_v23 = vld [vmem:[%s8910_s4 + $0x3d8] sm:$0xff]  ;;  %v7885_v25 = vpack.c.bf16 %v982_v36, %v978_v51  ;;  %v986_v51 = vld [vmem:[%s8910_s4 + $0x3d0] sm:$0xff] }
  0xbb   :  { %9123 = vst [vmem:[#allocation62_spill] sm:$0xff] %v7860_v48  ;;  %4531 = vmatpush1.bf16.msra.mxu0 %v7834_v52  ;;  %9124 = vst [vmem:[#allocation63_spill] sm:$0xff] %v7872_v45  ;;  %v7887_v60 = vpack.c.bf16 %v989_v13, %v985_v24  ;;  %v991_v5 = vld [vmem:[%s8910_s4 + $0x3f8] sm:$0xff]  ;;  %v984_v52 = vld [vmem:[%s8910_s4 + $0x3c0] sm:$0xff] }
  0xbc   :  { %4595 = vmatpush1.bf16.msra.mxu1 %v7847_v0  ;;  %4533 = vmatprep.subr.bf16.mxu0 %v7849_v12  ;;  %9125 = vst [vmem:[#allocation64_spill] sm:$0xff] %v7885_v25  ;;  %v7899_v0 = vpack.c.bf16 %v991_v5, %v987_v23  ;;  %v990_v36 = vld [vmem:[%s8910_s4 + $0x3f0] sm:$0xff]  ;;  %v7908_v24 = vpack.c.bf16 %v988_v33, %v984_v52 }
  0xbd   :  { %9126 = vst [vmem:[#allocation65_spill] sm:$0xff] %v7887_v60  ;;  %4597 = vmatprep.subr.bf16.mxu1 %v7860_v48  ;;  %v7912_v13 = vpack.c.bf16 %v990_v36, %v986_v51  ;;  %v230_v51 = vlaneseq }
  0xbe   :  { %9127 = vst [vmem:[#allocation66_spill] sm:$0xff] %v7899_v0  ;;  %9128 = vst [vmem:[#allocation67_spill] sm:$0xff] %v7908_v24 }
  0xbf   :  { %4535 = vmatpush1.bf16.msra.mxu0 %v7872_v45  ;;  %9129 = vst [vmem:[#allocation68_spill] sm:$0xff] %v7912_v13  ;;  %v7919_v36 = vshrl.u32 %v230_v51, 7 }
  0xc0   :  { %4599 = vmatpush1.bf16.msra.mxu1 %v7885_v25  ;;  %4537 = vmatprep.subr.bf16.mxu0 %v7887_v60 }
  0xc1   :  { %4601 = vmatprep.subr.bf16.mxu1 %v7899_v0  ;;  %v9029_v0 = vsub.s32 0, %v7919_v36  ;;  %v9044_v12 = vsub.s32 3, %v7919_v36  ;;  %v9043_v1 = vsub.s32 2, %v7919_v36 }
  0xc3   :  { %4539 = vmatpush1.bf16.msra.mxu0 %v7908_v24 }
  0xc4   :  { %4603 = vmatpush1.bf16.msra.mxu1 %v7912_v13  ;;  %4605 = vmatprep.subr.bf16.mxu0 %v7051_v41  ;;  %v228_v13 = vld [vmem:[%s8909_s3] sm:$0xf]  ;;  %v9030_v41 = vsub.s32 1, %v7919_v36 }
  0xc5   :  { %4637 = vmatprep.subr.bf16.mxu1 %v7059_v44  ;;  %v233_v44 = vrot.slane %v228_v13, %v9029_v0  ;;  %v245_v0 = vrot.slane %v228_v13, %v9044_v12  ;;  %v9152_v12 = vld [vmem:[#allocation27_spill] sm:$0xff] }
  0xc6   :  { %v237_v24 = vrot.slane %v228_v13, %v9030_v41 }
 0x138   :  { %v393_v23 = vpop.f32.mrb[0].mxu0 }
 0x139   :  { %v547_v5 = vpop.f32.mrb[0].mxu1  ;;  %v395_v52 = vpop.f32.mrb[1].mxu0  ;;  %v7931_v31 = vadd.f32 %v393_v23, %v233_v44 }
 0x13a   :  { %v549_v33 = vpop.f32.mrb[1].mxu1  ;;  %v7933_v51 = vadd.f32 %v395_v52, %v237_v24 }
 0x13b   :  { %9130 = vst [vmem:[#allocation69_spill] sm:$0xff] %v7931_v31  ;;  %v7948_v50 = vadd.f32 %v549_v33, %v245_v0 }
 0x13c   :  { %v399_v45 = vpop.f32.mrb[2].mxu0  ;;  %9131 = vst [vmem:[#allocation70_spill] sm:$0xff] %v7933_v51 }
 0x13d   :  { %v401_v25 = vpop.f32.mrb[3].mxu0  ;;  %v553_v48 = vpop.f32.mrb[2].mxu1  ;;  %v7936_v61 = vadd.f32 %v399_v45, %v233_v44 }
 0x13e   :  { %v555_v60 = vpop.f32.mrb[3].mxu1  ;;  %v7941_v41 = vadd.f32 %v401_v25, %v237_v24 }
 0x13f   :  { %9132 = vst [vmem:[#allocation71_spill] sm:$0xff] %v7936_v61  ;;  %v7950_v24 = vadd.f32 %v555_v60, %v245_v0 }
 0x140   :  { %9133 = vst [vmem:[#allocation72_spill] sm:$0xff] %v7941_v41 }
 0x158   :  { %v710_v18 = vpop.f32.mrb[4].mxu0 }
 0x159   :  { %v790_v47 = vrot.slane %v710_v18, 1  ;;  %v802_v42 = vadd.f32 %v7931_v31, %v710_v18  ;;  %v781_v37 = vpop.f32.mrb[4].mxu1  ;;  %v712_v30 = vpop.f32.mrb[5].mxu0  ;;  %v241_v18 = vrot.slane %v228_v13, %v9043_v1 }
 0x15a   :  { %v791_v19 = vrot.slane %v712_v30, 1  ;;  %v803_v23 = vadd.f32 %v7933_v51, %v712_v30  ;;  %v783_v52 = vpop.f32.mrb[5].mxu1 }
 0x15b   :  { %v806_v7 = vadd.f32 %v7936_v61, %v790_v47  ;;  %v4094_v6 = vmul.f32 -1.442695, %v802_v42  ;;  %v793_v62 = vrot.slane %v783_v52, 1  ;;  %v805_v30 = vadd.f32 %v7948_v50, %v783_v52 }
 0x15c   :  { %v807_v44 = vadd.f32 %v7941_v41, %v791_v19  ;;  %v4096_v45 = vmul.f32 -1.442695, %v803_v23  ;;  %v7953_v47 = vadd.f32 %v547_v5, %v241_v18  ;;  %v792_v42 = vrot.slane %v781_v37, 1 }
 0x15d   :  { %5992 = vpow2.f32 %v4094_v6  ;;  %v4095_v31 = vmul.f32 -1.442695, %v806_v7  ;;  %v809_v19 = vadd.f32 %v7950_v24, %v793_v62  ;;  %v4098_v6 = vmul.f32 -1.442695, %v805_v30 }
 0x15e   :  { %v4097_v25 = vmul.f32 -1.442695, %v807_v44  ;;  %v804_v13 = vadd.f32 %v7953_v47, %v781_v37  ;;  %v7957_v7 = vadd.f32 %v553_v48, %v241_v18 }
 0x15f   :  { %5994 = vpow2.f32 %v4095_v31  ;;  %v4099_v33 = vmul.f32 -1.442695, %v809_v19 }
 0x160   :  { %5996 = vpow2.f32 %v4096_v45  ;;  %v808_v0 = vadd.f32 %v7957_v7, %v792_v42 }
 0x161   :  { %5998 = vpow2.f32 %v4097_v25 }
 0x162   :  { %6000 = vtanh.f32 %v804_v13 }
 0x163   :  { %6002 = vpow2.f32 %v4098_v6 }
 0x164   :  { %6004 = vpow2.f32 %v4099_v33 }
 0x167   :  { %v5993_v23 = vpop.eup %5992 }
 0x168   :  { %v816_v31 = vadd.f32 1.0, %v5993_v23 }
 0x169   :  { %v5995_v60 = vpop.eup %5994 }
 0x16a   :  { %v5997_v5 = vpop.eup %5996  ;;  %v817_v52 = vadd.f32 1.0, %v5995_v60  ;;  %6006 = vrcp.f32 %v816_v31 }
 0x16b   :  { %v5999_v44 = vpop.eup %5998  ;;  %6008 = vtanh.f32 %v808_v0  ;;  %v828_v62 = vadd.f32 1.0, %v5997_v5 }
 0x16c   :  { %6010 = vrcp.f32 %v817_v52  ;;  %v829_v37 = vadd.f32 1.0, %v5999_v44  ;;  %v6001_v48 = vpop.eup %6000 }
 0x16d   :  { %6012 = vrcp.f32 %v828_v62  ;;  %v6003_v45 = vpop.eup %6002 }
 0x16e   :  { %6014 = vrcp.f32 %v829_v37  ;;  %v6005_v18 = vpop.eup %6004  ;;  %v842_v13 = vadd.f32 1.0, %v6003_v45 }
 0x16f   :  { %v843_v23 = vadd.f32 1.0, %v6005_v18 }
 0x170   :  { %6016 = vrcp.f32 %v842_v13  ;;  %v9138_v13 = vld [vmem:[#allocation13_spill] sm:$0xff] }
 0x171   :  { %6018 = vrcp.f32 %v843_v23  ;;  %v9141_v23 = vld [vmem:[#allocation16_spill] sm:$0xff] }
 0x174   :  { %v6007_v25 = vpop.eup %6006 }
 0x175   :  { %v6009_v30 = vpop.eup %6008  ;;  %v850_v19 = vmul.f32 %v6007_v25, %v6001_v48 }
 0x176   :  { %v6011_v42 = vpop.eup %6010 }
 0x177   :  { %v6013_v6 = vpop.eup %6012  ;;  %v851_v33 = vmul.f32 %v6011_v42, %v6009_v30  ;;  %v9135_v30 = vld [vmem:[#allocation10_spill] sm:$0xff]  ;;  %v9137_v42 = vld [vmem:[#allocation12_spill] sm:$0xff] }
 0x178   :  { %v6015_v60 = vpop.eup %6014  ;;  %v848_v31 = vmul.f32 0.0, %v6013_v6  ;;  %v9139_v6 = vld [vmem:[#allocation14_spill] sm:$0xff] }
 0x179   :  { %v849_v1 = vmul.f32 0.0, %v6015_v60  ;;  %v9142_v60 = vld [vmem:[#allocation17_spill] sm:$0xff] }
 0x17a   :  { %v7960_v0 = vadd.f32 %v850_v19, %v848_v31  ;;  %v6017_v52 = vpop.eup %6016  ;;  %v9136_v19 = vld [vmem:[#allocation11_spill] sm:$0xff]  ;;  %v9143_v31 = vld [vmem:[#allocation18_spill] sm:$0xff] }
 0x17b   :  { %v7962_v5 = vadd.f32 %v851_v33, %v849_v1  ;;  %v6019_v44 = vpop.eup %6018  ;;  %v9134_v1 = vmov 0.0   ;;  %v9140_v33 = vld [vmem:[#allocation15_spill] sm:$0xff] }
 0x17c   :  { %6020 = vtanh.f32 %v7960_v0 }
 0x17d   :  { %6022 = vtanh.f32 %v7962_v5 }
 0x186   :  { %v6021_v62 = vpop.eup %6020 }
 0x187   :  { %v6023_v37 = vpop.eup %6022  ;;  %v856_v48 = vmul.f32 %v6021_v62, %v6017_v52  ;;  %v9144_v52 = vld [vmem:[#allocation19_spill] sm:$0xff]  ;;  %v9146_v62 = vld [vmem:[#allocation21_spill] sm:$0xff] }
 0x188   :  { %v857_v45 = vmul.f32 %v6023_v37, %v6019_v44  ;;  %v9145_v44 = vld [vmem:[#allocation20_spill] sm:$0xff]  ;;  %v9147_v37 = vld [vmem:[#allocation22_spill] sm:$0xff] }
 0x18a   :  { %v860_v18 = vrot.slane %v857_v45, 7  ;;  %v9149_v45 = vld [vmem:[#allocation24_spill] sm:$0xff] }
 0x18c   :  { %v862_v25 = vsel %vm861_vm0, %v860_v18, %v856_v48  ;;  %v9148_v48 = vld [vmem:[#allocation23_spill] sm:$0xff]  ;;  %v9150_v18 = vld [vmem:[#allocation25_spill] sm:$0xff] }
 0x18d   :  { %1057 = vmatmul.mubr.f32.vlgmr.msra.gmra.mrb[6].mxu0 %v862_v25  ;;  %1128 = vmatmul.mubr.f32.vlgmr.msra.gmra.mrb[6].mxu1 %v862_v25 }
 0x18e   :  { %4607 = vmatpush1.bf16.msra.mxu0 %v7082_v53  ;;  %4639 = vmatpush1.bf16.msra.mxu1 %v7085_v54 }
 0x18f   :  { %4609 = vmatprep.subr.bf16.mxu0 %v7097_v58  ;;  %4641 = vmatprep.subr.bf16.mxu1 %v7099_v59 }
 0x190   :  { %1222 = vmatprep.mubr.f32.mxu0 %v9134_v1  ;;  %1293 = vmatprep.mubr.f32.mxu1 %v9134_v1 }
 0x192   :  { %4611 = vmatpush1.bf16.msra.mxu0 %v7120_v2  ;;  %4643 = vmatpush1.bf16.msra.mxu1 %v7124_v3 }
 0x193   :  { %4613 = vmatprep.subr.bf16.mxu0 %v7126_v4  ;;  %4645 = vmatprep.subr.bf16.mxu1 %v7139_v8 }
 0x196   :  { %4615 = vmatpush1.bf16.msra.mxu0 %v7158_v14  ;;  %4647 = vmatpush1.bf16.msra.mxu1 %v7162_v15 }
 0x197   :  { %4617 = vmatprep.subr.bf16.mxu0 %v7164_v16  ;;  %4649 = vmatprep.subr.bf16.mxu1 %v7176_v20 }
 0x19a   :  { %4619 = vmatpush1.bf16.msra.mxu0 %v7196_v26  ;;  %4651 = vmatpush1.bf16.msra.mxu1 %v7200_v27 }
 0x19b   :  { %4621 = vmatprep.subr.bf16.mxu0 %v7202_v28  ;;  %4653 = vmatprep.subr.bf16.mxu1 %v7214_v32 }
 0x19e   :  { %4623 = vmatpush1.bf16.msra.mxu0 %v7232_v38  ;;  %4655 = vmatpush1.bf16.msra.mxu1 %v7236_v39 }
 0x19f   :  { %4625 = vmatprep.subr.bf16.mxu0 %v7238_v40  ;;  %4657 = vmatprep.subr.bf16.mxu1 %v7250_v46 }
 0x1a2   :  { %4627 = vmatpush1.bf16.msra.mxu0 %v7268_v55  ;;  %4659 = vmatpush1.bf16.msra.mxu1 %v7272_v56 }
 0x1a3   :  { %4629 = vmatprep.subr.bf16.mxu0 %v7274_v57  ;;  %4661 = vmatprep.subr.bf16.mxu1 %v7286_v63 }
 0x1a6   :  { %4631 = vmatpush1.bf16.msra.mxu0 %v7304_v9  ;;  %4663 = vmatpush1.bf16.msra.mxu1 %v7308_v10 }
 0x1a7   :  { %4633 = vmatprep.subr.bf16.mxu0 %v7310_v11  ;;  %4665 = vmatprep.subr.bf16.mxu1 %v7319_v17 }
 0x1aa   :  { %4635 = vmatpush1.bf16.msra.mxu0 %v7328_v21  ;;  %4667 = vmatpush1.bf16.msra.mxu1 %v7332_v22 }
 0x1ab   :  { %4669 = vmatprep.subr.bf16.mxu0 %v7350_v29  ;;  %4733 = vmatprep.subr.bf16.mxu1 %v7361_v34 }
 0x1ad   :  { %1223 = vmatmul.mubr.f32.vlgmr.msra.gmra.mrb[8].mxu0 %v862_v25  ;;  %1294 = vmatmul.mubr.f32.vlgmr.msra.gmra.mrb[8].mxu1 %v862_v25  ;;  %v9151_v25 = vld [vmem:[#allocation26_spill] sm:$0xff] }
 0x1ae   :  { %4671 = vmatpush1.bf16.msra.mxu0 %v7363_v35  ;;  %4735 = vmatpush1.bf16.msra.mxu1 %v7375_v43 }
 0x1af   :  { %4673 = vmatprep.subr.bf16.mxu0 %v7388_v49  ;;  %4737 = vmatprep.subr.bf16.mxu1 %v9135_v30 }
 0x1b2   :  { %4675 = vmatpush1.bf16.msra.mxu0 %v9136_v19  ;;  %4739 = vmatpush1.bf16.msra.mxu1 %v9137_v42 }
 0x1b3   :  { %4677 = vmatprep.subr.bf16.mxu0 %v9138_v13  ;;  %4741 = vmatprep.subr.bf16.mxu1 %v9139_v6 }
 0x1b6   :  { %4679 = vmatpush1.bf16.msra.mxu0 %v9140_v33  ;;  %4743 = vmatpush1.bf16.msra.mxu1 %v9141_v23  ;;  %v9200_v33 = vsub.s32 3, %v7919_v36 }
 0x1b7   :  { %4681 = vmatprep.subr.bf16.mxu0 %v9142_v60  ;;  %4745 = vmatprep.subr.bf16.mxu1 %v9143_v31  ;;  %v9153_v60 = vld [vmem:[#allocation28_spill] sm:$0xff]  ;;  %v9154_v31 = vld [vmem:[#allocation29_spill] sm:$0xff] }
 0x1ba   :  { %4683 = vmatpush1.bf16.msra.mxu0 %v9144_v52  ;;  %4747 = vmatpush1.bf16.msra.mxu1 %v9145_v44  ;;  %v9155_v52 = vld [vmem:[#allocation30_spill] sm:$0xff]  ;;  %v9156_v44 = vld [vmem:[#allocation31_spill] sm:$0xff] }
 0x1bb   :  { %4685 = vmatprep.subr.bf16.mxu0 %v9146_v62  ;;  %4749 = vmatprep.subr.bf16.mxu1 %v9147_v37  ;;  %v9157_v62 = vld [vmem:[#allocation32_spill] sm:$0xff]  ;;  %v9158_v37 = vld [vmem:[#allocation33_spill] sm:$0xff] }
 0x1be   :  { %4687 = vmatpush1.bf16.msra.mxu0 %v9148_v48  ;;  %4751 = vmatpush1.bf16.msra.mxu1 %v9149_v45  ;;  %v9159_v48 = vld [vmem:[#allocation34_spill] sm:$0xff]  ;;  %v9160_v45 = vld [vmem:[#allocation35_spill] sm:$0xff] }
 0x1bf   :  { %4689 = vmatprep.subr.bf16.mxu0 %v9150_v18  ;;  %4753 = vmatprep.subr.bf16.mxu1 %v9151_v25  ;;  %v9161_v18 = vld [vmem:[#allocation36_spill] sm:$0xff]  ;;  %v9162_v25 = vld [vmem:[#allocation37_spill] sm:$0xff] }
 0x1c2   :  { %4691 = vmatpush1.bf16.msra.mxu0 %v9152_v12  ;;  %4755 = vmatpush1.bf16.msra.mxu1 %v9153_v60  ;;  %v9163_v12 = vld [vmem:[#allocation38_spill] sm:$0xff]  ;;  %v9164_v60 = vld [vmem:[#allocation39_spill] sm:$0xff] }
 0x1c3   :  { %4693 = vmatprep.subr.bf16.mxu0 %v9154_v31  ;;  %4757 = vmatprep.subr.bf16.mxu1 %v9155_v52  ;;  %v9165_v31 = vld [vmem:[#allocation40_spill] sm:$0xff]  ;;  %v9166_v52 = vld [vmem:[#allocation41_spill] sm:$0xff] }
 0x1c6   :  { %4695 = vmatpush1.bf16.msra.mxu0 %v9156_v44  ;;  %4759 = vmatpush1.bf16.msra.mxu1 %v9157_v62  ;;  %v9167_v44 = vld [vmem:[#allocation42_spill] sm:$0xff]  ;;  %v9168_v62 = vld [vmem:[#allocation43_spill] sm:$0xff] }
 0x1c7   :  { %4697 = vmatprep.subr.bf16.mxu0 %v9158_v37  ;;  %4761 = vmatprep.subr.bf16.mxu1 %v9159_v48  ;;  %v9169_v37 = vld [vmem:[#allocation44_spill] sm:$0xff]  ;;  %v9170_v48 = vld [vmem:[#allocation45_spill] sm:$0xff] }
 0x1ca   :  { %4699 = vmatpush1.bf16.msra.mxu0 %v9160_v45  ;;  %4763 = vmatpush1.bf16.msra.mxu1 %v9161_v18  ;;  %v9171_v45 = vld [vmem:[#allocation46_spill] sm:$0xff]  ;;  %v9172_v18 = vld [vmem:[#allocation47_spill] sm:$0xff] }
 0x1cb   :  { %4701 = vmatprep.subr.bf16.mxu0 %v9162_v25  ;;  %4765 = vmatprep.subr.bf16.mxu1 %v9163_v12  ;;  %v9173_v25 = vld [vmem:[#allocation48_spill] sm:$0xff]  ;;  %v9174_v12 = vld [vmem:[#allocation49_spill] sm:$0xff] }
 0x1ce   :  { %4703 = vmatpush1.bf16.msra.mxu0 %v9164_v60  ;;  %4767 = vmatpush1.bf16.msra.mxu1 %v9165_v31  ;;  %v9175_v60 = vld [vmem:[#allocation50_spill] sm:$0xff]  ;;  %v9176_v31 = vld [vmem:[#allocation51_spill] sm:$0xff] }
 0x1cf   :  { %4705 = vmatprep.subr.bf16.mxu0 %v9166_v52  ;;  %4769 = vmatprep.subr.bf16.mxu1 %v9167_v44  ;;  %v9177_v52 = vld [vmem:[#allocation52_spill] sm:$0xff]  ;;  %v9178_v44 = vld [vmem:[#allocation53_spill] sm:$0xff] }
 0x1d2   :  { %4707 = vmatpush1.bf16.msra.mxu0 %v9168_v62  ;;  %4771 = vmatpush1.bf16.msra.mxu1 %v9169_v37  ;;  %v9179_v62 = vld [vmem:[#allocation54_spill] sm:$0xff]  ;;  %v9180_v37 = vld [vmem:[#allocation55_spill] sm:$0xff] }
 0x1d3   :  { %4709 = vmatprep.subr.bf16.mxu0 %v9170_v48  ;;  %4773 = vmatprep.subr.bf16.mxu1 %v9171_v45  ;;  %v9181_v48 = vld [vmem:[#allocation56_spill] sm:$0xff]  ;;  %v9182_v45 = vld [vmem:[#allocation57_spill] sm:$0xff] }
 0x1d6   :  { %4711 = vmatpush1.bf16.msra.mxu0 %v9172_v18  ;;  %4775 = vmatpush1.bf16.msra.mxu1 %v9173_v25  ;;  %v9183_v18 = vld [vmem:[#allocation58_spill] sm:$0xff]  ;;  %v9184_v25 = vld [vmem:[#allocation59_spill] sm:$0xff] }
 0x1d7   :  { %4713 = vmatprep.subr.bf16.mxu0 %v9174_v12  ;;  %4777 = vmatprep.subr.bf16.mxu1 %v9175_v60  ;;  %v9185_v12 = vld [vmem:[#allocation60_spill] sm:$0xff]  ;;  %v9186_v60 = vld [vmem:[#allocation61_spill] sm:$0xff] }
 0x1da   :  { %4715 = vmatpush1.bf16.msra.mxu0 %v9176_v31  ;;  %4779 = vmatpush1.bf16.msra.mxu1 %v9177_v52  ;;  %v9187_v31 = vld [vmem:[#allocation62_spill] sm:$0xff]  ;;  %v9188_v52 = vld [vmem:[#allocation63_spill] sm:$0xff] }
 0x1db   :  { %4717 = vmatprep.subr.bf16.mxu0 %v9178_v44  ;;  %4781 = vmatprep.subr.bf16.mxu1 %v9179_v62  ;;  %v9189_v44 = vld [vmem:[#allocation64_spill] sm:$0xff]  ;;  %v9190_v62 = vld [vmem:[#allocation65_spill] sm:$0xff] }
 0x1de   :  { %4719 = vmatpush1.bf16.msra.mxu0 %v9180_v37  ;;  %4783 = vmatpush1.bf16.msra.mxu1 %v9181_v48  ;;  %v9191_v37 = vld [vmem:[#allocation66_spill] sm:$0xff]  ;;  %v9192_v48 = vld [vmem:[#allocation67_spill] sm:$0xff] }
 0x1df   :  { %4721 = vmatprep.subr.bf16.mxu0 %v9182_v45  ;;  %4785 = vmatprep.subr.bf16.mxu1 %v9183_v18  ;;  %v9193_v45 = vld [vmem:[#allocation68_spill] sm:$0xff]  ;;  %v9194_v18 = vld [vmem:[#allocation5_spill] sm:$0xff] }
 0x1e2   :  { %4723 = vmatpush1.bf16.msra.mxu0 %v9184_v25  ;;  %4787 = vmatpush1.bf16.msra.mxu1 %v9185_v12  ;;  %v9195_v25 = vld [vmem:[#allocation6_spill] sm:$0xff] }
 0x1e3   :  { %4725 = vmatprep.subr.bf16.mxu0 %v9186_v60  ;;  %4789 = vmatprep.subr.bf16.mxu1 %v9187_v31  ;;  %v558_v31 = vld [vmem:[%s8911_s5] sm:$0xf] }
 0x1e4   :  { %v8080_v6 = vrot.slane %v558_v31, %v9200_v33 }
 0x1e6   :  { %4727 = vmatpush1.bf16.msra.mxu0 %v9188_v52  ;;  %4791 = vmatpush1.bf16.msra.mxu1 %v9189_v44  ;;  %v9196_v52 = vsub.s32 0, %v7919_v36  ;;  %9201 = vst [vmem:[#allocation75_spill] sm:$0xff] %v8080_v6 }
 0x1e7   :  { %4729 = vmatprep.subr.bf16.mxu0 %v9190_v62  ;;  %4793 = vmatprep.subr.bf16.mxu1 %v9191_v37  ;;  %v9198_v62 = vsub.s32 1, %v7919_v36 }
 0x1e8   :  { %v8070_v60 = vrot.slane %v558_v31, %v9196_v52 }
 0x1e9   :  { %v8074_v44 = vrot.slane %v558_v31, %v9198_v62  ;;  %v9202_v62 = vsub.s32 2, %v7919_v36 }
 0x1ea   :  { %4731 = vmatpush1.bf16.msra.mxu0 %v9192_v48  ;;  %4795 = vmatpush1.bf16.msra.mxu1 %v9193_v45  ;;  %9197 = vst [vmem:[#allocation73_spill] sm:$0xff] %v8070_v60 }
 0x1eb   :  { %4797 = vmatprep.subr.bf16.mxu0 %v9194_v18  ;;  %4829 = vmatprep.subr.bf16.mxu1 %v9195_v25  ;;  %9199 = vst [vmem:[#allocation74_spill] sm:$0xff] %v8074_v44  ;;  %v8085_v42 = vrot.slane %v558_v31, %v9202_v62 }
 0x1ed   :  { %9203 = vst [vmem:[#allocation76_spill] sm:$0xff] %v8085_v42 }
 0x260   :  { %v1058_v37 = vpop.f32.mrb[6].mxu0  ;;  %v1129_v48 = vpop.f32.mrb[6].mxu1 }
 0x261   :  { %v1059_v45 = vadd.f32 %v1058_v37, %v8070_v60  ;;  %v1060_v12 = vpop.f32.mrb[7].mxu0  ;;  %v1131_v18 = vpop.f32.mrb[7].mxu1  ;;  %v1130_v37 = vadd.f32 %v1129_v48, %v8085_v42 }
 0x262   :  { %v1061_v25 = vadd.f32 %v1060_v12, %v8074_v44  ;;  %v1132_v52 = vadd.f32 %v1131_v18, %v8080_v6 }
 0x263   :  { %v4100_v23 = vmul.f32 -1.442695, %v1059_v45 }
 0x264   :  { %v4101_v13 = vmul.f32 -1.442695, %v1061_v25  ;;  %v4102_v19 = vmul.f32 -1.442695, %v1132_v52 }
 0x265   :  { %6024 = vpow2.f32 %v4100_v23 }
 0x266   :  { %6026 = vpow2.f32 %v4101_v13 }
 0x267   :  { %6028 = vpow2.f32 %v4102_v19 }
 0x268   :  { %6030 = vtanh.f32 %v1130_v37 }
 0x26f   :  { %v6025_v60 = vpop.eup %6024 }
 0x270   :  { %v6027_v30 = vpop.eup %6026  ;;  %v1137_v12 = vadd.f32 1.0, %v6025_v60 }
 0x271   :  { %v1143_v45 = vadd.f32 1.0, %v6027_v30  ;;  %v6029_v33 = vpop.eup %6028 }
 0x272   :  { %6032 = vrcp.f32 %v1137_v12  ;;  %v6031_v23 = vpop.eup %6030  ;;  %v1150_v6 = vadd.f32 1.0, %v6029_v33 }
 0x273   :  { %6034 = vrcp.f32 %v1143_v45  ;;  %v9205_v45 = vld [vmem:[#allocation69_spill] sm:$0xff] }
 0x274   :  { %6036 = vrcp.f32 %v1150_v6 }
 0x27c   :  { %v6033_v13 = vpop.eup %6032 }
 0x27d   :  { %v6035_v25 = vpop.eup %6034  ;;  %v1154_v18 = vmul.f32 %v6033_v13, %v6031_v23 }
 0x27e   :  { %v1153_v36 = vmul.f32 0.0, %v6035_v25 }
 0x280   :  { %v8088_v31 = vadd.f32 %v1154_v18, %v1153_v36  ;;  %v1224_v52 = vpop.f32.mrb[8].mxu0  ;;  %v1295_v62 = vpop.f32.mrb[8].mxu1 }
 0x281   :  { %v1304_v48 = vrot.slane %v1224_v52, 7  ;;  %v1320_v60 = vadd.f32 %v7936_v61, %v1224_v52  ;;  %v1226_v19 = vpop.f32.mrb[9].mxu0  ;;  %v1297_v37 = vpop.f32.mrb[9].mxu1 }
 0x282   :  { %9204 = vst [vmem:[#allocation77_spill] sm:$0xff] %v8088_v31  ;;  %6038 = vtanh.f32 %v8088_v31  ;;  %v1305_v30 = vrot.slane %v1226_v19, 7  ;;  %v1321_v12 = vadd.f32 %v7941_v41, %v1226_v19  ;;  %v1307_v13 = vrot.slane %v1297_v37, 7  ;;  %v6037_v61 = vpop.eup %6036 }
 0x283   :  { %v1316_v42 = vadd.f32 %v9205_v45, %v1304_v48  ;;  %v4104_v23 = vmul.f32 -1.442695, %v1320_v60  ;;  %v1323_v52 = vadd.f32 %v7950_v24, %v1297_v37  ;;  %v1306_v31 = vrot.slane %v1295_v62, 7 }
 0x284   :  { %v1317_v33 = vadd.f32 %v7933_v51, %v1305_v30  ;;  %v4106_v18 = vmul.f32 -1.442695, %v1321_v12  ;;  %v1319_v36 = vadd.f32 %v7948_v50, %v1307_v13  ;;  %v1322_v19 = vadd.f32 %v7957_v7, %v1295_v62 }
 0x285   :  { %v4103_v25 = vmul.f32 -1.442695, %v1316_v42  ;;  %6040 = vpow2.f32 %v4104_v23  ;;  %v4108_v41 = vmul.f32 -1.442695, %v1323_v52  ;;  %v1318_v42 = vadd.f32 %v7953_v47, %v1306_v31 }
 0x286   :  { %v4105_v6 = vmul.f32 -1.442695, %v1317_v33  ;;  %v4107_v60 = vmul.f32 -1.442695, %v1319_v36 }
 0x287   :  { %6042 = vpow2.f32 %v4103_v25 }
 0x288   :  { %6044 = vpow2.f32 %v4105_v6 }
 0x289   :  { %6046 = vpow2.f32 %v4106_v18 }
 0x28a   :  { %6048 = vtanh.f32 %v1322_v19 }
 0x28b   :  { %6050 = vpow2.f32 %v4107_v60 }
 0x28c   :  { %v6039_v48 = vpop.eup %6038  ;;  %6052 = vpow2.f32 %v4108_v41 }
 0x28d   :  { %v1157_v30 = vmul.f32 %v6039_v48, %v6037_v61  ;;  %v1364_v48 = vrot.slane %v7960_v0, 7 }
 0x28f   :  { %v6041_v51 = vpop.eup %6040  ;;  %v1384_v12 = vrot.slane %v1157_v30, 7 }
 0x290   :  { %v1331_v23 = vadd.f32 1.0, %v6041_v51 }
 0x291   :  { %v6043_v33 = vpop.eup %6042  ;;  %v1386_v13 = vrot.slane %v1384_v12, 1 }
 0x292   :  { %v6045_v25 = vpop.eup %6044  ;;  %v1330_v37 = vadd.f32 1.0, %v6043_v33  ;;  %6054 = vrcp.f32 %v1331_v23 }
 0x293   :  { %v6047_v18 = vpop.eup %6046  ;;  %6056 = vtanh.f32 %v1318_v42  ;;  %v1342_v62 = vadd.f32 1.0, %v6045_v25  ;;  %1453 = vmatprep.mubr.f32.mxu0 %v1386_v13  ;;  %1524 = vmatprep.mubr.f32.mxu1 %v1386_v13  ;;  %v1365_v42 = vrot.slane %v7962_v5, 7 }
 0x294   :  { %6058 = vrcp.f32 %v1330_v37  ;;  %v1343_v61 = vadd.f32 1.0, %v6047_v18  ;;  %v6049_v31 = vpop.eup %6048 }
 0x295   :  { %6060 = vrcp.f32 %v1342_v62  ;;  %v6051_v6 = vpop.eup %6050 }
 0x296   :  { %6062 = vrcp.f32 %v1343_v61  ;;  %v6053_v36 = vpop.eup %6052  ;;  %v1356_v60 = vadd.f32 1.0, %v6051_v6 }
 0x297   :  { %v1357_v23 = vadd.f32 1.0, %v6053_v36 }
 0x298   :  { %6064 = vrcp.f32 %v1356_v60  ;;  %v9207_v60 = vld [vmem:[#allocation11_spill] sm:$0xff] }
 0x299   :  { %6066 = vrcp.f32 %v1357_v23  ;;  %v9211_v23 = vld [vmem:[#allocation15_spill] sm:$0xff] }
 0x29c   :  { %v6055_v51 = vpop.eup %6054 }
 0x29d   :  { %v6057_v52 = vpop.eup %6056  ;;  %v1371_v19 = vmul.f32 %v6055_v51, %v6049_v31 }
 0x29e   :  { %v6059_v41 = vpop.eup %6058 }
 0x29f   :  { %v6061_v30 = vpop.eup %6060  ;;  %v1370_v12 = vmul.f32 %v6059_v41, %v6057_v52 }
 0x2a0   :  { %v6063_v33 = vpop.eup %6062  ;;  %v1368_v13 = vmul.f32 %v6061_v30, %v1364_v48  ;;  %v9208_v30 = vld [vmem:[#allocation12_spill] sm:$0xff] }
 0x2a1   :  { %v1369_v25 = vmul.f32 %v6063_v33, %v1365_v42  ;;  %v9209_v42 = vld [vmem:[#allocation13_spill] sm:$0xff]  ;;  %v9212_v33 = vld [vmem:[#allocation16_spill] sm:$0xff] }
 0x2a2   :  { %v8101_v37 = vadd.f32 %v1370_v12, %v1368_v13  ;;  %v6065_v0 = vpop.eup %6064  ;;  %v9210_v12 = vld [vmem:[#allocation14_spill] sm:$0xff]  ;;  %v9213_v13 = vld [vmem:[#allocation17_spill] sm:$0xff] }
 0x2a3   :  { %v8103_v18 = vadd.f32 %v1371_v19, %v1369_v25  ;;  %v6067_v62 = vpop.eup %6066  ;;  %v9206_v19 = vld [vmem:[#allocation10_spill] sm:$0xff] }
 0x2a4   :  { %6068 = vtanh.f32 %v8101_v37  ;;  %v9214_v25 = vld [vmem:[#allocation18_spill] sm:$0xff] }
 0x2a5   :  { %6070 = vtanh.f32 %v8103_v18 }
 0x2ae   :  { %v6069_v61 = vpop.eup %6068 }
 0x2af   :  { %v6071_v31 = vpop.eup %6070  ;;  %v1376_v5 = vmul.f32 %v6069_v61, %v6065_v0  ;;  %v9215_v0 = vld [vmem:[#allocation19_spill] sm:$0xff]  ;;  %v9217_v61 = vld [vmem:[#allocation21_spill] sm:$0xff] }
 0x2b0   :  { %v1377_v6 = vmul.f32 %v6071_v31, %v6067_v62  ;;  %v9216_v62 = vld [vmem:[#allocation20_spill] sm:$0xff]  ;;  %v9218_v31 = vld [vmem:[#allocation22_spill] sm:$0xff] }
 0x2b1   :  { %v1555_v36 = vrot.slane %v1376_v5, 1 }
 0x2b2   :  { %v1380_v51 = vrot.slane %v1377_v6, 7 }
 0x2b3   :  { %v1556_v52 = vsel %vm861_vm0, %v1377_v6, %v1555_v36  ;;  %v9220_v6 = vld [vmem:[#allocation24_spill] sm:$0xff]  ;;  %v9221_v36 = vld [vmem:[#allocation25_spill] sm:$0xff] }
 0x2b4   :  { %v1382_v41 = vsel %vm1381_vm1, %v1380_v51, %v1376_v5  ;;  %v9219_v5 = vld [vmem:[#allocation23_spill] sm:$0xff]  ;;  %v9222_v51 = vld [vmem:[#allocation26_spill] sm:$0xff] }
 0x2b5   :  { %v1385_v48 = vrot.slane %v1382_v41, 1  ;;  %v9224_v41 = vld [vmem:[#allocation28_spill] sm:$0xff] }
 0x2b7   :  { %1454 = vmatmul.mubr.f32.vlgmr.msra.gmra.mrb[10].mxu0 %v1385_v48  ;;  %1525 = vmatmul.mubr.f32.vlgmr.msra.gmra.mrb[10].mxu1 %v1385_v48  ;;  %v9225_v48 = vld [vmem:[#allocation29_spill] sm:$0xff] }
 0x2b8   :  { %4799 = vmatpush1.bf16.msra.mxu0 %v7082_v53  ;;  %4831 = vmatpush1.bf16.msra.mxu1 %v7085_v54 }
 0x2b9   :  { %4801 = vmatprep.subr.bf16.mxu0 %v7097_v58  ;;  %4833 = vmatprep.subr.bf16.mxu1 %v7099_v59 }
 0x2ba   :  { %1622 = vmatprep.mubr.f32.mxu0 %v9134_v1  ;;  %1693 = vmatprep.mubr.f32.mxu1 %v9134_v1 }
 0x2bc   :  { %4803 = vmatpush1.bf16.msra.mxu0 %v7120_v2  ;;  %4835 = vmatpush1.bf16.msra.mxu1 %v7124_v3 }
 0x2bd   :  { %4805 = vmatprep.subr.bf16.mxu0 %v7126_v4  ;;  %4837 = vmatprep.subr.bf16.mxu1 %v7139_v8 }
 0x2c0   :  { %4807 = vmatpush1.bf16.msra.mxu0 %v7158_v14  ;;  %4839 = vmatpush1.bf16.msra.mxu1 %v7162_v15 }
 0x2c1   :  { %4809 = vmatprep.subr.bf16.mxu0 %v7164_v16  ;;  %4841 = vmatprep.subr.bf16.mxu1 %v7176_v20 }
 0x2c4   :  { %4811 = vmatpush1.bf16.msra.mxu0 %v7196_v26  ;;  %4843 = vmatpush1.bf16.msra.mxu1 %v7200_v27 }
 0x2c5   :  { %4813 = vmatprep.subr.bf16.mxu0 %v7202_v28  ;;  %4845 = vmatprep.subr.bf16.mxu1 %v7214_v32 }
 0x2c8   :  { %4815 = vmatpush1.bf16.msra.mxu0 %v7232_v38  ;;  %4847 = vmatpush1.bf16.msra.mxu1 %v7236_v39 }
 0x2c9   :  { %4817 = vmatprep.subr.bf16.mxu0 %v7238_v40  ;;  %4849 = vmatprep.subr.bf16.mxu1 %v7250_v46 }
 0x2cc   :  { %4819 = vmatpush1.bf16.msra.mxu0 %v7268_v55  ;;  %4851 = vmatpush1.bf16.msra.mxu1 %v7272_v56 }
 0x2cd   :  { %4821 = vmatprep.subr.bf16.mxu0 %v7274_v57  ;;  %4853 = vmatprep.subr.bf16.mxu1 %v7286_v63 }
 0x2d0   :  { %4823 = vmatpush1.bf16.msra.mxu0 %v7304_v9  ;;  %4855 = vmatpush1.bf16.msra.mxu1 %v7308_v10 }
 0x2d1   :  { %4825 = vmatprep.subr.bf16.mxu0 %v7310_v11  ;;  %4857 = vmatprep.subr.bf16.mxu1 %v7319_v17 }
 0x2d4   :  { %4827 = vmatpush1.bf16.msra.mxu0 %v7328_v21  ;;  %4859 = vmatpush1.bf16.msra.mxu1 %v7332_v22 }
 0x2d5   :  { %4861 = vmatprep.subr.bf16.mxu0 %v7350_v29  ;;  %4925 = vmatprep.subr.bf16.mxu1 %v7361_v34 }
 0x2d7   :  { %1623 = vmatmul.mubr.f32.vlgmr.msra.gmra.mrb[12].mxu0 %v1556_v52  ;;  %1694 = vmatmul.mubr.f32.vlgmr.msra.gmra.mrb[12].mxu1 %v1556_v52  ;;  %v9223_v52 = vld [vmem:[#allocation27_spill] sm:$0xff] }
 0x2d8   :  { %4863 = vmatpush1.bf16.msra.mxu0 %v7363_v35  ;;  %4927 = vmatpush1.bf16.msra.mxu1 %v7375_v43 }
 0x2d9   :  { %4865 = vmatprep.subr.bf16.mxu0 %v7388_v49  ;;  %4929 = vmatprep.subr.bf16.mxu1 %v9206_v19  ;;  %v9273_v19 = vld [vmem:[#allocation72_spill] sm:$0xff] }
 0x2dc   :  { %4867 = vmatpush1.bf16.msra.mxu0 %v9207_v60  ;;  %4931 = vmatpush1.bf16.msra.mxu1 %v9208_v30 }
 0x2dd   :  { %4869 = vmatprep.subr.bf16.mxu0 %v9209_v42  ;;  %4933 = vmatprep.subr.bf16.mxu1 %v9210_v12 }
 0x2e0   :  { %4871 = vmatpush1.bf16.msra.mxu0 %v9211_v23  ;;  %4935 = vmatpush1.bf16.msra.mxu1 %v9212_v33 }
 0x2e1   :  { %4873 = vmatprep.subr.bf16.mxu0 %v9213_v13  ;;  %4937 = vmatprep.subr.bf16.mxu1 %v9214_v25  ;;  %v9267_v25 = vld [vmem:[#allocation73_spill] sm:$0xff] }
 0x2e4   :  { %4875 = vmatpush1.bf16.msra.mxu0 %v9215_v0  ;;  %4939 = vmatpush1.bf16.msra.mxu1 %v9216_v62  ;;  %v9226_v0 = vld [vmem:[#allocation30_spill] sm:$0xff]  ;;  %v9227_v62 = vld [vmem:[#allocation31_spill] sm:$0xff] }
 0x2e5   :  { %4877 = vmatprep.subr.bf16.mxu0 %v9217_v61  ;;  %4941 = vmatprep.subr.bf16.mxu1 %v9218_v31  ;;  %v9228_v61 = vld [vmem:[#allocation32_spill] sm:$0xff]  ;;  %v9229_v31 = vld [vmem:[#allocation33_spill] sm:$0xff] }
 0x2e8   :  { %4879 = vmatpush1.bf16.msra.mxu0 %v9219_v5  ;;  %4943 = vmatpush1.bf16.msra.mxu1 %v9220_v6  ;;  %v9230_v5 = vld [vmem:[#allocation34_spill] sm:$0xff]  ;;  %v9231_v6 = vld [vmem:[#allocation35_spill] sm:$0xff] }
 0x2e9   :  { %4881 = vmatprep.subr.bf16.mxu0 %v9221_v36  ;;  %4945 = vmatprep.subr.bf16.mxu1 %v9222_v51  ;;  %v9232_v36 = vld [vmem:[#allocation36_spill] sm:$0xff]  ;;  %v9233_v51 = vld [vmem:[#allocation37_spill] sm:$0xff] }
 0x2ec   :  { %4883 = vmatpush1.bf16.msra.mxu0 %v9223_v52  ;;  %4947 = vmatpush1.bf16.msra.mxu1 %v9224_v41  ;;  %v9234_v52 = vld [vmem:[#allocation38_spill] sm:$0xff]  ;;  %v9235_v41 = vld [vmem:[#allocation39_spill] sm:$0xff] }
 0x2ed   :  { %4885 = vmatprep.subr.bf16.mxu0 %v9225_v48  ;;  %4949 = vmatprep.subr.bf16.mxu1 %v9226_v0  ;;  %v9236_v48 = vld [vmem:[#allocation40_spill] sm:$0xff]  ;;  %v9237_v0 = vld [vmem:[#allocation41_spill] sm:$0xff] }
 0x2f0   :  { %4887 = vmatpush1.bf16.msra.mxu0 %v9227_v62  ;;  %4951 = vmatpush1.bf16.msra.mxu1 %v9228_v61  ;;  %v9238_v62 = vld [vmem:[#allocation42_spill] sm:$0xff]  ;;  %v9239_v61 = vld [vmem:[#allocation43_spill] sm:$0xff] }
 0x2f1   :  { %4889 = vmatprep.subr.bf16.mxu0 %v9229_v31  ;;  %4953 = vmatprep.subr.bf16.mxu1 %v9230_v5  ;;  %v9240_v31 = vld [vmem:[#allocation44_spill] sm:$0xff]  ;;  %v9241_v5 = vld [vmem:[#allocation45_spill] sm:$0xff] }
 0x2f4   :  { %4891 = vmatpush1.bf16.msra.mxu0 %v9231_v6  ;;  %4955 = vmatpush1.bf16.msra.mxu1 %v9232_v36  ;;  %v9242_v6 = vld [vmem:[#allocation46_spill] sm:$0xff]  ;;  %v9243_v36 = vld [vmem:[#allocation47_spill] sm:$0xff] }
 0x2f5   :  { %4893 = vmatprep.subr.bf16.mxu0 %v9233_v51  ;;  %4957 = vmatprep.subr.bf16.mxu1 %v9234_v52  ;;  %v9244_v51 = vld [vmem:[#allocation48_spill] sm:$0xff]  ;;  %v9245_v52 = vld [vmem:[#allocation49_spill] sm:$0xff] }
 0x2f8   :  { %4895 = vmatpush1.bf16.msra.mxu0 %v9235_v41  ;;  %4959 = vmatpush1.bf16.msra.mxu1 %v9236_v48  ;;  %v9246_v41 = vld [vmem:[#allocation50_spill] sm:$0xff]  ;;  %v9247_v48 = vld [vmem:[#allocation51_spill] sm:$0xff] }
 0x2f9   :  { %4897 = vmatprep.subr.bf16.mxu0 %v9237_v0  ;;  %4961 = vmatprep.subr.bf16.mxu1 %v9238_v62  ;;  %v9248_v0 = vld [vmem:[#allocation52_spill] sm:$0xff]  ;;  %v9249_v62 = vld [vmem:[#allocation53_spill] sm:$0xff] }
 0x2fc   :  { %4899 = vmatpush1.bf16.msra.mxu0 %v9239_v61  ;;  %4963 = vmatpush1.bf16.msra.mxu1 %v9240_v31  ;;  %v9250_v61 = vld [vmem:[#allocation54_spill] sm:$0xff]  ;;  %v9251_v31 = vld [vmem:[#allocation55_spill] sm:$0xff] }
 0x2fd   :  { %4901 = vmatprep.subr.bf16.mxu0 %v9241_v5  ;;  %4965 = vmatprep.subr.bf16.mxu1 %v9242_v6  ;;  %v9252_v5 = vld [vmem:[#allocation56_spill] sm:$0xff]  ;;  %v9253_v6 = vld [vmem:[#allocation57_spill] sm:$0xff] }
 0x300   :  { %4903 = vmatpush1.bf16.msra.mxu0 %v9243_v36  ;;  %4967 = vmatpush1.bf16.msra.mxu1 %v9244_v51  ;;  %v9254_v36 = vld [vmem:[#allocation58_spill] sm:$0xff]  ;;  %v9255_v51 = vld [vmem:[#allocation59_spill] sm:$0xff] }
 0x301   :  { %4905 = vmatprep.subr.bf16.mxu0 %v9245_v52  ;;  %4969 = vmatprep.subr.bf16.mxu1 %v9246_v41  ;;  %v9256_v52 = vld [vmem:[#allocation60_spill] sm:$0xff]  ;;  %v9257_v41 = vld [vmem:[#allocation61_spill] sm:$0xff] }
 0x304   :  { %4907 = vmatpush1.bf16.msra.mxu0 %v9247_v48  ;;  %4971 = vmatpush1.bf16.msra.mxu1 %v9248_v0  ;;  %v9258_v48 = vld [vmem:[#allocation62_spill] sm:$0xff]  ;;  %v9259_v0 = vld [vmem:[#allocation63_spill] sm:$0xff] }
 0x305   :  { %4909 = vmatprep.subr.bf16.mxu0 %v9249_v62  ;;  %4973 = vmatprep.subr.bf16.mxu1 %v9250_v61  ;;  %v9260_v62 = vld [vmem:[#allocation64_spill] sm:$0xff]  ;;  %v9261_v61 = vld [vmem:[#allocation65_spill] sm:$0xff] }
 0x308   :  { %4911 = vmatpush1.bf16.msra.mxu0 %v9251_v31  ;;  %4975 = vmatpush1.bf16.msra.mxu1 %v9252_v5  ;;  %v9262_v31 = vld [vmem:[#allocation66_spill] sm:$0xff]  ;;  %v9263_v5 = vld [vmem:[#allocation67_spill] sm:$0xff] }
 0x309   :  { %4913 = vmatprep.subr.bf16.mxu0 %v9253_v6  ;;  %4977 = vmatprep.subr.bf16.mxu1 %v9254_v36  ;;  %v9264_v6 = vld [vmem:[#allocation68_spill] sm:$0xff]  ;;  %v9265_v36 = vld [vmem:[#allocation5_spill] sm:$0xff] }
 0x30c   :  { %4915 = vmatpush1.bf16.msra.mxu0 %v9255_v51  ;;  %4979 = vmatpush1.bf16.msra.mxu1 %v9256_v52  ;;  %v9266_v51 = vld [vmem:[#allocation6_spill] sm:$0xff] }
 0x30d   :  { %4917 = vmatprep.subr.bf16.mxu0 %v9257_v41  ;;  %4981 = vmatprep.subr.bf16.mxu1 %v9258_v48 }
 0x310   :  { %4919 = vmatpush1.bf16.msra.mxu0 %v9259_v0  ;;  %4983 = vmatpush1.bf16.msra.mxu1 %v9260_v62 }
 0x311   :  { %4921 = vmatprep.subr.bf16.mxu0 %v9261_v61  ;;  %4985 = vmatprep.subr.bf16.mxu1 %v9262_v31  ;;  %v9268_v31 = vld [vmem:[#allocation76_spill] sm:$0xff] }
 0x314   :  { %4923 = vmatpush1.bf16.msra.mxu0 %v9263_v5  ;;  %4987 = vmatpush1.bf16.msra.mxu1 %v9264_v6 }
 0x315   :  { %4989 = vmatprep.subr.bf16.mxu0 %v9265_v36  ;;  %5021 = vmatprep.subr.bf16.mxu1 %v9266_v51  ;;  %v9269_v51 = vld [vmem:[#allocation75_spill] sm:$0xff] }
 0x38a   :  { %v1455_v52 = vpop.f32.mrb[10].mxu0  ;;  %v1526_v41 = vpop.f32.mrb[10].mxu1 }
 0x38b   :  { %v1456_v48 = vadd.f32 %v1455_v52, %v9267_v25  ;;  %v1457_v13 = vpop.f32.mrb[11].mxu0  ;;  %v1528_v0 = vpop.f32.mrb[11].mxu1  ;;  %v1527_v5 = vadd.f32 %v1526_v41, %v9268_v31 }
 0x38c   :  { %v1458_v62 = vadd.f32 %v1457_v13, %v8074_v44  ;;  %v1529_v42 = vadd.f32 %v1528_v0, %v9269_v51 }
 0x38d   :  { %v4109_v33 = vmul.f32 -1.442695, %v1456_v48 }
 0x38e   :  { %v4110_v61 = vmul.f32 -1.442695, %v1458_v62  ;;  %v4111_v52 = vmul.f32 -1.442695, %v1529_v42  ;;  %v9270_v62 = vld [vmem:[#allocation77_spill] sm:$0xff]  ;;  %v9271_v42 = vld [vmem:[#allocation71_spill] sm:$0xff] }
 0x38f   :  { %6072 = vpow2.f32 %v4109_v33 }
 0x390   :  { %6074 = vpow2.f32 %v4110_v61 }
 0x391   :  { %6076 = vtanh.f32 %v1527_v5 }
 0x399   :  { %v6073_v23 = vpop.eup %6072 }
 0x39a   :  { %v6075_v6 = vpop.eup %6074  ;;  %v1534_v12 = vadd.f32 1.0, %v6073_v23 }
 0x39b   :  { %v1540_v36 = vadd.f32 1.0, %v6075_v6  ;;  %v6077_v25 = vpop.eup %6076 }
 0x39c   :  { %6078 = vrcp.f32 %v1534_v12 }
 0x39d   :  { %6080 = vrcp.f32 %v1540_v36 }
 0x39e   :  { %6082 = vpow2.f32 %v4111_v52  ;;  %v9272_v52 = vld [vmem:[#allocation70_spill] sm:$0xff] }
 0x3a6   :  { %v6079_v30 = vpop.eup %6078 }
 0x3a7   :  { %v6081_v13 = vpop.eup %6080  ;;  %v1551_v48 = vmul.f32 %v6079_v30, %v6077_v25 }
 0x3a8   :  { %v1550_v33 = vmul.f32 %v6081_v13, %v9270_v62  ;;  %v6083_v25 = vpop.eup %6082 }
 0x3a9   :  { %v1547_v43 = vadd.f32 1.0, %v6083_v25 }
 0x3aa   :  { %v8211_v61 = vadd.f32 %v1551_v48, %v1550_v33  ;;  %v1624_v41 = vpop.f32.mrb[12].mxu0  ;;  %v1695_v31 = vpop.f32.mrb[12].mxu1 }
 0x3ab   :  { %v1704_v44 = vrot.slane %v1624_v41, 6  ;;  %v1708_v23 = vrot.slane %v1624_v41, 7  ;;  %v1626_v5 = vpop.f32.mrb[13].mxu0  ;;  %v1697_v6 = vpop.f32.mrb[13].mxu1  ;;  %v1706_v35 = vrot.slane %v1695_v31, 6 }
 0x3ac   :  { %v1705_v12 = vrot.slane %v1626_v5, 6  ;;  %v1709_v36 = vrot.slane %v1626_v5, 7  ;;  %v1707_v49 = vrot.slane %v1697_v6, 6  ;;  %v1711_v41 = vrot.slane %v1697_v6, 7 }
 0x3ad   :  { %v1720_v0 = vadd.f32 %v9205_v45, %v1704_v44  ;;  %v1724_v51 = vadd.f32 %v9271_v42, %v1708_v23  ;;  %v1710_v5 = vrot.slane %v1695_v31, 7 }
 0x3ae   :  { %v1721_v60 = vadd.f32 %v9272_v52, %v1705_v12  ;;  %v1725_v30 = vadd.f32 %v9273_v19, %v1709_v36  ;;  %v1723_v44 = vadd.f32 %v7948_v50, %v1707_v49  ;;  %v1727_v23 = vadd.f32 %v7950_v24, %v1711_v41 }
 0x3af   :  { %v4112_v13 = vmul.f32 -1.442695, %v1720_v0  ;;  %v4113_v48 = vmul.f32 -1.442695, %v1724_v51  ;;  %v1722_v12 = vadd.f32 %v7953_v47, %v1706_v35  ;;  %v1726_v51 = vadd.f32 %v7957_v7, %v1710_v5 }
 0x3b0   :  { %v4114_v62 = vmul.f32 -1.442695, %v1721_v60  ;;  %v4115_v33 = vmul.f32 -1.442695, %v1725_v30  ;;  %v4116_v60 = vmul.f32 -1.442695, %v1723_v44 }
 0x3b1   :  { %6084 = vpow2.f32 %v4112_v13  ;;  %v4117_v36 = vmul.f32 -1.442695, %v1727_v23 }
 0x3b2   :  { %6086 = vpow2.f32 %v4113_v48 }
 0x3b3   :  { %6088 = vpow2.f32 %v4114_v62 }
 0x3b4   :  { %6090 = vpow2.f32 %v4115_v33 }
 0x3b5   :  { %6092 = vrcp.f32 %v1547_v43 }
 0x3b6   :  { %6094 = vtanh.f32 %v8211_v61 }
 0x3b7   :  { %6096 = vtanh.f32 %v1722_v12 }
 0x3b8   :  { %6098 = vtanh.f32 %v1726_v51 }
 0x3b9   :  { %6100 = vpow2.f32 %v4116_v60 }
 0x3ba   :  { %6102 = vpow2.f32 %v4117_v36 }
 0x3bb   :  { %v6085_v6 = vpop.eup %6084 }
 0x3bc   :  { %v6087_v0 = vpop.eup %6086  ;;  %v1734_v31 = vadd.f32 1.0, %v6085_v6  ;;  %v1768_v6 = vrot.slane %v8101_v37, 7 }
 0x3bd   :  { %v6089_v30 = vpop.eup %6088  ;;  %v1735_v25 = vadd.f32 1.0, %v6087_v0 }
 0x3be   :  { %v6091_v49 = vpop.eup %6090  ;;  %6104 = vrcp.f32 %v1734_v31  ;;  %v1746_v43 = vadd.f32 1.0, %v6089_v30 }
 0x3bf   :  { %6106 = vrcp.f32 %v1735_v25  ;;  %v1747_v35 = vadd.f32 1.0, %v6091_v49  ;;  %v6093_v13 = vpop.eup %6092  ;;  %v1769_v25 = vrot.slane %v8103_v18, 7 }
 0x3c0   :  { %6108 = vrcp.f32 %v1746_v43  ;;  %v6095_v48 = vpop.eup %6094 }
 0x3c1   :  { %6110 = vrcp.f32 %v1747_v35  ;;  %v1554_v62 = vmul.f32 %v6095_v48, %v6093_v13  ;;  %v6097_v33 = vpop.eup %6096 }
 0x3c2   :  { %v6099_v5 = vpop.eup %6098 }
 0x3c3   :  { %v1788_v41 = vrot.slane %v1554_v62, 6  ;;  %v6101_v44 = vpop.eup %6100 }
 0x3c4   :  { %v6103_v12 = vpop.eup %6102  ;;  %v1760_v0 = vadd.f32 1.0, %v6101_v44 }
 0x3c5   :  { %v1790_v23 = vrot.slane %v1788_v41, 2  ;;  %v1761_v49 = vadd.f32 1.0, %v6103_v12 }
 0x3c6   :  { %6112 = vrcp.f32 %v1760_v0  ;;  %v9274_v0 = vld [vmem:[#allocation7_spill] sm:$0xff] }
 0x3c7   :  { %1857 = vmatprep.mubr.f32.mxu0 %v1790_v23  ;;  %1928 = vmatprep.mubr.f32.mxu1 %v1790_v23  ;;  %6114 = vrcp.f32 %v1761_v49  ;;  %v9278_v49 = vld [vmem:[#allocation11_spill] sm:$0xff] }
 0x3c8   :  { %v6105_v51 = vpop.eup %6104 }
 0x3c9   :  { %v6107_v60 = vpop.eup %6106  ;;  %v1774_v36 = vmul.f32 %v6105_v51, %v6097_v33 }
 0x3ca   :  { %v6109_v31 = vpop.eup %6108  ;;  %v1775_v30 = vmul.f32 %v6107_v60, %v6099_v5 }
 0x3cb   :  { %v6111_v43 = vpop.eup %6110  ;;  %v1772_v35 = vmul.f32 %v6109_v31, %v1768_v6  ;;  %v9275_v31 = vld [vmem:[#allocation8_spill] sm:$0xff] }
 0x3cc   :  { %v1773_v13 = vmul.f32 %v6111_v43, %v1769_v25  ;;  %v9277_v25 = vld [vmem:[#allocation10_spill] sm:$0xff]  ;;  %v9279_v43 = vld [vmem:[#allocation12_spill] sm:$0xff] }
 0x3cd   :  { %v8224_v48 = vadd.f32 %v1774_v36, %v1772_v35  ;;  %v9280_v35 = vld [vmem:[#allocation13_spill] sm:$0xff] }
 0x3ce   :  { %v8226_v62 = vadd.f32 %v1775_v30, %v1773_v13  ;;  %v9276_v30 = vld [vmem:[#allocation9_spill] sm:$0xff]  ;;  %v9281_v13 = vld [vmem:[#allocation14_spill] sm:$0xff] }
 0x3cf   :  { %6116 = vtanh.f32 %v8224_v48 }
 0x3d0   :  { %6118 = vtanh.f32 %v8226_v62  ;;  %v6113_v37 = vpop.eup %6112 }
 0x3d1   :  { %v6115_v33 = vpop.eup %6114 }
 0x3d9   :  { %v6117_v41 = vpop.eup %6116 }
 0x3da   :  { %v6119_v5 = vpop.eup %6118  ;;  %v1780_v44 = vmul.f32 %v6117_v41, %v6113_v37  ;;  %v9282_v37 = vld [vmem:[#allocation15_spill] sm:$0xff]  ;;  %v9284_v41 = vld [vmem:[#allocation17_spill] sm:$0xff] }
 0x3db   :  { %v1781_v18 = vmul.f32 %v6119_v5, %v6115_v33  ;;  %v9283_v33 = vld [vmem:[#allocation16_spill] sm:$0xff]  ;;  %v9285_v5 = vld [vmem:[#allocation18_spill] sm:$0xff] }
 0x3dc   :  { %v1959_v23 = vrot.slane %v1780_v44, 2 }
 0x3dd   :  { %v1784_v12 = vrot.slane %v1781_v18, 7  ;;  %v1960_v51 = vrot.slane %v1781_v18, 1  ;;  %v9287_v18 = vld [vmem:[#allocation20_spill] sm:$0xff] }
 0x3df   :  { %v1786_v60 = vsel %vm1785_vm2, %v1784_v12, %v1780_v44  ;;  %v1961_v36 = vsel %vm861_vm0, %v1960_v51, %v1959_v23  ;;  %v9286_v44 = vld [vmem:[#allocation19_spill] sm:$0xff]  ;;  %v9288_v23 = vld [vmem:[#allocation21_spill] sm:$0xff]  ;;  %v9289_v12 = vld [vmem:[#allocation22_spill] sm:$0xff] }
 0x3e0   :  { %v1789_v6 = vrot.slane %v1786_v60, 2  ;;  %v9290_v51 = vld [vmem:[#allocation23_spill] sm:$0xff]  ;;  %v9291_v60 = vld [vmem:[#allocation24_spill] sm:$0xff] }
 0x3e2   :  { %1858 = vmatmul.mubr.f32.vlgmr.msra.gmra.mrb[14].mxu0 %v1789_v6  ;;  %1929 = vmatmul.mubr.f32.vlgmr.msra.gmra.mrb[14].mxu1 %v1789_v6  ;;  %v9293_v6 = vld [vmem:[#allocation26_spill] sm:$0xff] }
 0x3e3   :  { %4991 = vmatpush1.bf16.msra.mxu0 %v7082_v53  ;;  %5023 = vmatpush1.bf16.msra.mxu1 %v7085_v54 }
 0x3e4   :  { %4993 = vmatprep.subr.bf16.mxu0 %v7097_v58  ;;  %5025 = vmatprep.subr.bf16.mxu1 %v7099_v59 }
 0x3e5   :  { %2027 = vmatprep.mubr.f32.mxu0 %v9134_v1  ;;  %2098 = vmatprep.mubr.f32.mxu1 %v9134_v1 }
 0x3e7   :  { %4995 = vmatpush1.bf16.msra.mxu0 %v7120_v2  ;;  %5027 = vmatpush1.bf16.msra.mxu1 %v7124_v3 }
 0x3e8   :  { %4997 = vmatprep.subr.bf16.mxu0 %v7126_v4  ;;  %5029 = vmatprep.subr.bf16.mxu1 %v7139_v8 }
 0x3eb   :  { %4999 = vmatpush1.bf16.msra.mxu0 %v7158_v14  ;;  %5031 = vmatpush1.bf16.msra.mxu1 %v7162_v15 }
 0x3ec   :  { %5001 = vmatprep.subr.bf16.mxu0 %v7164_v16  ;;  %5033 = vmatprep.subr.bf16.mxu1 %v7176_v20 }
 0x3ef   :  { %5003 = vmatpush1.bf16.msra.mxu0 %v7196_v26  ;;  %5035 = vmatpush1.bf16.msra.mxu1 %v7200_v27 }
 0x3f0   :  { %5005 = vmatprep.subr.bf16.mxu0 %v7202_v28  ;;  %5037 = vmatprep.subr.bf16.mxu1 %v7214_v32 }
 0x3f3   :  { %5007 = vmatpush1.bf16.msra.mxu0 %v7232_v38  ;;  %5039 = vmatpush1.bf16.msra.mxu1 %v7236_v39 }
 0x3f4   :  { %5009 = vmatprep.subr.bf16.mxu0 %v7238_v40  ;;  %5041 = vmatprep.subr.bf16.mxu1 %v7250_v46 }
 0x3f7   :  { %5011 = vmatpush1.bf16.msra.mxu0 %v7268_v55  ;;  %5043 = vmatpush1.bf16.msra.mxu1 %v7272_v56 }
 0x3f8   :  { %5013 = vmatprep.subr.bf16.mxu0 %v7274_v57  ;;  %5045 = vmatprep.subr.bf16.mxu1 %v7286_v63 }
 0x3fb   :  { %5015 = vmatpush1.bf16.msra.mxu0 %v7304_v9  ;;  %5047 = vmatpush1.bf16.msra.mxu1 %v7308_v10 }
 0x3fc   :  { %5017 = vmatprep.subr.bf16.mxu0 %v7310_v11  ;;  %5049 = vmatprep.subr.bf16.mxu1 %v7319_v17 }
 0x3ff   :  { %5019 = vmatpush1.bf16.msra.mxu0 %v7328_v21  ;;  %5051 = vmatpush1.bf16.msra.mxu1 %v7332_v22 }
 0x400   :  { %5053 = vmatprep.subr.bf16.mxu0 %v7350_v29  ;;  %5117 = vmatprep.subr.bf16.mxu1 %v7361_v34 }
 0x402   :  { %2028 = vmatmul.mubr.f32.vlgmr.msra.gmra.mrb[16].mxu0 %v1961_v36  ;;  %2099 = vmatmul.mubr.f32.vlgmr.msra.gmra.mrb[16].mxu1 %v1961_v36  ;;  %v9292_v36 = vld [vmem:[#allocation25_spill] sm:$0xff] }
 0x403   :  { %5055 = vmatpush1.bf16.msra.mxu0 %v9274_v0  ;;  %5119 = vmatpush1.bf16.msra.mxu1 %v9275_v31 }
 0x404   :  { %5057 = vmatprep.subr.bf16.mxu0 %v9276_v30  ;;  %5121 = vmatprep.subr.bf16.mxu1 %v9277_v25 }
 0x407   :  { %5059 = vmatpush1.bf16.msra.mxu0 %v9278_v49  ;;  %5123 = vmatpush1.bf16.msra.mxu1 %v9279_v43 }
 0x408   :  { %5061 = vmatprep.subr.bf16.mxu0 %v9280_v35  ;;  %5125 = vmatprep.subr.bf16.mxu1 %v9281_v13  ;;  %v9339_v35 = vld [vmem:[#allocation74_spill] sm:$0xff] }
 0x40b   :  { %5063 = vmatpush1.bf16.msra.mxu0 %v9282_v37  ;;  %5127 = vmatpush1.bf16.msra.mxu1 %v9283_v33  ;;  %v9294_v33 = vld [vmem:[#allocation27_spill] sm:$0xff]  ;;  %v9338_v37 = vld [vmem:[#allocation73_spill] sm:$0xff] }
 0x40c   :  { %5065 = vmatprep.subr.bf16.mxu0 %v9284_v41  ;;  %5129 = vmatprep.subr.bf16.mxu1 %v9285_v5  ;;  %v9295_v41 = vld [vmem:[#allocation28_spill] sm:$0xff]  ;;  %v9296_v5 = vld [vmem:[#allocation29_spill] sm:$0xff] }
 0x40f   :  { %5067 = vmatpush1.bf16.msra.mxu0 %v9286_v44  ;;  %5131 = vmatpush1.bf16.msra.mxu1 %v9287_v18  ;;  %v9297_v44 = vld [vmem:[#allocation30_spill] sm:$0xff]  ;;  %v9298_v18 = vld [vmem:[#allocation31_spill] sm:$0xff] }
 0x410   :  { %5069 = vmatprep.subr.bf16.mxu0 %v9288_v23  ;;  %5133 = vmatprep.subr.bf16.mxu1 %v9289_v12  ;;  %v9299_v23 = vld [vmem:[#allocation32_spill] sm:$0xff]  ;;  %v9300_v12 = vld [vmem:[#allocation33_spill] sm:$0xff] }
 0x413   :  { %5071 = vmatpush1.bf16.msra.mxu0 %v9290_v51  ;;  %5135 = vmatpush1.bf16.msra.mxu1 %v9291_v60  ;;  %v9301_v51 = vld [vmem:[#allocation34_spill] sm:$0xff]  ;;  %v9302_v60 = vld [vmem:[#allocation35_spill] sm:$0xff] }
 0x414   :  { %5073 = vmatprep.subr.bf16.mxu0 %v9292_v36  ;;  %5137 = vmatprep.subr.bf16.mxu1 %v9293_v6  ;;  %v9303_v36 = vld [vmem:[#allocation36_spill] sm:$0xff]  ;;  %v9304_v6 = vld [vmem:[#allocation37_spill] sm:$0xff] }
 0x417   :  { %5075 = vmatpush1.bf16.msra.mxu0 %v9294_v33  ;;  %5139 = vmatpush1.bf16.msra.mxu1 %v9295_v41  ;;  %v9305_v33 = vld [vmem:[#allocation38_spill] sm:$0xff]  ;;  %v9306_v41 = vld [vmem:[#allocation39_spill] sm:$0xff] }
 0x418   :  { %5077 = vmatprep.subr.bf16.mxu0 %v9296_v5  ;;  %5141 = vmatprep.subr.bf16.mxu1 %v9297_v44  ;;  %v9307_v5 = vld [vmem:[#allocation40_spill] sm:$0xff]  ;;  %v9308_v44 = vld [vmem:[#allocation41_spill] sm:$0xff] }
 0x41b   :  { %5079 = vmatpush1.bf16.msra.mxu0 %v9298_v18  ;;  %5143 = vmatpush1.bf16.msra.mxu1 %v9299_v23  ;;  %v9309_v18 = vld [vmem:[#allocation42_spill] sm:$0xff]  ;;  %v9310_v23 = vld [vmem:[#allocation43_spill] sm:$0xff] }
 0x41c   :  { %5081 = vmatprep.subr.bf16.mxu0 %v9300_v12  ;;  %5145 = vmatprep.subr.bf16.mxu1 %v9301_v51  ;;  %v9311_v12 = vld [vmem:[#allocation44_spill] sm:$0xff]  ;;  %v9312_v51 = vld [vmem:[#allocation45_spill] sm:$0xff] }
 0x41f   :  { %5083 = vmatpush1.bf16.msra.mxu0 %v9302_v60  ;;  %5147 = vmatpush1.bf16.msra.mxu1 %v9303_v36  ;;  %v9313_v60 = vld [vmem:[#allocation46_spill] sm:$0xff]  ;;  %v9314_v36 = vld [vmem:[#allocation47_spill] sm:$0xff] }
 0x420   :  { %5085 = vmatprep.subr.bf16.mxu0 %v9304_v6  ;;  %5149 = vmatprep.subr.bf16.mxu1 %v9305_v33  ;;  %v9315_v6 = vld [vmem:[#allocation48_spill] sm:$0xff]  ;;  %v9316_v33 = vld [vmem:[#allocation49_spill] sm:$0xff] }
 0x423   :  { %5087 = vmatpush1.bf16.msra.mxu0 %v9306_v41  ;;  %5151 = vmatpush1.bf16.msra.mxu1 %v9307_v5  ;;  %v9317_v41 = vld [vmem:[#allocation50_spill] sm:$0xff]  ;;  %v9318_v5 = vld [vmem:[#allocation51_spill] sm:$0xff] }
 0x424   :  { %5089 = vmatprep.subr.bf16.mxu0 %v9308_v44  ;;  %5153 = vmatprep.subr.bf16.mxu1 %v9309_v18  ;;  %v9319_v44 = vld [vmem:[#allocation52_spill] sm:$0xff]  ;;  %v9320_v18 = vld [vmem:[#allocation53_spill] sm:$0xff] }
 0x427   :  { %5091 = vmatpush1.bf16.msra.mxu0 %v9310_v23  ;;  %5155 = vmatpush1.bf16.msra.mxu1 %v9311_v12  ;;  %v9321_v23 = vld [vmem:[#allocation54_spill] sm:$0xff]  ;;  %v9322_v12 = vld [vmem:[#allocation55_spill] sm:$0xff] }
 0x428   :  { %5093 = vmatprep.subr.bf16.mxu0 %v9312_v51  ;;  %5157 = vmatprep.subr.bf16.mxu1 %v9313_v60  ;;  %v9323_v51 = vld [vmem:[#allocation56_spill] sm:$0xff]  ;;  %v9324_v60 = vld [vmem:[#allocation57_spill] sm:$0xff] }
 0x42b   :  { %5095 = vmatpush1.bf16.msra.mxu0 %v9314_v36  ;;  %5159 = vmatpush1.bf16.msra.mxu1 %v9315_v6  ;;  %v9325_v36 = vld [vmem:[#allocation58_spill] sm:$0xff]  ;;  %v9326_v6 = vld [vmem:[#allocation59_spill] sm:$0xff] }
 0x42c   :  { %5097 = vmatprep.subr.bf16.mxu0 %v9316_v33  ;;  %5161 = vmatprep.subr.bf16.mxu1 %v9317_v41  ;;  %v9327_v33 = vld [vmem:[#allocation60_spill] sm:$0xff]  ;;  %v9328_v41 = vld [vmem:[#allocation61_spill] sm:$0xff] }
 0x42f   :  { %5099 = vmatpush1.bf16.msra.mxu0 %v9318_v5  ;;  %5163 = vmatpush1.bf16.msra.mxu1 %v9319_v44  ;;  %v9329_v5 = vld [vmem:[#allocation62_spill] sm:$0xff]  ;;  %v9330_v44 = vld [vmem:[#allocation63_spill] sm:$0xff] }
 0x430   :  { %5101 = vmatprep.subr.bf16.mxu0 %v9320_v18  ;;  %5165 = vmatprep.subr.bf16.mxu1 %v9321_v23  ;;  %v9331_v18 = vld [vmem:[#allocation64_spill] sm:$0xff]  ;;  %v9332_v23 = vld [vmem:[#allocation65_spill] sm:$0xff] }
 0x433   :  { %5103 = vmatpush1.bf16.msra.mxu0 %v9322_v12  ;;  %5167 = vmatpush1.bf16.msra.mxu1 %v9323_v51  ;;  %v9333_v12 = vld [vmem:[#allocation66_spill] sm:$0xff]  ;;  %v9334_v51 = vld [vmem:[#allocation67_spill] sm:$0xff] }
 0x434   :  { %5105 = vmatprep.subr.bf16.mxu0 %v9324_v60  ;;  %5169 = vmatprep.subr.bf16.mxu1 %v9325_v36  ;;  %v9335_v60 = vld [vmem:[#allocation68_spill] sm:$0xff]  ;;  %v9336_v36 = vld [vmem:[#allocation5_spill] sm:$0xff] }
 0x437   :  { %5107 = vmatpush1.bf16.msra.mxu0 %v9326_v6  ;;  %5171 = vmatpush1.bf16.msra.mxu1 %v9327_v33  ;;  %v9337_v6 = vld [vmem:[#allocation6_spill] sm:$0xff] }
 0x438   :  { %5109 = vmatprep.subr.bf16.mxu0 %v9328_v41  ;;  %5173 = vmatprep.subr.bf16.mxu1 %v9329_v5 }
 0x43b   :  { %5111 = vmatpush1.bf16.msra.mxu0 %v9330_v44  ;;  %5175 = vmatpush1.bf16.msra.mxu1 %v9331_v18 }
 0x43c   :  { %5113 = vmatprep.subr.bf16.mxu0 %v9332_v23  ;;  %5177 = vmatprep.subr.bf16.mxu1 %v9333_v12  ;;  %v9340_v12 = vld [vmem:[#allocation76_spill] sm:$0xff] }
 0x43f   :  { %5115 = vmatpush1.bf16.msra.mxu0 %v9334_v51  ;;  %5179 = vmatpush1.bf16.msra.mxu1 %v9335_v60 }
 0x440   :  { %5181 = vmatprep.subr.bf16.mxu0 %v9336_v36  ;;  %5213 = vmatprep.subr.bf16.mxu1 %v9337_v6  ;;  %v9341_v6 = vld [vmem:[#allocation75_spill] sm:$0xff] }
 0x4b5   :  { %v1859_v33 = vpop.f32.mrb[14].mxu0  ;;  %v1930_v41 = vpop.f32.mrb[14].mxu1 }
 0x4b6   :  { %v1860_v5 = vadd.f32 %v1859_v33, %v9338_v37  ;;  %v1861_v13 = vpop.f32.mrb[15].mxu0  ;;  %v1932_v44 = vpop.f32.mrb[15].mxu1  ;;  %v1931_v51 = vadd.f32 %v1930_v41, %v9340_v12 }
 0x4b7   :  { %v1862_v18 = vadd.f32 %v1861_v13, %v9339_v35  ;;  %v1933_v30 = vadd.f32 %v1932_v44, %v9341_v6 }
 0x4b8   :  { %v4118_v43 = vmul.f32 -1.442695, %v1860_v5 }
 0x4b9   :  { %v4119_v23 = vmul.f32 -1.442695, %v1862_v18  ;;  %v4120_v33 = vmul.f32 -1.442695, %v1933_v30 }
 0x4ba   :  { %6120 = vpow2.f32 %v4118_v43 }
 0x4bb   :  { %6122 = vpow2.f32 %v4119_v23 }
 0x4bc   :  { %6124 = vtanh.f32 %v1931_v51 }
 0x4c4   :  { %v6121_v49 = vpop.eup %6120 }
 0x4c5   :  { %v6123_v60 = vpop.eup %6122  ;;  %v1938_v25 = vadd.f32 1.0, %v6121_v49 }
 0x4c6   :  { %v1944_v36 = vadd.f32 1.0, %v6123_v60  ;;  %v6125_v37 = vpop.eup %6124 }
 0x4c7   :  { %6126 = vrcp.f32 %v1938_v25 }
 0x4c8   :  { %6128 = vrcp.f32 %v1944_v36 }
 0x4c9   :  { %6130 = vpow2.f32 %v4120_v33 }
 0x4d1   :  { %v6127_v31 = vpop.eup %6126 }
 0x4d2   :  { %v6129_v13 = vpop.eup %6128  ;;  %v1955_v5 = vmul.f32 %v6127_v31, %v6125_v37 }
 0x4d3   :  { %v1954_v43 = vmul.f32 %v6129_v13, %v8211_v61  ;;  %v6131_v37 = vpop.eup %6130 }
 0x4d4   :  { %v1951_v35 = vadd.f32 1.0, %v6131_v37 }
 0x4d5   :  { %v8334_v18 = vadd.f32 %v1955_v5, %v1954_v43  ;;  %v2029_v41 = vpop.f32.mrb[16].mxu0  ;;  %v2100_v23 = vpop.f32.mrb[16].mxu1 }
 0x4d6   :  { %v2109_v12 = vrot.slane %v2029_v41, 5  ;;  %v2113_v49 = vrot.slane %v2029_v41, 6  ;;  %v2031_v51 = vpop.f32.mrb[17].mxu0  ;;  %v2102_v60 = vpop.f32.mrb[17].mxu1  ;;  %v2111_v0 = vrot.slane %v2100_v23, 5 }
 0x4d7   :  { %v2110_v25 = vrot.slane %v2031_v51, 5  ;;  %v2114_v36 = vrot.slane %v2031_v51, 6  ;;  %v2112_v6 = vrot.slane %v2102_v60, 5  ;;  %v2116_v41 = vrot.slane %v2102_v60, 6 }
 0x4d8   :  { %v2125_v44 = vadd.f32 %v9205_v45, %v2109_v12  ;;  %v2129_v30 = vadd.f32 %v9271_v42, %v2113_v49  ;;  %v2115_v51 = vrot.slane %v2100_v23, 6 }
 0x4d9   :  { %v2126_v33 = vadd.f32 %v9272_v52, %v2110_v25  ;;  %v2130_v31 = vadd.f32 %v9273_v19, %v2114_v36  ;;  %v2128_v12 = vadd.f32 %v7948_v50, %v2112_v6  ;;  %v2132_v49 = vadd.f32 %v7950_v24, %v2116_v41 }
 0x4da   :  { %v4121_v61 = vmul.f32 -1.442695, %v2125_v44  ;;  %v4122_v13 = vmul.f32 -1.442695, %v2129_v30  ;;  %v2127_v25 = vadd.f32 %v7953_v47, %v2111_v0  ;;  %v2131_v36 = vadd.f32 %v7957_v7, %v2115_v51 }
 0x4db   :  { %v4123_v5 = vmul.f32 -1.442695, %v2126_v33  ;;  %v4124_v43 = vmul.f32 -1.442695, %v2130_v31  ;;  %v4125_v44 = vmul.f32 -1.442695, %v2128_v12 }
 0x4dc   :  { %6132 = vpow2.f32 %v4121_v61  ;;  %v4126_v30 = vmul.f32 -1.442695, %v2132_v49 }
 0x4dd   :  { %6134 = vpow2.f32 %v4122_v13 }
 0x4de   :  { %6136 = vpow2.f32 %v4123_v5 }
 0x4df   :  { %6138 = vpow2.f32 %v4124_v43 }
 0x4e0   :  { %6140 = vrcp.f32 %v1951_v35 }
 0x4e1   :  { %6142 = vtanh.f32 %v8334_v18 }
 0x4e2   :  { %6144 = vtanh.f32 %v2127_v25 }
 0x4e3   :  { %6146 = vtanh.f32 %v2131_v36 }
 0x4e4   :  { %6148 = vpow2.f32 %v4125_v44 }
 0x4e5   :  { %6150 = vpow2.f32 %v4126_v30 }
 0x4e6   :  { %v6133_v60 = vpop.eup %6132 }
 0x4e7   :  { %v6135_v33 = vpop.eup %6134  ;;  %v2139_v23 = vadd.f32 1.0, %v6133_v60  ;;  %v2173_v60 = vrot.slane %v8224_v48, 7 }
 0x4e8   :  { %v6137_v31 = vpop.eup %6136  ;;  %v2140_v37 = vadd.f32 1.0, %v6135_v33 }
 0x4e9   :  { %v6139_v6 = vpop.eup %6138  ;;  %6152 = vrcp.f32 %v2139_v23  ;;  %v2151_v35 = vadd.f32 1.0, %v6137_v31 }
 0x4ea   :  { %6154 = vrcp.f32 %v2140_v37  ;;  %v2152_v0 = vadd.f32 1.0, %v6139_v6  ;;  %v6141_v61 = vpop.eup %6140  ;;  %v2174_v37 = vrot.slane %v8226_v62, 7 }
 0x4eb   :  { %6156 = vrcp.f32 %v2151_v35  ;;  %v6143_v13 = vpop.eup %6142 }
 0x4ec   :  { %6158 = vrcp.f32 %v2152_v0  ;;  %v1958_v5 = vmul.f32 %v6143_v13, %v6141_v61  ;;  %v6145_v43 = vpop.eup %6144 }
 0x4ed   :  { %v6147_v51 = vpop.eup %6146 }
 0x4ee   :  { %v2193_v41 = vrot.slane %v1958_v5, 5  ;;  %v6149_v12 = vpop.eup %6148 }
 0x4ef   :  { %v6151_v25 = vpop.eup %6150  ;;  %v2165_v33 = vadd.f32 1.0, %v6149_v12 }
 0x4f0   :  { %v2195_v49 = vrot.slane %v2193_v41, 3  ;;  %v2166_v6 = vadd.f32 1.0, %v6151_v25 }
 0x4f1   :  { %6160 = vrcp.f32 %v2165_v33  ;;  %v9342_v33 = vld [vmem:[#allocation7_spill] sm:$0xff] }
 0x4f2   :  { %2262 = vmatprep.mubr.f32.mxu0 %v2195_v49  ;;  %2333 = vmatprep.mubr.f32.mxu1 %v2195_v49  ;;  %6162 = vrcp.f32 %v2166_v6  ;;  %v9346_v6 = vld [vmem:[#allocation11_spill] sm:$0xff] }
 0x4f3   :  { %v6153_v36 = vpop.eup %6152 }
 0x4f4   :  { %v6155_v44 = vpop.eup %6154  ;;  %v2179_v30 = vmul.f32 %v6153_v36, %v6145_v43 }
 0x4f5   :  { %v6157_v23 = vpop.eup %6156  ;;  %v2180_v31 = vmul.f32 %v6155_v44, %v6147_v51 }
 0x4f6   :  { %v6159_v35 = vpop.eup %6158  ;;  %v2177_v0 = vmul.f32 %v6157_v23, %v2173_v60  ;;  %v9343_v23 = vld [vmem:[#allocation8_spill] sm:$0xff] }
 0x4f7   :  { %v2178_v61 = vmul.f32 %v6159_v35, %v2174_v37  ;;  %v9345_v37 = vld [vmem:[#allocation10_spill] sm:$0xff]  ;;  %v9347_v35 = vld [vmem:[#allocation12_spill] sm:$0xff] }
 0x4f8   :  { %v8347_v13 = vadd.f32 %v2179_v30, %v2177_v0  ;;  %v9348_v0 = vld [vmem:[#allocation13_spill] sm:$0xff] }
 0x4f9   :  { %v8349_v5 = vadd.f32 %v2180_v31, %v2178_v61  ;;  %v9344_v31 = vld [vmem:[#allocation9_spill] sm:$0xff]  ;;  %v9349_v61 = vld [vmem:[#allocation14_spill] sm:$0xff] }
 0x4fa   :  { %6164 = vtanh.f32 %v8347_v13 }
 0x4fb   :  { %6166 = vtanh.f32 %v8349_v5  ;;  %v6161_v48 = vpop.eup %6160 }
 0x4fc   :  { %v6163_v43 = vpop.eup %6162 }
 0x504   :  { %v6165_v41 = vpop.eup %6164 }
 0x505   :  { %v6167_v51 = vpop.eup %6166  ;;  %v2185_v12 = vmul.f32 %v6165_v41, %v6161_v48  ;;  %v9350_v48 = vld [vmem:[#allocation15_spill] sm:$0xff]  ;;  %v9352_v41 = vld [vmem:[#allocation17_spill] sm:$0xff] }
 0x506   :  { %v2186_v62 = vmul.f32 %v6167_v51, %v6163_v43  ;;  %v9351_v43 = vld [vmem:[#allocation16_spill] sm:$0xff]  ;;  %v9353_v51 = vld [vmem:[#allocation18_spill] sm:$0xff] }
 0x507   :  { %v2364_v49 = vrot.slane %v2185_v12, 3 }
 0x508   :  { %v2189_v25 = vrot.slane %v2186_v62, 7  ;;  %v2365_v36 = vrot.slane %v2186_v62, 2  ;;  %v9355_v62 = vld [vmem:[#allocation20_spill] sm:$0xff] }
 0x50a   :  { %v2191_v44 = vsel %vm2190_vm3, %v2189_v25, %v2185_v12  ;;  %v2366_v30 = vsel %vm861_vm0, %v2365_v36, %v2364_v49  ;;  %v9354_v12 = vld [vmem:[#allocation19_spill] sm:$0xff]  ;;  %v9356_v49 = vld [vmem:[#allocation21_spill] sm:$0xff]  ;;  %v9357_v25 = vld [vmem:[#allocation22_spill] sm:$0xff] }
 0x50b   :  { %v2194_v60 = vrot.slane %v2191_v44, 3  ;;  %v9358_v36 = vld [vmem:[#allocation23_spill] sm:$0xff]  ;;  %v9359_v44 = vld [vmem:[#allocation24_spill] sm:$0xff] }
 0x50d   :  { %2263 = vmatmul.mubr.f32.vlgmr.msra.gmra.mrb[18].mxu0 %v2194_v60  ;;  %2334 = vmatmul.mubr.f32.vlgmr.msra.gmra.mrb[18].mxu1 %v2194_v60  ;;  %v9361_v60 = vld [vmem:[#allocation26_spill] sm:$0xff] }
 0x50e   :  { %5183 = vmatpush1.bf16.msra.mxu0 %v7082_v53  ;;  %5215 = vmatpush1.bf16.msra.mxu1 %v7085_v54 }
 0x50f   :  { %5185 = vmatprep.subr.bf16.mxu0 %v7097_v58  ;;  %5217 = vmatprep.subr.bf16.mxu1 %v7099_v59 }
 0x510   :  { %2432 = vmatprep.mubr.f32.mxu0 %v9134_v1  ;;  %2503 = vmatprep.mubr.f32.mxu1 %v9134_v1 }
 0x512   :  { %5187 = vmatpush1.bf16.msra.mxu0 %v7120_v2  ;;  %5219 = vmatpush1.bf16.msra.mxu1 %v7124_v3 }
 0x513   :  { %5189 = vmatprep.subr.bf16.mxu0 %v7126_v4  ;;  %5221 = vmatprep.subr.bf16.mxu1 %v7139_v8 }
 0x516   :  { %5191 = vmatpush1.bf16.msra.mxu0 %v7158_v14  ;;  %5223 = vmatpush1.bf16.msra.mxu1 %v7162_v15 }
 0x517   :  { %5193 = vmatprep.subr.bf16.mxu0 %v7164_v16  ;;  %5225 = vmatprep.subr.bf16.mxu1 %v7176_v20 }
 0x51a   :  { %5195 = vmatpush1.bf16.msra.mxu0 %v7196_v26  ;;  %5227 = vmatpush1.bf16.msra.mxu1 %v7200_v27 }
 0x51b   :  { %5197 = vmatprep.subr.bf16.mxu0 %v7202_v28  ;;  %5229 = vmatprep.subr.bf16.mxu1 %v7214_v32 }
 0x51e   :  { %5199 = vmatpush1.bf16.msra.mxu0 %v7232_v38  ;;  %5231 = vmatpush1.bf16.msra.mxu1 %v7236_v39 }
 0x51f   :  { %5201 = vmatprep.subr.bf16.mxu0 %v7238_v40  ;;  %5233 = vmatprep.subr.bf16.mxu1 %v7250_v46 }
 0x522   :  { %5203 = vmatpush1.bf16.msra.mxu0 %v7268_v55  ;;  %5235 = vmatpush1.bf16.msra.mxu1 %v7272_v56 }
 0x523   :  { %5205 = vmatprep.subr.bf16.mxu0 %v7274_v57  ;;  %5237 = vmatprep.subr.bf16.mxu1 %v7286_v63 }
 0x526   :  { %5207 = vmatpush1.bf16.msra.mxu0 %v7304_v9  ;;  %5239 = vmatpush1.bf16.msra.mxu1 %v7308_v10 }
 0x527   :  { %5209 = vmatprep.subr.bf16.mxu0 %v7310_v11  ;;  %5241 = vmatprep.subr.bf16.mxu1 %v7319_v17 }
 0x52a   :  { %5211 = vmatpush1.bf16.msra.mxu0 %v7328_v21  ;;  %5243 = vmatpush1.bf16.msra.mxu1 %v7332_v22 }
 0x52b   :  { %5245 = vmatprep.subr.bf16.mxu0 %v7350_v29  ;;  %5309 = vmatprep.subr.bf16.mxu1 %v7361_v34 }
 0x52d   :  { %2433 = vmatmul.mubr.f32.vlgmr.msra.gmra.mrb[20].mxu0 %v2366_v30  ;;  %2504 = vmatmul.mubr.f32.vlgmr.msra.gmra.mrb[20].mxu1 %v2366_v30  ;;  %v9360_v30 = vld [vmem:[#allocation25_spill] sm:$0xff] }
 0x52e   :  { %5247 = vmatpush1.bf16.msra.mxu0 %v9342_v33  ;;  %5311 = vmatpush1.bf16.msra.mxu1 %v9343_v23 }
 0x52f   :  { %5249 = vmatprep.subr.bf16.mxu0 %v9344_v31  ;;  %5313 = vmatprep.subr.bf16.mxu1 %v9345_v37 }
 0x532   :  { %5251 = vmatpush1.bf16.msra.mxu0 %v9346_v6  ;;  %5315 = vmatpush1.bf16.msra.mxu1 %v9347_v35 }
 0x533   :  { %5253 = vmatprep.subr.bf16.mxu0 %v9348_v0  ;;  %5317 = vmatprep.subr.bf16.mxu1 %v9349_v61  ;;  %v9407_v0 = vld [vmem:[#allocation74_spill] sm:$0xff] }
 0x536   :  { %5255 = vmatpush1.bf16.msra.mxu0 %v9350_v48  ;;  %5319 = vmatpush1.bf16.msra.mxu1 %v9351_v43  ;;  %v9362_v43 = vld [vmem:[#allocation27_spill] sm:$0xff]  ;;  %v9406_v48 = vld [vmem:[#allocation73_spill] sm:$0xff] }
 0x537   :  { %5257 = vmatprep.subr.bf16.mxu0 %v9352_v41  ;;  %5321 = vmatprep.subr.bf16.mxu1 %v9353_v51  ;;  %v9363_v41 = vld [vmem:[#allocation28_spill] sm:$0xff]  ;;  %v9364_v51 = vld [vmem:[#allocation29_spill] sm:$0xff] }
 0x53a   :  { %5259 = vmatpush1.bf16.msra.mxu0 %v9354_v12  ;;  %5323 = vmatpush1.bf16.msra.mxu1 %v9355_v62  ;;  %v9365_v12 = vld [vmem:[#allocation30_spill] sm:$0xff]  ;;  %v9366_v62 = vld [vmem:[#allocation31_spill] sm:$0xff] }
 0x53b   :  { %5261 = vmatprep.subr.bf16.mxu0 %v9356_v49  ;;  %5325 = vmatprep.subr.bf16.mxu1 %v9357_v25  ;;  %v9367_v49 = vld [vmem:[#allocation32_spill] sm:$0xff]  ;;  %v9368_v25 = vld [vmem:[#allocation33_spill] sm:$0xff] }
 0x53e   :  { %5263 = vmatpush1.bf16.msra.mxu0 %v9358_v36  ;;  %5327 = vmatpush1.bf16.msra.mxu1 %v9359_v44  ;;  %v9369_v36 = vld [vmem:[#allocation34_spill] sm:$0xff]  ;;  %v9370_v44 = vld [vmem:[#allocation35_spill] sm:$0xff] }
 0x53f   :  { %5265 = vmatprep.subr.bf16.mxu0 %v9360_v30  ;;  %5329 = vmatprep.subr.bf16.mxu1 %v9361_v60  ;;  %v9371_v30 = vld [vmem:[#allocation36_spill] sm:$0xff]  ;;  %v9372_v60 = vld [vmem:[#allocation37_spill] sm:$0xff] }
 0x542   :  { %5267 = vmatpush1.bf16.msra.mxu0 %v9362_v43  ;;  %5331 = vmatpush1.bf16.msra.mxu1 %v9363_v41  ;;  %v9373_v43 = vld [vmem:[#allocation38_spill] sm:$0xff]  ;;  %v9374_v41 = vld [vmem:[#allocation39_spill] sm:$0xff] }
 0x543   :  { %5269 = vmatprep.subr.bf16.mxu0 %v9364_v51  ;;  %5333 = vmatprep.subr.bf16.mxu1 %v9365_v12  ;;  %v9375_v51 = vld [vmem:[#allocation40_spill] sm:$0xff]  ;;  %v9376_v12 = vld [vmem:[#allocation41_spill] sm:$0xff] }
 0x546   :  { %5271 = vmatpush1.bf16.msra.mxu0 %v9366_v62  ;;  %5335 = vmatpush1.bf16.msra.mxu1 %v9367_v49  ;;  %v9377_v62 = vld [vmem:[#allocation42_spill] sm:$0xff]  ;;  %v9378_v49 = vld [vmem:[#allocation43_spill] sm:$0xff] }
 0x547   :  { %5273 = vmatprep.subr.bf16.mxu0 %v9368_v25  ;;  %5337 = vmatprep.subr.bf16.mxu1 %v9369_v36  ;;  %v9379_v25 = vld [vmem:[#allocation44_spill] sm:$0xff]  ;;  %v9380_v36 = vld [vmem:[#allocation45_spill] sm:$0xff] }
 0x54a   :  { %5275 = vmatpush1.bf16.msra.mxu0 %v9370_v44  ;;  %5339 = vmatpush1.bf16.msra.mxu1 %v9371_v30  ;;  %v9381_v44 = vld [vmem:[#allocation46_spill] sm:$0xff]  ;;  %v9382_v30 = vld [vmem:[#allocation47_spill] sm:$0xff] }
 0x54b   :  { %5277 = vmatprep.subr.bf16.mxu0 %v9372_v60  ;;  %5341 = vmatprep.subr.bf16.mxu1 %v9373_v43  ;;  %v9383_v60 = vld [vmem:[#allocation48_spill] sm:$0xff]  ;;  %v9384_v43 = vld [vmem:[#allocation49_spill] sm:$0xff] }
 0x54e   :  { %5279 = vmatpush1.bf16.msra.mxu0 %v9374_v41  ;;  %5343 = vmatpush1.bf16.msra.mxu1 %v9375_v51  ;;  %v9385_v41 = vld [vmem:[#allocation50_spill] sm:$0xff]  ;;  %v9386_v51 = vld [vmem:[#allocation51_spill] sm:$0xff] }
 0x54f   :  { %5281 = vmatprep.subr.bf16.mxu0 %v9376_v12  ;;  %5345 = vmatprep.subr.bf16.mxu1 %v9377_v62  ;;  %v9387_v12 = vld [vmem:[#allocation52_spill] sm:$0xff]  ;;  %v9388_v62 = vld [vmem:[#allocation53_spill] sm:$0xff] }
 0x552   :  { %5283 = vmatpush1.bf16.msra.mxu0 %v9378_v49  ;;  %5347 = vmatpush1.bf16.msra.mxu1 %v9379_v25  ;;  %v9389_v49 = vld [vmem:[#allocation54_spill] sm:$0xff]  ;;  %v9390_v25 = vld [vmem:[#allocation55_spill] sm:$0xff] }
 0x553   :  { %5285 = vmatprep.subr.bf16.mxu0 %v9380_v36  ;;  %5349 = vmatprep.subr.bf16.mxu1 %v9381_v44  ;;  %v9391_v36 = vld [vmem:[#allocation56_spill] sm:$0xff]  ;;  %v9392_v44 = vld [vmem:[#allocation57_spill] sm:$0xff] }
 0x556   :  { %5287 = vmatpush1.bf16.msra.mxu0 %v9382_v30  ;;  %5351 = vmatpush1.bf16.msra.mxu1 %v9383_v60  ;;  %v9393_v30 = vld [vmem:[#allocation58_spill] sm:$0xff]  ;;  %v9394_v60 = vld [vmem:[#allocation59_spill] sm:$0xff] }
 0x557   :  { %5289 = vmatprep.subr.bf16.mxu0 %v9384_v43  ;;  %5353 = vmatprep.subr.bf16.mxu1 %v9385_v41  ;;  %v9395_v43 = vld [vmem:[#allocation60_spill] sm:$0xff]  ;;  %v9396_v41 = vld [vmem:[#allocation61_spill] sm:$0xff] }
 0x55a   :  { %5291 = vmatpush1.bf16.msra.mxu0 %v9386_v51  ;;  %5355 = vmatpush1.bf16.msra.mxu1 %v9387_v12  ;;  %v9397_v51 = vld [vmem:[#allocation62_spill] sm:$0xff]  ;;  %v9398_v12 = vld [vmem:[#allocation63_spill] sm:$0xff] }
 0x55b   :  { %5293 = vmatprep.subr.bf16.mxu0 %v9388_v62  ;;  %5357 = vmatprep.subr.bf16.mxu1 %v9389_v49  ;;  %v9399_v62 = vld [vmem:[#allocation64_spill] sm:$0xff]  ;;  %v9400_v49 = vld [vmem:[#allocation65_spill] sm:$0xff] }
 0x55e   :  { %5295 = vmatpush1.bf16.msra.mxu0 %v9390_v25  ;;  %5359 = vmatpush1.bf16.msra.mxu1 %v9391_v36  ;;  %v9401_v25 = vld [vmem:[#allocation66_spill] sm:$0xff]  ;;  %v9402_v36 = vld [vmem:[#allocation67_spill] sm:$0xff] }
 0x55f   :  { %5297 = vmatprep.subr.bf16.mxu0 %v9392_v44  ;;  %5361 = vmatprep.subr.bf16.mxu1 %v9393_v30  ;;  %v9403_v44 = vld [vmem:[#allocation68_spill] sm:$0xff]  ;;  %v9404_v30 = vld [vmem:[#allocation5_spill] sm:$0xff] }
 0x562   :  { %5299 = vmatpush1.bf16.msra.mxu0 %v9394_v60  ;;  %5363 = vmatpush1.bf16.msra.mxu1 %v9395_v43  ;;  %v9405_v60 = vld [vmem:[#allocation6_spill] sm:$0xff] }
 0x563   :  { %5301 = vmatprep.subr.bf16.mxu0 %v9396_v41  ;;  %5365 = vmatprep.subr.bf16.mxu1 %v9397_v51 }
 0x566   :  { %5303 = vmatpush1.bf16.msra.mxu0 %v9398_v12  ;;  %5367 = vmatpush1.bf16.msra.mxu1 %v9399_v62 }
 0x567   :  { %5305 = vmatprep.subr.bf16.mxu0 %v9400_v49  ;;  %5369 = vmatprep.subr.bf16.mxu1 %v9401_v25  ;;  %v9408_v25 = vld [vmem:[#allocation76_spill] sm:$0xff] }
 0x56a   :  { %5307 = vmatpush1.bf16.msra.mxu0 %v9402_v36  ;;  %5371 = vmatpush1.bf16.msra.mxu1 %v9403_v44 }
 0x56b   :  { %5373 = vmatprep.subr.bf16.mxu0 %v9404_v30  ;;  %5405 = vmatprep.subr.bf16.mxu1 %v9405_v60  ;;  %v9409_v60 = vld [vmem:[#allocation75_spill] sm:$0xff] }
 0x5e0   :  { %v2264_v43 = vpop.f32.mrb[18].mxu0  ;;  %v2335_v41 = vpop.f32.mrb[18].mxu1 }
 0x5e1   :  { %v2265_v51 = vadd.f32 %v2264_v43, %v9406_v48  ;;  %v2266_v61 = vpop.f32.mrb[19].mxu0  ;;  %v2337_v12 = vpop.f32.mrb[19].mxu1  ;;  %v2336_v36 = vadd.f32 %v2335_v41, %v9408_v25 }
 0x5e2   :  { %v2267_v62 = vadd.f32 %v2266_v61, %v9407_v0  ;;  %v2338_v31 = vadd.f32 %v2337_v12, %v9409_v60 }
 0x5e3   :  { %v4127_v35 = vmul.f32 -1.442695, %v2265_v51 }
 0x5e4   :  { %v4128_v49 = vmul.f32 -1.442695, %v2267_v62  ;;  %v4129_v43 = vmul.f32 -1.442695, %v2338_v31 }
 0x5e5   :  { %6168 = vpow2.f32 %v4127_v35 }
 0x5e6   :  { %6170 = vpow2.f32 %v4128_v49 }
 0x5e7   :  { %6172 = vtanh.f32 %v2336_v36 }
 0x5ef   :  { %v6169_v6 = vpop.eup %6168 }
 0x5f0   :  { %v6171_v44 = vpop.eup %6170  ;;  %v2343_v37 = vadd.f32 1.0, %v6169_v6 }
 0x5f1   :  { %v2349_v30 = vadd.f32 1.0, %v6171_v44  ;;  %v6173_v48 = vpop.eup %6172 }
 0x5f2   :  { %6174 = vrcp.f32 %v2343_v37 }
 0x5f3   :  { %6176 = vrcp.f32 %v2349_v30 }
 0x5f4   :  { %6178 = vpow2.f32 %v4129_v43 }
 0x5fc   :  { %v6175_v23 = vpop.eup %6174 }
 0x5fd   :  { %v6177_v61 = vpop.eup %6176  ;;  %v2360_v51 = vmul.f32 %v6175_v23, %v6173_v48 }
 0x5fe   :  { %v2359_v35 = vmul.f32 %v6177_v61, %v8334_v18  ;;  %v6179_v48 = vpop.eup %6178 }
 0x5ff   :  { %v2356_v0 = vadd.f32 1.0, %v6179_v48 }
 0x600   :  { %v8457_v62 = vadd.f32 %v2360_v51, %v2359_v35  ;;  %v2434_v41 = vpop.f32.mrb[20].mxu0  ;;  %v2505_v49 = vpop.f32.mrb[20].mxu1 }
 0x601   :  { %v2514_v25 = vrot.slane %v2434_v41, 4  ;;  %v2518_v6 = vrot.slane %v2434_v41, 5  ;;  %v2436_v36 = vpop.f32.mrb[21].mxu0  ;;  %v2507_v44 = vpop.f32.mrb[21].mxu1  ;;  %v2516_v33 = vrot.slane %v2505_v49, 4 }
 0x602   :  { %v2515_v37 = vrot.slane %v2436_v36, 4  ;;  %v2519_v30 = vrot.slane %v2436_v36, 5  ;;  %v2517_v60 = vrot.slane %v2507_v44, 4  ;;  %v2521_v41 = vrot.slane %v2507_v44, 5 }
 0x603   :  { %v2530_v12 = vadd.f32 %v9205_v45, %v2514_v25  ;;  %v2534_v31 = vadd.f32 %v9271_v42, %v2518_v6  ;;  %v2520_v36 = vrot.slane %v2505_v49, 5 }
 0x604   :  { %v2531_v43 = vadd.f32 %v9272_v52, %v2515_v37  ;;  %v2535_v23 = vadd.f32 %v9273_v19, %v2519_v30  ;;  %v2533_v25 = vadd.f32 %v7948_v50, %v2517_v60  ;;  %v2537_v6 = vadd.f32 %v7950_v24, %v2521_v41 }
 0x605   :  { %v4130_v18 = vmul.f32 -1.442695, %v2530_v12  ;;  %v4131_v61 = vmul.f32 -1.442695, %v2534_v31  ;;  %v2532_v37 = vadd.f32 %v7953_v47, %v2516_v33  ;;  %v2536_v30 = vadd.f32 %v7957_v7, %v2520_v36 }
 0x606   :  { %v4132_v51 = vmul.f32 -1.442695, %v2531_v43  ;;  %v4133_v35 = vmul.f32 -1.442695, %v2535_v23  ;;  %v4134_v12 = vmul.f32 -1.442695, %v2533_v25 }
 0x607   :  { %6180 = vpow2.f32 %v4130_v18  ;;  %v4135_v31 = vmul.f32 -1.442695, %v2537_v6 }
 0x608   :  { %6182 = vpow2.f32 %v4131_v61 }
 0x609   :  { %6184 = vpow2.f32 %v4132_v51 }
 0x60a   :  { %6186 = vpow2.f32 %v4133_v35 }
 0x60b   :  { %6188 = vrcp.f32 %v2356_v0 }
 0x60c   :  { %6190 = vtanh.f32 %v8457_v62 }
 0x60d   :  { %6192 = vtanh.f32 %v2532_v37 }
 0x60e   :  { %6194 = vtanh.f32 %v2536_v30 }
 0x60f   :  { %6196 = vpow2.f32 %v4134_v12 }
 0x610   :  { %6198 = vpow2.f32 %v4135_v31 }
 0x611   :  { %v6181_v44 = vpop.eup %6180 }
 0x612   :  { %v6183_v43 = vpop.eup %6182  ;;  %v2544_v49 = vadd.f32 1.0, %v6181_v44  ;;  %v2578_v44 = vrot.slane %v8347_v13, 7 }
 0x613   :  { %v6185_v23 = vpop.eup %6184  ;;  %v2545_v48 = vadd.f32 1.0, %v6183_v43 }
 0x614   :  { %v6187_v60 = vpop.eup %6186  ;;  %6200 = vrcp.f32 %v2544_v49  ;;  %v2556_v0 = vadd.f32 1.0, %v6185_v23 }
 0x615   :  { %6202 = vrcp.f32 %v2545_v48  ;;  %v2557_v33 = vadd.f32 1.0, %v6187_v60  ;;  %v6189_v18 = vpop.eup %6188  ;;  %v2579_v48 = vrot.slane %v8349_v5, 7 }
 0x616   :  { %6204 = vrcp.f32 %v2556_v0  ;;  %v6191_v61 = vpop.eup %6190 }
 0x617   :  { %6206 = vrcp.f32 %v2557_v33  ;;  %v2363_v51 = vmul.f32 %v6191_v61, %v6189_v18  ;;  %v6193_v35 = vpop.eup %6192 }
 0x618   :  { %v6195_v36 = vpop.eup %6194 }
 0x619   :  { %v2598_v41 = vrot.slane %v2363_v51, 4  ;;  %v6197_v25 = vpop.eup %6196 }
 0x61a   :  { %v6199_v37 = vpop.eup %6198  ;;  %v2570_v43 = vadd.f32 1.0, %v6197_v25 }
 0x61b   :  { %v2600_v6 = vrot.slane %v2598_v41, 4  ;;  %v2571_v60 = vadd.f32 1.0, %v6199_v37 }
 0x61c   :  { %6208 = vrcp.f32 %v2570_v43  ;;  %v9410_v43 = vld [vmem:[#allocation7_spill] sm:$0xff] }
 0x61d   :  { %2667 = vmatprep.mubr.f32.mxu0 %v2600_v6  ;;  %2738 = vmatprep.mubr.f32.mxu1 %v2600_v6  ;;  %6210 = vrcp.f32 %v2571_v60  ;;  %v9414_v60 = vld [vmem:[#allocation11_spill] sm:$0xff] }
 0x61e   :  { %v6201_v30 = vpop.eup %6200 }
 0x61f   :  { %v6203_v12 = vpop.eup %6202  ;;  %v2584_v31 = vmul.f32 %v6201_v30, %v6193_v35 }
 0x620   :  { %v6205_v49 = vpop.eup %6204  ;;  %v2585_v23 = vmul.f32 %v6203_v12, %v6195_v36 }
 0x621   :  { %v6207_v0 = vpop.eup %6206  ;;  %v2582_v33 = vmul.f32 %v6205_v49, %v2578_v44  ;;  %v9411_v49 = vld [vmem:[#allocation8_spill] sm:$0xff] }
 0x622   :  { %v2583_v18 = vmul.f32 %v6207_v0, %v2579_v48  ;;  %v9413_v48 = vld [vmem:[#allocation10_spill] sm:$0xff]  ;;  %v9415_v0 = vld [vmem:[#allocation12_spill] sm:$0xff] }
 0x623   :  { %v8470_v61 = vadd.f32 %v2584_v31, %v2582_v33  ;;  %v9416_v33 = vld [vmem:[#allocation13_spill] sm:$0xff] }
 0x624   :  { %v8472_v51 = vadd.f32 %v2585_v23, %v2583_v18  ;;  %v9412_v23 = vld [vmem:[#allocation9_spill] sm:$0xff]  ;;  %v9417_v18 = vld [vmem:[#allocation14_spill] sm:$0xff] }
 0x625   :  { %6212 = vtanh.f32 %v8470_v61 }
 0x626   :  { %6214 = vtanh.f32 %v8472_v51  ;;  %v6209_v13 = vpop.eup %6208 }
 0x627   :  { %v6211_v35 = vpop.eup %6210 }
 0x62f   :  { %v6213_v41 = vpop.eup %6212 }
 0x630   :  { %v6215_v36 = vpop.eup %6214  ;;  %v2590_v25 = vmul.f32 %v6213_v41, %v6209_v13  ;;  %v9418_v13 = vld [vmem:[#allocation15_spill] sm:$0xff]  ;;  %v9420_v41 = vld [vmem:[#allocation17_spill] sm:$0xff] }
 0x631   :  { %v2591_v5 = vmul.f32 %v6215_v36, %v6211_v35  ;;  %v9419_v35 = vld [vmem:[#allocation16_spill] sm:$0xff]  ;;  %v9421_v36 = vld [vmem:[#allocation18_spill] sm:$0xff] }
 0x632   :  { %v2769_v6 = vrot.slane %v2590_v25, 4 }
 0x633   :  { %v2594_v37 = vrot.slane %v2591_v5, 7  ;;  %v2770_v30 = vrot.slane %v2591_v5, 3  ;;  %v9423_v5 = vld [vmem:[#allocation20_spill] sm:$0xff] }
 0x635   :  { %v2596_v12 = vsel %vm2595_vm4, %v2594_v37, %v2590_v25  ;;  %v2771_v31 = vsel %vm861_vm0, %v2770_v30, %v2769_v6  ;;  %v9422_v25 = vld [vmem:[#allocation19_spill] sm:$0xff]  ;;  %v9424_v6 = vld [vmem:[#allocation21_spill] sm:$0xff]  ;;  %v9425_v37 = vld [vmem:[#allocation22_spill] sm:$0xff] }
 0x636   :  { %v2599_v44 = vrot.slane %v2596_v12, 4  ;;  %v9426_v30 = vld [vmem:[#allocation23_spill] sm:$0xff]  ;;  %v9427_v12 = vld [vmem:[#allocation24_spill] sm:$0xff] }
 0x638   :  { %2668 = vmatmul.mubr.f32.vlgmr.msra.gmra.mrb[22].mxu0 %v2599_v44  ;;  %2739 = vmatmul.mubr.f32.vlgmr.msra.gmra.mrb[22].mxu1 %v2599_v44  ;;  %v9429_v44 = vld [vmem:[#allocation26_spill] sm:$0xff] }
 0x639   :  { %5375 = vmatpush1.bf16.msra.mxu0 %v7082_v53  ;;  %5407 = vmatpush1.bf16.msra.mxu1 %v7085_v54 }
 0x63a   :  { %5377 = vmatprep.subr.bf16.mxu0 %v7097_v58  ;;  %5409 = vmatprep.subr.bf16.mxu1 %v7099_v59 }
 0x63b   :  { %2837 = vmatprep.mubr.f32.mxu0 %v9134_v1  ;;  %2908 = vmatprep.mubr.f32.mxu1 %v9134_v1 }
 0x63d   :  { %5379 = vmatpush1.bf16.msra.mxu0 %v7120_v2  ;;  %5411 = vmatpush1.bf16.msra.mxu1 %v7124_v3 }
 0x63e   :  { %5381 = vmatprep.subr.bf16.mxu0 %v7126_v4  ;;  %5413 = vmatprep.subr.bf16.mxu1 %v7139_v8 }
 0x641   :  { %5383 = vmatpush1.bf16.msra.mxu0 %v7158_v14  ;;  %5415 = vmatpush1.bf16.msra.mxu1 %v7162_v15 }
 0x642   :  { %5385 = vmatprep.subr.bf16.mxu0 %v7164_v16  ;;  %5417 = vmatprep.subr.bf16.mxu1 %v7176_v20 }
 0x645   :  { %5387 = vmatpush1.bf16.msra.mxu0 %v7196_v26  ;;  %5419 = vmatpush1.bf16.msra.mxu1 %v7200_v27 }
 0x646   :  { %5389 = vmatprep.subr.bf16.mxu0 %v7202_v28  ;;  %5421 = vmatprep.subr.bf16.mxu1 %v7214_v32 }
 0x649   :  { %5391 = vmatpush1.bf16.msra.mxu0 %v7232_v38  ;;  %5423 = vmatpush1.bf16.msra.mxu1 %v7236_v39 }
 0x64a   :  { %5393 = vmatprep.subr.bf16.mxu0 %v7238_v40  ;;  %5425 = vmatprep.subr.bf16.mxu1 %v7250_v46 }
 0x64d   :  { %5395 = vmatpush1.bf16.msra.mxu0 %v7268_v55  ;;  %5427 = vmatpush1.bf16.msra.mxu1 %v7272_v56 }
 0x64e   :  { %5397 = vmatprep.subr.bf16.mxu0 %v7274_v57  ;;  %5429 = vmatprep.subr.bf16.mxu1 %v7286_v63 }
 0x651   :  { %5399 = vmatpush1.bf16.msra.mxu0 %v7304_v9  ;;  %5431 = vmatpush1.bf16.msra.mxu1 %v7308_v10 }
 0x652   :  { %5401 = vmatprep.subr.bf16.mxu0 %v7310_v11  ;;  %5433 = vmatprep.subr.bf16.mxu1 %v7319_v17 }
 0x655   :  { %5403 = vmatpush1.bf16.msra.mxu0 %v7328_v21  ;;  %5435 = vmatpush1.bf16.msra.mxu1 %v7332_v22 }
 0x656   :  { %5437 = vmatprep.subr.bf16.mxu0 %v7350_v29  ;;  %5501 = vmatprep.subr.bf16.mxu1 %v7361_v34 }
 0x658   :  { %2838 = vmatmul.mubr.f32.vlgmr.msra.gmra.mrb[24].mxu0 %v2771_v31  ;;  %2909 = vmatmul.mubr.f32.vlgmr.msra.gmra.mrb[24].mxu1 %v2771_v31  ;;  %v9428_v31 = vld [vmem:[#allocation25_spill] sm:$0xff] }
 0x659   :  { %5439 = vmatpush1.bf16.msra.mxu0 %v9410_v43  ;;  %5503 = vmatpush1.bf16.msra.mxu1 %v9411_v49 }
 0x65a   :  { %5441 = vmatprep.subr.bf16.mxu0 %v9412_v23  ;;  %5505 = vmatprep.subr.bf16.mxu1 %v9413_v48 }
 0x65d   :  { %5443 = vmatpush1.bf16.msra.mxu0 %v9414_v60  ;;  %5507 = vmatpush1.bf16.msra.mxu1 %v9415_v0 }
 0x65e   :  { %5445 = vmatprep.subr.bf16.mxu0 %v9416_v33  ;;  %5509 = vmatprep.subr.bf16.mxu1 %v9417_v18  ;;  %v9475_v33 = vld [vmem:[#allocation74_spill] sm:$0xff] }
 0x661   :  { %5447 = vmatpush1.bf16.msra.mxu0 %v9418_v13  ;;  %5511 = vmatpush1.bf16.msra.mxu1 %v9419_v35  ;;  %v9430_v35 = vld [vmem:[#allocation27_spill] sm:$0xff]  ;;  %v9474_v13 = vld [vmem:[#allocation73_spill] sm:$0xff] }
 0x662   :  { %5449 = vmatprep.subr.bf16.mxu0 %v9420_v41  ;;  %5513 = vmatprep.subr.bf16.mxu1 %v9421_v36  ;;  %v9431_v41 = vld [vmem:[#allocation28_spill] sm:$0xff]  ;;  %v9432_v36 = vld [vmem:[#allocation29_spill] sm:$0xff] }
 0x665   :  { %5451 = vmatpush1.bf16.msra.mxu0 %v9422_v25  ;;  %5515 = vmatpush1.bf16.msra.mxu1 %v9423_v5  ;;  %v9433_v25 = vld [vmem:[#allocation30_spill] sm:$0xff]  ;;  %v9434_v5 = vld [vmem:[#allocation31_spill] sm:$0xff] }
 0x666   :  { %5453 = vmatprep.subr.bf16.mxu0 %v9424_v6  ;;  %5517 = vmatprep.subr.bf16.mxu1 %v9425_v37  ;;  %v9435_v6 = vld [vmem:[#allocation32_spill] sm:$0xff]  ;;  %v9436_v37 = vld [vmem:[#allocation33_spill] sm:$0xff] }
 0x669   :  { %5455 = vmatpush1.bf16.msra.mxu0 %v9426_v30  ;;  %5519 = vmatpush1.bf16.msra.mxu1 %v9427_v12  ;;  %v9437_v30 = vld [vmem:[#allocation34_spill] sm:$0xff]  ;;  %v9438_v12 = vld [vmem:[#allocation35_spill] sm:$0xff] }
 0x66a   :  { %5457 = vmatprep.subr.bf16.mxu0 %v9428_v31  ;;  %5521 = vmatprep.subr.bf16.mxu1 %v9429_v44  ;;  %v9439_v31 = vld [vmem:[#allocation36_spill] sm:$0xff]  ;;  %v9440_v44 = vld [vmem:[#allocation37_spill] sm:$0xff] }
 0x66d   :  { %5459 = vmatpush1.bf16.msra.mxu0 %v9430_v35  ;;  %5523 = vmatpush1.bf16.msra.mxu1 %v9431_v41  ;;  %v9441_v35 = vld [vmem:[#allocation38_spill] sm:$0xff]  ;;  %v9442_v41 = vld [vmem:[#allocation39_spill] sm:$0xff] }
 0x66e   :  { %5461 = vmatprep.subr.bf16.mxu0 %v9432_v36  ;;  %5525 = vmatprep.subr.bf16.mxu1 %v9433_v25  ;;  %v9443_v36 = vld [vmem:[#allocation40_spill] sm:$0xff]  ;;  %v9444_v25 = vld [vmem:[#allocation41_spill] sm:$0xff] }
 0x671   :  { %5463 = vmatpush1.bf16.msra.mxu0 %v9434_v5  ;;  %5527 = vmatpush1.bf16.msra.mxu1 %v9435_v6  ;;  %v9445_v5 = vld [vmem:[#allocation42_spill] sm:$0xff]  ;;  %v9446_v6 = vld [vmem:[#allocation43_spill] sm:$0xff] }
 0x672   :  { %5465 = vmatprep.subr.bf16.mxu0 %v9436_v37  ;;  %5529 = vmatprep.subr.bf16.mxu1 %v9437_v30  ;;  %v9447_v37 = vld [vmem:[#allocation44_spill] sm:$0xff]  ;;  %v9448_v30 = vld [vmem:[#allocation45_spill] sm:$0xff] }
 0x675   :  { %5467 = vmatpush1.bf16.msra.mxu0 %v9438_v12  ;;  %5531 = vmatpush1.bf16.msra.mxu1 %v9439_v31  ;;  %v9449_v12 = vld [vmem:[#allocation46_spill] sm:$0xff]  ;;  %v9450_v31 = vld [vmem:[#allocation47_spill] sm:$0xff] }
 0x676   :  { %5469 = vmatprep.subr.bf16.mxu0 %v9440_v44  ;;  %5533 = vmatprep.subr.bf16.mxu1 %v9441_v35  ;;  %v9451_v44 = vld [vmem:[#allocation48_spill] sm:$0xff]  ;;  %v9452_v35 = vld [vmem:[#allocation49_spill] sm:$0xff] }
 0x679   :  { %5471 = vmatpush1.bf16.msra.mxu0 %v9442_v41  ;;  %5535 = vmatpush1.bf16.msra.mxu1 %v9443_v36  ;;  %v9453_v41 = vld [vmem:[#allocation50_spill] sm:$0xff]  ;;  %v9454_v36 = vld [vmem:[#allocation51_spill] sm:$0xff] }
 0x67a   :  { %5473 = vmatprep.subr.bf16.mxu0 %v9444_v25  ;;  %5537 = vmatprep.subr.bf16.mxu1 %v9445_v5  ;;  %v9455_v25 = vld [vmem:[#allocation52_spill] sm:$0xff]  ;;  %v9456_v5 = vld [vmem:[#allocation53_spill] sm:$0xff] }
 0x67d   :  { %5475 = vmatpush1.bf16.msra.mxu0 %v9446_v6  ;;  %5539 = vmatpush1.bf16.msra.mxu1 %v9447_v37  ;;  %v9457_v6 = vld [vmem:[#allocation54_spill] sm:$0xff]  ;;  %v9458_v37 = vld [vmem:[#allocation55_spill] sm:$0xff] }
 0x67e   :  { %5477 = vmatprep.subr.bf16.mxu0 %v9448_v30  ;;  %5541 = vmatprep.subr.bf16.mxu1 %v9449_v12  ;;  %v9459_v30 = vld [vmem:[#allocation56_spill] sm:$0xff]  ;;  %v9460_v12 = vld [vmem:[#allocation57_spill] sm:$0xff] }
 0x681   :  { %5479 = vmatpush1.bf16.msra.mxu0 %v9450_v31  ;;  %5543 = vmatpush1.bf16.msra.mxu1 %v9451_v44  ;;  %v9461_v31 = vld [vmem:[#allocation58_spill] sm:$0xff]  ;;  %v9462_v44 = vld [vmem:[#allocation59_spill] sm:$0xff] }
 0x682   :  { %5481 = vmatprep.subr.bf16.mxu0 %v9452_v35  ;;  %5545 = vmatprep.subr.bf16.mxu1 %v9453_v41  ;;  %v9463_v35 = vld [vmem:[#allocation60_spill] sm:$0xff]  ;;  %v9464_v41 = vld [vmem:[#allocation61_spill] sm:$0xff] }
 0x685   :  { %5483 = vmatpush1.bf16.msra.mxu0 %v9454_v36  ;;  %5547 = vmatpush1.bf16.msra.mxu1 %v9455_v25  ;;  %v9465_v36 = vld [vmem:[#allocation62_spill] sm:$0xff]  ;;  %v9466_v25 = vld [vmem:[#allocation63_spill] sm:$0xff] }
 0x686   :  { %5485 = vmatprep.subr.bf16.mxu0 %v9456_v5  ;;  %5549 = vmatprep.subr.bf16.mxu1 %v9457_v6  ;;  %v9467_v5 = vld [vmem:[#allocation64_spill] sm:$0xff]  ;;  %v9468_v6 = vld [vmem:[#allocation65_spill] sm:$0xff] }
 0x689   :  { %5487 = vmatpush1.bf16.msra.mxu0 %v9458_v37  ;;  %5551 = vmatpush1.bf16.msra.mxu1 %v9459_v30  ;;  %v9469_v37 = vld [vmem:[#allocation66_spill] sm:$0xff]  ;;  %v9470_v30 = vld [vmem:[#allocation67_spill] sm:$0xff] }
 0x68a   :  { %5489 = vmatprep.subr.bf16.mxu0 %v9460_v12  ;;  %5553 = vmatprep.subr.bf16.mxu1 %v9461_v31  ;;  %v9471_v12 = vld [vmem:[#allocation68_spill] sm:$0xff]  ;;  %v9472_v31 = vld [vmem:[#allocation5_spill] sm:$0xff] }
 0x68d   :  { %5491 = vmatpush1.bf16.msra.mxu0 %v9462_v44  ;;  %5555 = vmatpush1.bf16.msra.mxu1 %v9463_v35  ;;  %v9473_v44 = vld [vmem:[#allocation6_spill] sm:$0xff] }
 0x68e   :  { %5493 = vmatprep.subr.bf16.mxu0 %v9464_v41  ;;  %5557 = vmatprep.subr.bf16.mxu1 %v9465_v36 }
 0x691   :  { %5495 = vmatpush1.bf16.msra.mxu0 %v9466_v25  ;;  %5559 = vmatpush1.bf16.msra.mxu1 %v9467_v5 }
 0x692   :  { %5497 = vmatprep.subr.bf16.mxu0 %v9468_v6  ;;  %5561 = vmatprep.subr.bf16.mxu1 %v9469_v37  ;;  %v9476_v37 = vld [vmem:[#allocation76_spill] sm:$0xff] }
 0x695   :  { %5499 = vmatpush1.bf16.msra.mxu0 %v9470_v30  ;;  %5563 = vmatpush1.bf16.msra.mxu1 %v9471_v12 }
 0x696   :  { %5565 = vmatprep.subr.bf16.mxu0 %v9472_v31  ;;  %5597 = vmatprep.subr.bf16.mxu1 %v9473_v44  ;;  %v9477_v44 = vld [vmem:[#allocation75_spill] sm:$0xff] }
 0x70b   :  { %v2669_v35 = vpop.f32.mrb[22].mxu0  ;;  %v2740_v41 = vpop.f32.mrb[22].mxu1 }
 0x70c   :  { %v2670_v36 = vadd.f32 %v2669_v35, %v9474_v13  ;;  %v2671_v18 = vpop.f32.mrb[23].mxu0  ;;  %v2742_v25 = vpop.f32.mrb[23].mxu1  ;;  %v2741_v30 = vadd.f32 %v2740_v41, %v9476_v37 }
 0x70d   :  { %v2672_v5 = vadd.f32 %v2671_v18, %v9475_v33  ;;  %v2743_v23 = vadd.f32 %v2742_v25, %v9477_v44 }
 0x70e   :  { %v4136_v0 = vmul.f32 -1.442695, %v2670_v36 }
 0x70f   :  { %v4137_v6 = vmul.f32 -1.442695, %v2672_v5  ;;  %v4138_v35 = vmul.f32 -1.442695, %v2743_v23 }
 0x710   :  { %6216 = vpow2.f32 %v4136_v0 }
 0x711   :  { %6218 = vpow2.f32 %v4137_v6 }
 0x712   :  { %6220 = vtanh.f32 %v2741_v30 }
 0x71a   :  { %v6217_v60 = vpop.eup %6216 }
 0x71b   :  { %v6219_v12 = vpop.eup %6218  ;;  %v2748_v48 = vadd.f32 1.0, %v6217_v60 }
 0x71c   :  { %v2754_v31 = vadd.f32 1.0, %v6219_v12  ;;  %v6221_v13 = vpop.eup %6220 }
 0x71d   :  { %6222 = vrcp.f32 %v2748_v48 }
 0x71e   :  { %6224 = vrcp.f32 %v2754_v31 }
 0x71f   :  { %6226 = vpow2.f32 %v4138_v35 }
 0x727   :  { %v6223_v49 = vpop.eup %6222 }
 0x728   :  { %v6225_v18 = vpop.eup %6224  ;;  %v2765_v36 = vmul.f32 %v6223_v49, %v6221_v13 }
 0x729   :  { %v2764_v0 = vmul.f32 %v6225_v18, %v8457_v62  ;;  %v6227_v13 = vpop.eup %6226 }
 0x72a   :  { %v2761_v33 = vadd.f32 1.0, %v6227_v13 }
 0x72b   :  { %v8580_v5 = vadd.f32 %v2765_v36, %v2764_v0  ;;  %v2839_v41 = vpop.f32.mrb[24].mxu0  ;;  %v2910_v6 = vpop.f32.mrb[24].mxu1 }
 0x72c   :  { %v2919_v37 = vrot.slane %v2839_v41, 3  ;;  %v2923_v60 = vrot.slane %v2839_v41, 4  ;;  %v2841_v30 = vpop.f32.mrb[25].mxu0  ;;  %v2912_v12 = vpop.f32.mrb[25].mxu1  ;;  %v2921_v43 = vrot.slane %v2910_v6, 3 }
 0x72d   :  { %v2920_v48 = vrot.slane %v2841_v30, 3  ;;  %v2924_v31 = vrot.slane %v2841_v30, 4  ;;  %v2922_v44 = vrot.slane %v2912_v12, 3  ;;  %v2926_v41 = vrot.slane %v2912_v12, 4 }
 0x72e   :  { %v2935_v25 = vadd.f32 %v9205_v45, %v2919_v37  ;;  %v2939_v23 = vadd.f32 %v9271_v42, %v2923_v60  ;;  %v2925_v30 = vrot.slane %v2910_v6, 4 }
 0x72f   :  { %v2936_v35 = vadd.f32 %v9272_v52, %v2920_v48  ;;  %v2940_v49 = vadd.f32 %v9273_v19, %v2924_v31  ;;  %v2938_v37 = vadd.f32 %v7948_v50, %v2922_v44  ;;  %v2942_v60 = vadd.f32 %v7950_v24, %v2926_v41 }
 0x730   :  { %v4139_v62 = vmul.f32 -1.442695, %v2935_v25  ;;  %v4140_v18 = vmul.f32 -1.442695, %v2939_v23  ;;  %v2937_v48 = vadd.f32 %v7953_v47, %v2921_v43  ;;  %v2941_v31 = vadd.f32 %v7957_v7, %v2925_v30 }
 0x731   :  { %v4141_v36 = vmul.f32 -1.442695, %v2936_v35  ;;  %v4142_v0 = vmul.f32 -1.442695, %v2940_v49  ;;  %v4143_v25 = vmul.f32 -1.442695, %v2938_v37 }
 0x732   :  { %6228 = vpow2.f32 %v4139_v62  ;;  %v4144_v23 = vmul.f32 -1.442695, %v2942_v60 }
 0x733   :  { %6230 = vpow2.f32 %v4140_v18 }
 0x734   :  { %6232 = vpow2.f32 %v4141_v36 }
 0x735   :  { %6234 = vpow2.f32 %v4142_v0 }
 0x736   :  { %6236 = vrcp.f32 %v2761_v33 }
 0x737   :  { %6238 = vtanh.f32 %v8580_v5 }
 0x738   :  { %6240 = vtanh.f32 %v2937_v48 }
 0x739   :  { %6242 = vtanh.f32 %v2941_v31 }
 0x73a   :  { %6244 = vpow2.f32 %v4143_v25 }
 0x73b   :  { %6246 = vpow2.f32 %v4144_v23 }
 0x73c   :  { %v6229_v12 = vpop.eup %6228 }
 0x73d   :  { %v6231_v35 = vpop.eup %6230  ;;  %v2949_v6 = vadd.f32 1.0, %v6229_v12  ;;  %v2983_v12 = vrot.slane %v8470_v61, 7 }
 0x73e   :  { %v6233_v49 = vpop.eup %6232  ;;  %v2950_v13 = vadd.f32 1.0, %v6231_v35 }
 0x73f   :  { %v6235_v44 = vpop.eup %6234  ;;  %6248 = vrcp.f32 %v2949_v6  ;;  %v2961_v33 = vadd.f32 1.0, %v6233_v49 }
 0x740   :  { %6250 = vrcp.f32 %v2950_v13  ;;  %v2962_v43 = vadd.f32 1.0, %v6235_v44  ;;  %v6237_v62 = vpop.eup %6236  ;;  %v2984_v13 = vrot.slane %v8472_v51, 7 }
 0x741   :  { %6252 = vrcp.f32 %v2961_v33  ;;  %v6239_v18 = vpop.eup %6238 }
 0x742   :  { %6254 = vrcp.f32 %v2962_v43  ;;  %v2768_v36 = vmul.f32 %v6239_v18, %v6237_v62  ;;  %v6241_v0 = vpop.eup %6240 }
 0x743   :  { %v6243_v30 = vpop.eup %6242 }
 0x744   :  { %v3003_v41 = vrot.slane %v2768_v36, 3  ;;  %v6245_v37 = vpop.eup %6244 }
 0x745   :  { %v6247_v48 = vpop.eup %6246  ;;  %v2975_v35 = vadd.f32 1.0, %v6245_v37 }
 0x746   :  { %v3005_v60 = vrot.slane %v3003_v41, 5  ;;  %v2976_v44 = vadd.f32 1.0, %v6247_v48 }
 0x747   :  { %6256 = vrcp.f32 %v2975_v35  ;;  %v9478_v35 = vld [vmem:[#allocation7_spill] sm:$0xff] }
 0x748   :  { %3072 = vmatprep.mubr.f32.mxu0 %v3005_v60  ;;  %3143 = vmatprep.mubr.f32.mxu1 %v3005_v60  ;;  %6258 = vrcp.f32 %v2976_v44  ;;  %v9482_v44 = vld [vmem:[#allocation11_spill] sm:$0xff] }
 0x749   :  { %v6249_v31 = vpop.eup %6248 }
 0x74a   :  { %v6251_v25 = vpop.eup %6250  ;;  %v2989_v23 = vmul.f32 %v6249_v31, %v6241_v0 }
 0x74b   :  { %v6253_v6 = vpop.eup %6252  ;;  %v2990_v49 = vmul.f32 %v6251_v25, %v6243_v30 }
 0x74c   :  { %v6255_v33 = vpop.eup %6254  ;;  %v2987_v43 = vmul.f32 %v6253_v6, %v2983_v12  ;;  %v9479_v6 = vld [vmem:[#allocation8_spill] sm:$0xff] }
 0x74d   :  { %v2988_v62 = vmul.f32 %v6255_v33, %v2984_v13  ;;  %v9481_v13 = vld [vmem:[#allocation10_spill] sm:$0xff]  ;;  %v9483_v33 = vld [vmem:[#allocation12_spill] sm:$0xff] }
 0x74e   :  { %v8593_v18 = vadd.f32 %v2989_v23, %v2987_v43  ;;  %v9484_v43 = vld [vmem:[#allocation13_spill] sm:$0xff] }
 0x74f   :  { %v8595_v36 = vadd.f32 %v2990_v49, %v2988_v62  ;;  %v9480_v49 = vld [vmem:[#allocation9_spill] sm:$0xff]  ;;  %v9485_v62 = vld [vmem:[#allocation14_spill] sm:$0xff] }
 0x750   :  { %6260 = vtanh.f32 %v8593_v18 }
 0x751   :  { %6262 = vtanh.f32 %v8595_v36  ;;  %v6257_v61 = vpop.eup %6256 }
 0x752   :  { %v6259_v0 = vpop.eup %6258 }
 0x75a   :  { %v6261_v41 = vpop.eup %6260 }
 0x75b   :  { %v6263_v30 = vpop.eup %6262  ;;  %v2995_v37 = vmul.f32 %v6261_v41, %v6257_v61  ;;  %v9486_v61 = vld [vmem:[#allocation15_spill] sm:$0xff]  ;;  %v9488_v41 = vld [vmem:[#allocation17_spill] sm:$0xff] }
 0x75c   :  { %v2996_v51 = vmul.f32 %v6263_v30, %v6259_v0  ;;  %v9487_v0 = vld [vmem:[#allocation16_spill] sm:$0xff]  ;;  %v9489_v30 = vld [vmem:[#allocation18_spill] sm:$0xff] }
 0x75d   :  { %v3174_v60 = vrot.slane %v2995_v37, 5 }
 0x75e   :  { %v2999_v48 = vrot.slane %v2996_v51, 7  ;;  %v3175_v31 = vrot.slane %v2996_v51, 4  ;;  %v9491_v51 = vld [vmem:[#allocation20_spill] sm:$0xff] }
 0x760   :  { %v3001_v25 = vsel %vm3000_vm5, %v2999_v48, %v2995_v37  ;;  %v3176_v23 = vsel %vm861_vm0, %v3175_v31, %v3174_v60  ;;  %v9490_v37 = vld [vmem:[#allocation19_spill] sm:$0xff]  ;;  %v9492_v60 = vld [vmem:[#allocation21_spill] sm:$0xff]  ;;  %v9493_v48 = vld [vmem:[#allocation22_spill] sm:$0xff] }
 0x761   :  { %v3004_v12 = vrot.slane %v3001_v25, 5  ;;  %v9494_v31 = vld [vmem:[#allocation23_spill] sm:$0xff]  ;;  %v9495_v25 = vld [vmem:[#allocation24_spill] sm:$0xff] }
 0x763   :  { %3073 = vmatmul.mubr.f32.vlgmr.msra.gmra.mrb[26].mxu0 %v3004_v12  ;;  %3144 = vmatmul.mubr.f32.vlgmr.msra.gmra.mrb[26].mxu1 %v3004_v12  ;;  %v9497_v12 = vld [vmem:[#allocation26_spill] sm:$0xff] }
 0x764   :  { %5567 = vmatpush1.bf16.msra.mxu0 %v7082_v53  ;;  %5599 = vmatpush1.bf16.msra.mxu1 %v7085_v54 }
 0x765   :  { %5569 = vmatprep.subr.bf16.mxu0 %v7097_v58  ;;  %5601 = vmatprep.subr.bf16.mxu1 %v7099_v59 }
 0x766   :  { %3242 = vmatprep.mubr.f32.mxu0 %v9134_v1  ;;  %3313 = vmatprep.mubr.f32.mxu1 %v9134_v1 }
 0x768   :  { %5571 = vmatpush1.bf16.msra.mxu0 %v7120_v2  ;;  %5603 = vmatpush1.bf16.msra.mxu1 %v7124_v3 }
 0x769   :  { %5573 = vmatprep.subr.bf16.mxu0 %v7126_v4  ;;  %5605 = vmatprep.subr.bf16.mxu1 %v7139_v8 }
 0x76c   :  { %5575 = vmatpush1.bf16.msra.mxu0 %v7158_v14  ;;  %5607 = vmatpush1.bf16.msra.mxu1 %v7162_v15 }
 0x76d   :  { %5577 = vmatprep.subr.bf16.mxu0 %v7164_v16  ;;  %5609 = vmatprep.subr.bf16.mxu1 %v7176_v20 }
 0x770   :  { %5579 = vmatpush1.bf16.msra.mxu0 %v7196_v26  ;;  %5611 = vmatpush1.bf16.msra.mxu1 %v7200_v27 }
 0x771   :  { %5581 = vmatprep.subr.bf16.mxu0 %v7202_v28  ;;  %5613 = vmatprep.subr.bf16.mxu1 %v7214_v32 }
 0x774   :  { %5583 = vmatpush1.bf16.msra.mxu0 %v7232_v38  ;;  %5615 = vmatpush1.bf16.msra.mxu1 %v7236_v39 }
 0x775   :  { %5585 = vmatprep.subr.bf16.mxu0 %v7238_v40  ;;  %5617 = vmatprep.subr.bf16.mxu1 %v7250_v46 }
 0x778   :  { %5587 = vmatpush1.bf16.msra.mxu0 %v7268_v55  ;;  %5619 = vmatpush1.bf16.msra.mxu1 %v7272_v56 }
 0x779   :  { %5589 = vmatprep.subr.bf16.mxu0 %v7274_v57  ;;  %5621 = vmatprep.subr.bf16.mxu1 %v7286_v63 }
 0x77c   :  { %5591 = vmatpush1.bf16.msra.mxu0 %v7304_v9  ;;  %5623 = vmatpush1.bf16.msra.mxu1 %v7308_v10 }
 0x77d   :  { %5593 = vmatprep.subr.bf16.mxu0 %v7310_v11  ;;  %5625 = vmatprep.subr.bf16.mxu1 %v7319_v17 }
 0x780   :  { %5595 = vmatpush1.bf16.msra.mxu0 %v7328_v21  ;;  %5627 = vmatpush1.bf16.msra.mxu1 %v7332_v22 }
 0x781   :  { %5629 = vmatprep.subr.bf16.mxu0 %v7350_v29  ;;  %5693 = vmatprep.subr.bf16.mxu1 %v7361_v34 }
 0x783   :  { %3243 = vmatmul.mubr.f32.vlgmr.msra.gmra.mrb[28].mxu0 %v3176_v23  ;;  %3314 = vmatmul.mubr.f32.vlgmr.msra.gmra.mrb[28].mxu1 %v3176_v23  ;;  %v9496_v23 = vld [vmem:[#allocation25_spill] sm:$0xff] }
 0x784   :  { %5631 = vmatpush1.bf16.msra.mxu0 %v9478_v35  ;;  %5695 = vmatpush1.bf16.msra.mxu1 %v9479_v6 }
 0x785   :  { %5633 = vmatprep.subr.bf16.mxu0 %v9480_v49  ;;  %5697 = vmatprep.subr.bf16.mxu1 %v9481_v13 }
 0x788   :  { %5635 = vmatpush1.bf16.msra.mxu0 %v9482_v44  ;;  %5699 = vmatpush1.bf16.msra.mxu1 %v9483_v33 }
 0x789   :  { %5637 = vmatprep.subr.bf16.mxu0 %v9484_v43  ;;  %5701 = vmatprep.subr.bf16.mxu1 %v9485_v62  ;;  %v9543_v43 = vld [vmem:[#allocation74_spill] sm:$0xff] }
 0x78c   :  { %5639 = vmatpush1.bf16.msra.mxu0 %v9486_v61  ;;  %5703 = vmatpush1.bf16.msra.mxu1 %v9487_v0  ;;  %v9498_v0 = vld [vmem:[#allocation27_spill] sm:$0xff]  ;;  %v9542_v61 = vld [vmem:[#allocation73_spill] sm:$0xff] }
 0x78d   :  { %5641 = vmatprep.subr.bf16.mxu0 %v9488_v41  ;;  %5705 = vmatprep.subr.bf16.mxu1 %v9489_v30  ;;  %v9499_v41 = vld [vmem:[#allocation28_spill] sm:$0xff]  ;;  %v9500_v30 = vld [vmem:[#allocation29_spill] sm:$0xff] }
 0x790   :  { %5643 = vmatpush1.bf16.msra.mxu0 %v9490_v37  ;;  %5707 = vmatpush1.bf16.msra.mxu1 %v9491_v51  ;;  %v9501_v37 = vld [vmem:[#allocation30_spill] sm:$0xff]  ;;  %v9502_v51 = vld [vmem:[#allocation31_spill] sm:$0xff] }
 0x791   :  { %5645 = vmatprep.subr.bf16.mxu0 %v9492_v60  ;;  %5709 = vmatprep.subr.bf16.mxu1 %v9493_v48  ;;  %v9503_v60 = vld [vmem:[#allocation32_spill] sm:$0xff]  ;;  %v9504_v48 = vld [vmem:[#allocation33_spill] sm:$0xff] }
 0x794   :  { %5647 = vmatpush1.bf16.msra.mxu0 %v9494_v31  ;;  %5711 = vmatpush1.bf16.msra.mxu1 %v9495_v25  ;;  %v9505_v31 = vld [vmem:[#allocation34_spill] sm:$0xff]  ;;  %v9506_v25 = vld [vmem:[#allocation35_spill] sm:$0xff] }
 0x795   :  { %5649 = vmatprep.subr.bf16.mxu0 %v9496_v23  ;;  %5713 = vmatprep.subr.bf16.mxu1 %v9497_v12  ;;  %v9507_v23 = vld [vmem:[#allocation36_spill] sm:$0xff]  ;;  %v9508_v12 = vld [vmem:[#allocation37_spill] sm:$0xff] }
 0x798   :  { %5651 = vmatpush1.bf16.msra.mxu0 %v9498_v0  ;;  %5715 = vmatpush1.bf16.msra.mxu1 %v9499_v41  ;;  %v9509_v0 = vld [vmem:[#allocation38_spill] sm:$0xff]  ;;  %v9510_v41 = vld [vmem:[#allocation39_spill] sm:$0xff] }
 0x799   :  { %5653 = vmatprep.subr.bf16.mxu0 %v9500_v30  ;;  %5717 = vmatprep.subr.bf16.mxu1 %v9501_v37  ;;  %v9511_v30 = vld [vmem:[#allocation40_spill] sm:$0xff]  ;;  %v9512_v37 = vld [vmem:[#allocation41_spill] sm:$0xff] }
 0x79c   :  { %5655 = vmatpush1.bf16.msra.mxu0 %v9502_v51  ;;  %5719 = vmatpush1.bf16.msra.mxu1 %v9503_v60  ;;  %v9513_v51 = vld [vmem:[#allocation42_spill] sm:$0xff]  ;;  %v9514_v60 = vld [vmem:[#allocation43_spill] sm:$0xff] }
 0x79d   :  { %5657 = vmatprep.subr.bf16.mxu0 %v9504_v48  ;;  %5721 = vmatprep.subr.bf16.mxu1 %v9505_v31  ;;  %v9515_v48 = vld [vmem:[#allocation44_spill] sm:$0xff]  ;;  %v9516_v31 = vld [vmem:[#allocation45_spill] sm:$0xff] }
 0x7a0   :  { %5659 = vmatpush1.bf16.msra.mxu0 %v9506_v25  ;;  %5723 = vmatpush1.bf16.msra.mxu1 %v9507_v23  ;;  %v9517_v25 = vld [vmem:[#allocation46_spill] sm:$0xff]  ;;  %v9518_v23 = vld [vmem:[#allocation47_spill] sm:$0xff] }
 0x7a1   :  { %5661 = vmatprep.subr.bf16.mxu0 %v9508_v12  ;;  %5725 = vmatprep.subr.bf16.mxu1 %v9509_v0  ;;  %v9519_v12 = vld [vmem:[#allocation48_spill] sm:$0xff]  ;;  %v9520_v0 = vld [vmem:[#allocation49_spill] sm:$0xff] }
 0x7a4   :  { %5663 = vmatpush1.bf16.msra.mxu0 %v9510_v41  ;;  %5727 = vmatpush1.bf16.msra.mxu1 %v9511_v30  ;;  %v9521_v41 = vld [vmem:[#allocation50_spill] sm:$0xff]  ;;  %v9522_v30 = vld [vmem:[#allocation51_spill] sm:$0xff] }
 0x7a5   :  { %5665 = vmatprep.subr.bf16.mxu0 %v9512_v37  ;;  %5729 = vmatprep.subr.bf16.mxu1 %v9513_v51  ;;  %v9523_v37 = vld [vmem:[#allocation52_spill] sm:$0xff]  ;;  %v9524_v51 = vld [vmem:[#allocation53_spill] sm:$0xff] }
 0x7a8   :  { %5667 = vmatpush1.bf16.msra.mxu0 %v9514_v60  ;;  %5731 = vmatpush1.bf16.msra.mxu1 %v9515_v48  ;;  %v9525_v60 = vld [vmem:[#allocation54_spill] sm:$0xff]  ;;  %v9526_v48 = vld [vmem:[#allocation55_spill] sm:$0xff] }
 0x7a9   :  { %5669 = vmatprep.subr.bf16.mxu0 %v9516_v31  ;;  %5733 = vmatprep.subr.bf16.mxu1 %v9517_v25  ;;  %v9527_v31 = vld [vmem:[#allocation56_spill] sm:$0xff]  ;;  %v9528_v25 = vld [vmem:[#allocation57_spill] sm:$0xff] }
 0x7ac   :  { %5671 = vmatpush1.bf16.msra.mxu0 %v9518_v23  ;;  %5735 = vmatpush1.bf16.msra.mxu1 %v9519_v12  ;;  %v9529_v23 = vld [vmem:[#allocation58_spill] sm:$0xff]  ;;  %v9530_v12 = vld [vmem:[#allocation59_spill] sm:$0xff] }
 0x7ad   :  { %5673 = vmatprep.subr.bf16.mxu0 %v9520_v0  ;;  %5737 = vmatprep.subr.bf16.mxu1 %v9521_v41  ;;  %v9531_v0 = vld [vmem:[#allocation60_spill] sm:$0xff]  ;;  %v9532_v41 = vld [vmem:[#allocation61_spill] sm:$0xff] }
 0x7b0   :  { %5675 = vmatpush1.bf16.msra.mxu0 %v9522_v30  ;;  %5739 = vmatpush1.bf16.msra.mxu1 %v9523_v37  ;;  %v9533_v30 = vld [vmem:[#allocation62_spill] sm:$0xff]  ;;  %v9534_v37 = vld [vmem:[#allocation63_spill] sm:$0xff] }
 0x7b1   :  { %5677 = vmatprep.subr.bf16.mxu0 %v9524_v51  ;;  %5741 = vmatprep.subr.bf16.mxu1 %v9525_v60  ;;  %v9535_v51 = vld [vmem:[#allocation64_spill] sm:$0xff]  ;;  %v9536_v60 = vld [vmem:[#allocation65_spill] sm:$0xff] }
 0x7b4   :  { %5679 = vmatpush1.bf16.msra.mxu0 %v9526_v48  ;;  %5743 = vmatpush1.bf16.msra.mxu1 %v9527_v31  ;;  %v9537_v48 = vld [vmem:[#allocation66_spill] sm:$0xff]  ;;  %v9538_v31 = vld [vmem:[#allocation67_spill] sm:$0xff] }
 0x7b5   :  { %5681 = vmatprep.subr.bf16.mxu0 %v9528_v25  ;;  %5745 = vmatprep.subr.bf16.mxu1 %v9529_v23  ;;  %v9539_v25 = vld [vmem:[#allocation68_spill] sm:$0xff]  ;;  %v9540_v23 = vld [vmem:[#allocation5_spill] sm:$0xff] }
 0x7b8   :  { %5683 = vmatpush1.bf16.msra.mxu0 %v9530_v12  ;;  %5747 = vmatpush1.bf16.msra.mxu1 %v9531_v0  ;;  %v9541_v12 = vld [vmem:[#allocation6_spill] sm:$0xff] }
 0x7b9   :  { %5685 = vmatprep.subr.bf16.mxu0 %v9532_v41  ;;  %5749 = vmatprep.subr.bf16.mxu1 %v9533_v30 }
 0x7bc   :  { %5687 = vmatpush1.bf16.msra.mxu0 %v9534_v37  ;;  %5751 = vmatpush1.bf16.msra.mxu1 %v9535_v51 }
 0x7bd   :  { %5689 = vmatprep.subr.bf16.mxu0 %v9536_v60  ;;  %5753 = vmatprep.subr.bf16.mxu1 %v9537_v48  ;;  %v9544_v48 = vld [vmem:[#allocation76_spill] sm:$0xff] }
 0x7c0   :  { %5691 = vmatpush1.bf16.msra.mxu0 %v9538_v31  ;;  %5755 = vmatpush1.bf16.msra.mxu1 %v9539_v25 }
 0x7c1   :  { %5757 = vmatprep.subr.bf16.mxu0 %v9540_v23  ;;  %5789 = vmatprep.subr.bf16.mxu1 %v9541_v12  ;;  %v9545_v12 = vld [vmem:[#allocation75_spill] sm:$0xff] }
 0x836   :  { %v3074_v0 = vpop.f32.mrb[26].mxu0  ;;  %v3145_v41 = vpop.f32.mrb[26].mxu1 }
 0x837   :  { %v3075_v30 = vadd.f32 %v3074_v0, %v9542_v61  ;;  %v3076_v62 = vpop.f32.mrb[27].mxu0  ;;  %v3147_v37 = vpop.f32.mrb[27].mxu1  ;;  %v3146_v31 = vadd.f32 %v3145_v41, %v9544_v48 }
 0x838   :  { %v3077_v51 = vadd.f32 %v3076_v62, %v9543_v43  ;;  %v3148_v49 = vadd.f32 %v3147_v37, %v9545_v12 }
 0x839   :  { %v4145_v33 = vmul.f32 -1.442695, %v3075_v30 }
 0x83a   :  { %v4146_v60 = vmul.f32 -1.442695, %v3077_v51  ;;  %v4147_v0 = vmul.f32 -1.442695, %v3148_v49 }
 0x83b   :  { %6264 = vpow2.f32 %v4145_v33 }
 0x83c   :  { %6266 = vpow2.f32 %v4146_v60 }
 0x83d   :  { %6268 = vtanh.f32 %v3146_v31 }
 0x845   :  { %v6265_v44 = vpop.eup %6264 }
 0x846   :  { %v6267_v25 = vpop.eup %6266  ;;  %v3153_v13 = vadd.f32 1.0, %v6265_v44 }
 0x847   :  { %v3159_v23 = vadd.f32 1.0, %v6267_v25  ;;  %v6269_v61 = vpop.eup %6268 }
 0x848   :  { %6270 = vrcp.f32 %v3153_v13 }
 0x849   :  { %6272 = vrcp.f32 %v3159_v23 }
 0x84a   :  { %6274 = vpow2.f32 %v4147_v0 }
 0x852   :  { %v6271_v6 = vpop.eup %6270 }
 0x853   :  { %v6273_v62 = vpop.eup %6272  ;;  %v3170_v30 = vmul.f32 %v6271_v6, %v6269_v61 }
 0x854   :  { %v3169_v33 = vmul.f32 %v6273_v62, %v8580_v5  ;;  %v6275_v61 = vpop.eup %6274 }
 0x855   :  { %v3166_v43 = vadd.f32 1.0, %v6275_v61 }
 0x856   :  { %v8703_v51 = vadd.f32 %v3170_v30, %v3169_v33  ;;  %v3244_v41 = vpop.f32.mrb[28].mxu0  ;;  %v3315_v60 = vpop.f32.mrb[28].mxu1 }
 0x857   :  { %v3324_v48 = vrot.slane %v3244_v41, 2  ;;  %v3328_v44 = vrot.slane %v3244_v41, 3  ;;  %v3246_v31 = vpop.f32.mrb[29].mxu0  ;;  %v3317_v25 = vpop.f32.mrb[29].mxu1  ;;  %v3326_v35 = vrot.slane %v3315_v60, 2 }
 0x858   :  { %v3325_v13 = vrot.slane %v3246_v31, 2  ;;  %v3329_v23 = vrot.slane %v3246_v31, 3  ;;  %v3327_v12 = vrot.slane %v3317_v25, 2  ;;  %v3331_v41 = vrot.slane %v3317_v25, 3 }
 0x859   :  { %v3340_v37 = vadd.f32 %v9205_v45, %v3324_v48  ;;  %v3344_v49 = vadd.f32 %v9271_v42, %v3328_v44  ;;  %v3330_v31 = vrot.slane %v3315_v60, 3 }
 0x85a   :  { %v3341_v0 = vadd.f32 %v9272_v52, %v3325_v13  ;;  %v3345_v6 = vadd.f32 %v9273_v19, %v3329_v23  ;;  %v3343_v48 = vadd.f32 %v7948_v50, %v3327_v12  ;;  %v3347_v44 = vadd.f32 %v7950_v24, %v3331_v41 }
 0x85b   :  { %v4148_v5 = vmul.f32 -1.442695, %v3340_v37  ;;  %v4149_v62 = vmul.f32 -1.442695, %v3344_v49  ;;  %v3342_v13 = vadd.f32 %v7953_v47, %v3326_v35  ;;  %v3346_v23 = vadd.f32 %v7957_v7, %v3330_v31 }
 0x85c   :  { %v4150_v30 = vmul.f32 -1.442695, %v3341_v0  ;;  %v4151_v33 = vmul.f32 -1.442695, %v3345_v6  ;;  %v4152_v37 = vmul.f32 -1.442695, %v3343_v48 }
 0x85d   :  { %6276 = vpow2.f32 %v4148_v5  ;;  %v4153_v49 = vmul.f32 -1.442695, %v3347_v44 }
 0x85e   :  { %6278 = vpow2.f32 %v4149_v62 }
 0x85f   :  { %6280 = vpow2.f32 %v4150_v30 }
 0x860   :  { %6282 = vpow2.f32 %v4151_v33 }
 0x861   :  { %6284 = vrcp.f32 %v3166_v43 }
 0x862   :  { %6286 = vtanh.f32 %v8703_v51 }
 0x863   :  { %6288 = vtanh.f32 %v3342_v13 }
 0x864   :  { %6290 = vtanh.f32 %v3346_v23 }
 0x865   :  { %6292 = vpow2.f32 %v4152_v37 }
 0x866   :  { %6294 = vpow2.f32 %v4153_v49 }
 0x867   :  { %v6277_v25 = vpop.eup %6276 }
 0x868   :  { %v6279_v0 = vpop.eup %6278  ;;  %v3354_v60 = vadd.f32 1.0, %v6277_v25  ;;  %v3388_v25 = vrot.slane %v8593_v18, 7 }
 0x869   :  { %v6281_v6 = vpop.eup %6280  ;;  %v3355_v61 = vadd.f32 1.0, %v6279_v0 }
 0x86a   :  { %v6283_v12 = vpop.eup %6282  ;;  %6296 = vrcp.f32 %v3354_v60  ;;  %v3366_v43 = vadd.f32 1.0, %v6281_v6 }
 0x86b   :  { %6298 = vrcp.f32 %v3355_v61  ;;  %v3367_v35 = vadd.f32 1.0, %v6283_v12  ;;  %v6285_v5 = vpop.eup %6284  ;;  %v3389_v61 = vrot.slane %v8595_v36, 7 }
 0x86c   :  { %6300 = vrcp.f32 %v3366_v43  ;;  %v6287_v62 = vpop.eup %6286 }
 0x86d   :  { %6302 = vrcp.f32 %v3367_v35  ;;  %v3173_v30 = vmul.f32 %v6287_v62, %v6285_v5  ;;  %v6289_v33 = vpop.eup %6288 }
 0x86e   :  { %v6291_v31 = vpop.eup %6290 }
 0x86f   :  { %v3408_v41 = vrot.slane %v3173_v30, 2  ;;  %v6293_v48 = vpop.eup %6292 }
 0x870   :  { %v6295_v13 = vpop.eup %6294  ;;  %v3380_v0 = vadd.f32 1.0, %v6293_v48 }
 0x871   :  { %v3410_v44 = vrot.slane %v3408_v41, 6  ;;  %v3381_v12 = vadd.f32 1.0, %v6295_v13 }
 0x872   :  { %6304 = vrcp.f32 %v3380_v0  ;;  %v9578_v0 = vld [vmem:[#allocation39_spill] sm:$0xff] }
 0x873   :  { %3477 = vmatprep.mubr.f32.mxu0 %v3410_v44  ;;  %3548 = vmatprep.mubr.f32.mxu1 %v3410_v44  ;;  %6306 = vrcp.f32 %v3381_v12  ;;  %v9582_v12 = vld [vmem:[#allocation43_spill] sm:$0xff] }
 0x874   :  { %v6297_v23 = vpop.eup %6296 }
 0x875   :  { %v6299_v37 = vpop.eup %6298  ;;  %v3394_v49 = vmul.f32 %v6297_v23, %v6289_v33 }
 0x876   :  { %v6301_v60 = vpop.eup %6300  ;;  %v3395_v6 = vmul.f32 %v6299_v37, %v6291_v31 }
 0x877   :  { %v6303_v43 = vpop.eup %6302  ;;  %v3392_v35 = vmul.f32 %v6301_v60, %v3388_v25  ;;  %v9579_v60 = vld [vmem:[#allocation40_spill] sm:$0xff] }
 0x878   :  { %v3393_v5 = vmul.f32 %v6303_v43, %v3389_v61  ;;  %v9581_v61 = vld [vmem:[#allocation42_spill] sm:$0xff]  ;;  %v9583_v43 = vld [vmem:[#allocation44_spill] sm:$0xff] }
 0x879   :  { %v8716_v62 = vadd.f32 %v3394_v49, %v3392_v35  ;;  %v9584_v35 = vld [vmem:[#allocation45_spill] sm:$0xff] }
 0x87a   :  { %v8718_v30 = vadd.f32 %v3395_v6, %v3393_v5  ;;  %v9580_v6 = vld [vmem:[#allocation41_spill] sm:$0xff]  ;;  %v9585_v5 = vld [vmem:[#allocation46_spill] sm:$0xff] }
 0x87b   :  { %6308 = vtanh.f32 %v8716_v62 }
 0x87c   :  { %6310 = vtanh.f32 %v8718_v30  ;;  %v6305_v18 = vpop.eup %6304 }
 0x87d   :  { %v6307_v33 = vpop.eup %6306 }
 0x885   :  { %v6309_v41 = vpop.eup %6308 }
 0x886   :  { %v6311_v31 = vpop.eup %6310  ;;  %v3400_v48 = vmul.f32 %v6309_v41, %v6305_v18  ;;  %v9586_v18 = vld [vmem:[#allocation47_spill] sm:$0xff]  ;;  %v9588_v41 = vld [vmem:[#allocation49_spill] sm:$0xff] }
 0x887   :  { %v3401_v36 = vmul.f32 %v6311_v31, %v6307_v33  ;;  %v9587_v33 = vld [vmem:[#allocation48_spill] sm:$0xff]  ;;  %v9589_v31 = vld [vmem:[#allocation50_spill] sm:$0xff] }
 0x888   :  { %v3579_v44 = vrot.slane %v3400_v48, 6 }
 0x889   :  { %v3404_v13 = vrot.slane %v3401_v36, 7  ;;  %v3580_v23 = vrot.slane %v3401_v36, 5  ;;  %v9591_v36 = vld [vmem:[#allocation52_spill] sm:$0xff] }
 0x88b   :  { %v3406_v37 = vsel %vm3405_vm6, %v3404_v13, %v3400_v48  ;;  %v3581_v49 = vsel %vm861_vm0, %v3580_v23, %v3579_v44  ;;  %v9590_v48 = vld [vmem:[#allocation51_spill] sm:$0xff]  ;;  %v9592_v44 = vld [vmem:[#allocation53_spill] sm:$0xff]  ;;  %v9593_v13 = vld [vmem:[#allocation54_spill] sm:$0xff] }
 0x88c   :  { %v3409_v25 = vrot.slane %v3406_v37, 6  ;;  %v9594_v23 = vld [vmem:[#allocation55_spill] sm:$0xff]  ;;  %v9595_v37 = vld [vmem:[#allocation56_spill] sm:$0xff] }
 0x88e   :  { %3478 = vmatmul.mubr.f32.vlgmr.msra.gmra.mrb[30].mxu0 %v3409_v25  ;;  %3549 = vmatmul.mubr.f32.vlgmr.msra.gmra.mrb[30].mxu1 %v3409_v25  ;;  %v9597_v25 = vld [vmem:[#allocation58_spill] sm:$0xff] }
 0x88f   :  { %5759 = vmatpush1.bf16.msra.mxu0 %v7082_v53  ;;  %5791 = vmatpush1.bf16.msra.mxu1 %v7085_v54  ;;  %v9546_v53 = vld [vmem:[#allocation7_spill] sm:$0xff]  ;;  %v9547_v54 = vld [vmem:[#allocation8_spill] sm:$0xff] }
 0x890   :  { %5761 = vmatprep.subr.bf16.mxu0 %v7097_v58  ;;  %5793 = vmatprep.subr.bf16.mxu1 %v7099_v59  ;;  %v9548_v58 = vld [vmem:[#allocation9_spill] sm:$0xff]  ;;  %v9549_v59 = vld [vmem:[#allocation10_spill] sm:$0xff] }
 0x891   :  { %3647 = vmatprep.mubr.f32.mxu0 %v9134_v1  ;;  %3718 = vmatprep.mubr.f32.mxu1 %v9134_v1 }
 0x893   :  { %5763 = vmatpush1.bf16.msra.mxu0 %v7120_v2  ;;  %5795 = vmatpush1.bf16.msra.mxu1 %v7124_v3  ;;  %v9550_v2 = vld [vmem:[#allocation11_spill] sm:$0xff]  ;;  %v9551_v3 = vld [vmem:[#allocation12_spill] sm:$0xff] }
 0x894   :  { %5765 = vmatprep.subr.bf16.mxu0 %v7126_v4  ;;  %5797 = vmatprep.subr.bf16.mxu1 %v7139_v8  ;;  %v9552_v4 = vld [vmem:[#allocation13_spill] sm:$0xff]  ;;  %v9553_v8 = vld [vmem:[#allocation14_spill] sm:$0xff] }
 0x897   :  { %5767 = vmatpush1.bf16.msra.mxu0 %v7158_v14  ;;  %5799 = vmatpush1.bf16.msra.mxu1 %v7162_v15  ;;  %v9554_v14 = vld [vmem:[#allocation15_spill] sm:$0xff]  ;;  %v9555_v15 = vld [vmem:[#allocation16_spill] sm:$0xff] }
 0x898   :  { %5769 = vmatprep.subr.bf16.mxu0 %v7164_v16  ;;  %5801 = vmatprep.subr.bf16.mxu1 %v7176_v20  ;;  %v9556_v16 = vld [vmem:[#allocation17_spill] sm:$0xff]  ;;  %v9557_v20 = vld [vmem:[#allocation18_spill] sm:$0xff] }
 0x89b   :  { %5771 = vmatpush1.bf16.msra.mxu0 %v7196_v26  ;;  %5803 = vmatpush1.bf16.msra.mxu1 %v7200_v27  ;;  %v9558_v26 = vld [vmem:[#allocation19_spill] sm:$0xff]  ;;  %v9559_v27 = vld [vmem:[#allocation20_spill] sm:$0xff] }
 0x89c   :  { %5773 = vmatprep.subr.bf16.mxu0 %v7202_v28  ;;  %5805 = vmatprep.subr.bf16.mxu1 %v7214_v32  ;;  %v9560_v28 = vld [vmem:[#allocation21_spill] sm:$0xff]  ;;  %v9561_v32 = vld [vmem:[#allocation22_spill] sm:$0xff] }
 0x89f   :  { %5775 = vmatpush1.bf16.msra.mxu0 %v7232_v38  ;;  %5807 = vmatpush1.bf16.msra.mxu1 %v7236_v39  ;;  %v9562_v38 = vld [vmem:[#allocation23_spill] sm:$0xff]  ;;  %v9563_v39 = vld [vmem:[#allocation24_spill] sm:$0xff] }
 0x8a0   :  { %5777 = vmatprep.subr.bf16.mxu0 %v7238_v40  ;;  %5809 = vmatprep.subr.bf16.mxu1 %v7250_v46  ;;  %v9564_v40 = vld [vmem:[#allocation25_spill] sm:$0xff]  ;;  %v9565_v46 = vld [vmem:[#allocation26_spill] sm:$0xff] }
 0x8a3   :  { %5779 = vmatpush1.bf16.msra.mxu0 %v7268_v55  ;;  %5811 = vmatpush1.bf16.msra.mxu1 %v7272_v56  ;;  %v9566_v55 = vld [vmem:[#allocation27_spill] sm:$0xff]  ;;  %v9567_v56 = vld [vmem:[#allocation28_spill] sm:$0xff] }
 0x8a4   :  { %5781 = vmatprep.subr.bf16.mxu0 %v7274_v57  ;;  %5813 = vmatprep.subr.bf16.mxu1 %v7286_v63  ;;  %v9568_v57 = vld [vmem:[#allocation29_spill] sm:$0xff]  ;;  %v9569_v63 = vld [vmem:[#allocation30_spill] sm:$0xff] }
 0x8a7   :  { %5783 = vmatpush1.bf16.msra.mxu0 %v7304_v9  ;;  %5815 = vmatpush1.bf16.msra.mxu1 %v7308_v10  ;;  %v9570_v9 = vld [vmem:[#allocation31_spill] sm:$0xff]  ;;  %v9571_v10 = vld [vmem:[#allocation32_spill] sm:$0xff] }
 0x8a8   :  { %5785 = vmatprep.subr.bf16.mxu0 %v7310_v11  ;;  %5817 = vmatprep.subr.bf16.mxu1 %v7319_v17  ;;  %v9572_v11 = vld [vmem:[#allocation33_spill] sm:$0xff]  ;;  %v9573_v17 = vld [vmem:[#allocation34_spill] sm:$0xff] }
 0x8ab   :  { %5787 = vmatpush1.bf16.msra.mxu0 %v7328_v21  ;;  %5819 = vmatpush1.bf16.msra.mxu1 %v7332_v22  ;;  %v9574_v21 = vld [vmem:[#allocation35_spill] sm:$0xff]  ;;  %v9575_v22 = vld [vmem:[#allocation36_spill] sm:$0xff] }
 0x8ac   :  { %5821 = vmatprep.subr.bf16.mxu0 %v7350_v29  ;;  %5885 = vmatprep.subr.bf16.mxu1 %v7361_v34  ;;  %v9576_v29 = vld [vmem:[#allocation37_spill] sm:$0xff]  ;;  %v9577_v34 = vld [vmem:[#allocation38_spill] sm:$0xff] }
 0x8ae   :  { %3648 = vmatmul.mubr.f32.vlgmr.msra.gmra.mrb[32].mxu0 %v3581_v49  ;;  %3719 = vmatmul.mubr.f32.vlgmr.msra.gmra.mrb[32].mxu1 %v3581_v49  ;;  %v9596_v49 = vld [vmem:[#allocation57_spill] sm:$0xff] }
 0x8af   :  { %5823 = vmatpush1.bf16.msra.mxu0 %v9546_v53  ;;  %5887 = vmatpush1.bf16.msra.mxu1 %v9547_v54  ;;  %v9598_v53 = vld [vmem:[#allocation59_spill] sm:$0xff]  ;;  %v9599_v54 = vld [vmem:[#allocation60_spill] sm:$0xff] }
 0x8b0   :  { %5825 = vmatprep.subr.bf16.mxu0 %v9548_v58  ;;  %5889 = vmatprep.subr.bf16.mxu1 %v9549_v59  ;;  %v9600_v58 = vld [vmem:[#allocation61_spill] sm:$0xff]  ;;  %v9601_v59 = vld [vmem:[#allocation62_spill] sm:$0xff] }
 0x8b3   :  { %5827 = vmatpush1.bf16.msra.mxu0 %v9550_v2  ;;  %5891 = vmatpush1.bf16.msra.mxu1 %v9551_v3  ;;  %v9602_v2 = vld [vmem:[#allocation63_spill] sm:$0xff]  ;;  %v9603_v3 = vld [vmem:[#allocation64_spill] sm:$0xff] }
 0x8b4   :  { %5829 = vmatprep.subr.bf16.mxu0 %v9552_v4  ;;  %5893 = vmatprep.subr.bf16.mxu1 %v9553_v8  ;;  %v9604_v4 = vld [vmem:[#allocation65_spill] sm:$0xff]  ;;  %v9605_v8 = vld [vmem:[#allocation66_spill] sm:$0xff] }
 0x8b7   :  { %5831 = vmatpush1.bf16.msra.mxu0 %v9554_v14  ;;  %5895 = vmatpush1.bf16.msra.mxu1 %v9555_v15  ;;  %v9606_v14 = vld [vmem:[#allocation67_spill] sm:$0xff]  ;;  %v9607_v15 = vld [vmem:[#allocation68_spill] sm:$0xff] }
 0x8b8   :  { %5833 = vmatprep.subr.bf16.mxu0 %v9556_v16  ;;  %5897 = vmatprep.subr.bf16.mxu1 %v9557_v20 }
 0x8bb   :  { %5835 = vmatpush1.bf16.msra.mxu0 %v9558_v26  ;;  %5899 = vmatpush1.bf16.msra.mxu1 %v9559_v27  ;;  %v9608_v26 = vld [vmem:[#allocation73_spill] sm:$0xff] }
 0x8bc   :  { %5837 = vmatprep.subr.bf16.mxu0 %v9560_v28  ;;  %5901 = vmatprep.subr.bf16.mxu1 %v9561_v32 }
 0x8bf   :  { %5839 = vmatpush1.bf16.msra.mxu0 %v9562_v38  ;;  %5903 = vmatpush1.bf16.msra.mxu1 %v9563_v39  ;;  %v9609_v38 = vld [vmem:[#allocation74_spill] sm:$0xff] }
 0x8c0   :  { %5841 = vmatprep.subr.bf16.mxu0 %v9564_v40  ;;  %5905 = vmatprep.subr.bf16.mxu1 %v9565_v46 }
 0x8c3   :  { %5843 = vmatpush1.bf16.msra.mxu0 %v9566_v55  ;;  %5907 = vmatpush1.bf16.msra.mxu1 %v9567_v56  ;;  %v9610_v55 = vld [vmem:[#allocation76_spill] sm:$0xff] }
 0x8c4   :  { %5845 = vmatprep.subr.bf16.mxu0 %v9568_v57  ;;  %5909 = vmatprep.subr.bf16.mxu1 %v9569_v63 }
 0x8c7   :  { %5847 = vmatpush1.bf16.msra.mxu0 %v9570_v9  ;;  %5911 = vmatpush1.bf16.msra.mxu1 %v9571_v10 }
 0x8c8   :  { %5849 = vmatprep.subr.bf16.mxu0 %v9572_v11  ;;  %5913 = vmatprep.subr.bf16.mxu1 %v9573_v17  ;;  %v9611_v11 = vld [vmem:[#allocation75_spill] sm:$0xff] }
 0x8cb   :  { %5851 = vmatpush1.bf16.msra.mxu0 %v9574_v21  ;;  %5915 = vmatpush1.bf16.msra.mxu1 %v9575_v22 }
 0x8cc   :  { %5853 = vmatprep.subr.bf16.mxu0 %v9576_v29  ;;  %5917 = vmatprep.subr.bf16.mxu1 %v9577_v34 }
 0x8cf   :  { %5855 = vmatpush1.bf16.msra.mxu0 %v9578_v0  ;;  %5919 = vmatpush1.bf16.msra.mxu1 %v9579_v60 }
 0x8d0   :  { %5857 = vmatprep.subr.bf16.mxu0 %v9580_v6  ;;  %5921 = vmatprep.subr.bf16.mxu1 %v9581_v61 }
 0x8d3   :  { %5859 = vmatpush1.bf16.msra.mxu0 %v9582_v12  ;;  %5923 = vmatpush1.bf16.msra.mxu1 %v9583_v43 }
 0x8d4   :  { %5861 = vmatprep.subr.bf16.mxu0 %v9584_v35  ;;  %5925 = vmatprep.subr.bf16.mxu1 %v9585_v5 }
 0x8d7   :  { %5863 = vmatpush1.bf16.msra.mxu0 %v9586_v18  ;;  %5927 = vmatpush1.bf16.msra.mxu1 %v9587_v33 }
 0x8d8   :  { %5865 = vmatprep.subr.bf16.mxu0 %v9588_v41  ;;  %5929 = vmatprep.subr.bf16.mxu1 %v9589_v31 }
 0x8db   :  { %5867 = vmatpush1.bf16.msra.mxu0 %v9590_v48  ;;  %5931 = vmatpush1.bf16.msra.mxu1 %v9591_v36 }
 0x8dc   :  { %5869 = vmatprep.subr.bf16.mxu0 %v9592_v44  ;;  %5933 = vmatprep.subr.bf16.mxu1 %v9593_v13 }
 0x8df   :  { %5871 = vmatpush1.bf16.msra.mxu0 %v9594_v23  ;;  %5935 = vmatpush1.bf16.msra.mxu1 %v9595_v37 }
 0x8e0   :  { %5873 = vmatprep.subr.bf16.mxu0 %v9596_v49  ;;  %5937 = vmatprep.subr.bf16.mxu1 %v9597_v25 }
 0x8e3   :  { %5875 = vmatpush1.bf16.msra.mxu0 %v9598_v53  ;;  %5939 = vmatpush1.bf16.msra.mxu1 %v9599_v54 }
 0x8e4   :  { %5877 = vmatprep.subr.bf16.mxu0 %v9600_v58  ;;  %5941 = vmatprep.subr.bf16.mxu1 %v9601_v59 }
 0x8e7   :  { %5879 = vmatpush1.bf16.msra.mxu0 %v9602_v2  ;;  %5943 = vmatpush1.bf16.msra.mxu1 %v9603_v3 }
 0x8e8   :  { %5881 = vmatprep.subr.bf16.mxu0 %v9604_v4  ;;  %5945 = vmatprep.subr.bf16.mxu1 %v9605_v8 }
 0x8eb   :  { %5883 = vmatpush1.bf16.msra.mxu0 %v9606_v14  ;;  %5947 = vmatpush1.bf16.msra.mxu1 %v9607_v15 }
 0x961   :  { %v3479_v16 = vpop.f32.mrb[30].mxu0  ;;  %v3550_v20 = vpop.f32.mrb[30].mxu1 }
 0x962   :  { %v3480_v27 = vadd.f32 %v3479_v16, %v9608_v26  ;;  %v3481_v28 = vpop.f32.mrb[31].mxu0  ;;  %v3552_v32 = vpop.f32.mrb[31].mxu1  ;;  %v3551_v56 = vadd.f32 %v3550_v20, %v9610_v55 }
 0x963   :  { %v3482_v39 = vadd.f32 %v3481_v28, %v9609_v38  ;;  %v3553_v17 = vadd.f32 %v3552_v32, %v9611_v11 }
 0x964   :  { %v4154_v40 = vmul.f32 -1.442695, %v3480_v27 }
 0x965   :  { %v4155_v46 = vmul.f32 -1.442695, %v3482_v39  ;;  %v4156_v21 = vmul.f32 -1.442695, %v3553_v17 }
 0x966   :  { %6312 = vpow2.f32 %v4154_v40 }
 0x967   :  { %6314 = vpow2.f32 %v4155_v46 }
 0x968   :  { %6316 = vtanh.f32 %v3551_v56 }
 0x970   :  { %v6313_v57 = vpop.eup %6312 }
 0x971   :  { %v6315_v63 = vpop.eup %6314  ;;  %v3558_v9 = vadd.f32 1.0, %v6313_v57 }
 0x972   :  { %v3564_v10 = vadd.f32 1.0, %v6315_v63  ;;  %v6317_v22 = vpop.eup %6316 }
 0x973   :  { %6318 = vrcp.f32 %v3558_v9 }
 0x974   :  { %6320 = vrcp.f32 %v3564_v10  ;;  %v3793_v10 = vrot.slane %v8716_v62, 7 }
 0x975   :  { %6322 = vpow2.f32 %v4156_v21 }
 0x97d   :  { %v6319_v29 = vpop.eup %6318 }
 0x97e   :  { %v6321_v34 = vpop.eup %6320  ;;  %v3575_v0 = vmul.f32 %v6319_v29, %v6317_v22  ;;  %v3794_v29 = vrot.slane %v8718_v30, 7 }
 0x97f   :  { %v3574_v60 = vmul.f32 %v6321_v34, %v8703_v51  ;;  %v6323_v13 = vpop.eup %6322 }
 0x980   :  { %v3571_v54 = vadd.f32 1.0, %v6323_v13 }
 0x981   :  { %v8824_v6 = vadd.f32 %v3575_v0, %v3574_v60  ;;  %v3649_v61 = vpop.f32.mrb[32].mxu0  ;;  %v3720_v12 = vpop.f32.mrb[32].mxu1 }
 0x982   :  { %v3729_v43 = vrot.slane %v3649_v61, 1  ;;  %v3733_v35 = vrot.slane %v3649_v61, 2  ;;  %v3651_v5 = vpop.f32.mrb[33].mxu0  ;;  %v3722_v18 = vpop.f32.mrb[33].mxu1  ;;  %v3731_v58 = vrot.slane %v3720_v12, 1  ;;  %v3735_v59 = vrot.slane %v3720_v12, 2 }
 0x983   :  { %v3730_v33 = vrot.slane %v3651_v5, 1  ;;  %v3734_v41 = vrot.slane %v3651_v5, 2  ;;  %v3732_v25 = vrot.slane %v3722_v18, 1  ;;  %v3736_v53 = vrot.slane %v3722_v18, 2 }
 0x984   :  { %v3745_v31 = vadd.f32 %v9205_v45, %v3729_v43  ;;  %v3749_v48 = vadd.f32 %v9271_v42, %v3733_v35 }
 0x985   :  { %v3746_v36 = vadd.f32 %v9272_v52, %v3730_v33  ;;  %v3750_v44 = vadd.f32 %v9273_v19, %v3734_v41  ;;  %v3748_v45 = vadd.f32 %v7948_v50, %v3732_v25  ;;  %v3752_v42 = vadd.f32 %v7950_v24, %v3736_v53  ;;  %v3990_v25 = vld [vmem:[%s8912_s6 + $0x20] sm:$0xff]  ;;  %v3991_v53 = vld [vmem:[%s8912_s6 + $0x28] sm:$0xff] }
 0x986   :  { %v4157_v51 = vmul.f32 -1.442695, %v3745_v31  ;;  %v4158_v23 = vmul.f32 -1.442695, %v3749_v48  ;;  %v3747_v19 = vadd.f32 %v7953_v47, %v3731_v58  ;;  %v3751_v52 = vadd.f32 %v7957_v7, %v3735_v59  ;;  %v3992_v58 = vld [vmem:[%s8912_s6 + $0x30] sm:$0xff]  ;;  %v3993_v59 = vld [vmem:[%s8912_s6 + $0x38] sm:$0xff] }
 0x987   :  { %v4159_v37 = vmul.f32 -1.442695, %v3746_v36  ;;  %v4160_v49 = vmul.f32 -1.442695, %v3750_v44  ;;  %v4161_v2 = vmul.f32 -1.442695, %v3748_v45  ;;  %v5958_v45 = vpack.c.bf16 %v3993_v59, %v3992_v58 }
 0x988   :  { %6324 = vpow2.f32 %v4157_v51  ;;  %v4162_v3 = vmul.f32 -1.442695, %v3752_v42  ;;  %v3986_v36 = vld [vmem:[%s8912_s6] sm:$0xff]  ;;  %v3987_v44 = vld [vmem:[%s8912_s6 + $0x8] sm:$0xff]  ;;  %v6401_v51 = vmov 0.0|0.0  }
 0x989   :  { %6326 = vpow2.f32 %v4158_v23  ;;  %v5949_v13 = vpack.c.bf16 %v3987_v44, %v3986_v36  ;;  %5948 = vmatprep.subr.bf16.mxu0 %v6401_v51  ;;  %v3988_v23 = vld [vmem:[%s8912_s6 + $0x10] sm:$0xff]  ;;  %v3994_v42 = vld [vmem:[%s8912_s6 + $0x40] sm:$0xff] }
 0x98a   :  { %6328 = vpow2.f32 %v4159_v37  ;;  %v3989_v37 = vld [vmem:[%s8912_s6 + $0x18] sm:$0xff] }
 0x98b   :  { %6330 = vpow2.f32 %v4160_v49  ;;  %v5952_v49 = vpack.c.bf16 %v3989_v37, %v3988_v23 }
 0x98c   :  { %6332 = vrcp.f32 %v3571_v54  ;;  %v5955_v54 = vpack.c.bf16 %v3991_v53, %v3990_v25 }
 0x98d   :  { %6334 = vtanh.f32 %v8824_v6 }
 0x98e   :  { %6336 = vtanh.f32 %v3747_v19  ;;  %v3995_v19 = vld [vmem:[%s8912_s6 + $0x48] sm:$0xff] }
 0x98f   :  { %6338 = vtanh.f32 %v3751_v52  ;;  %v5961_v52 = vpack.c.bf16 %v3995_v19, %v3994_v42 }
 0x990   :  { %6340 = vpow2.f32 %v4161_v2  ;;  %v3996_v2 = vld [vmem:[%s8912_s6 + $0x50] sm:$0xff] }
 0x991   :  { %6342 = vpow2.f32 %v4162_v3  ;;  %v3997_v3 = vld [vmem:[%s8912_s6 + $0x58] sm:$0xff] }
 0x992   :  { %v6325_v4 = vpop.eup %6324 }
 0x993   :  { %v6327_v8 = vpop.eup %6326  ;;  %v3759_v14 = vadd.f32 1.0, %v6325_v4  ;;  %v5964_v4 = vpack.c.bf16 %v3997_v3, %v3996_v2 }
 0x994   :  { %v6329_v15 = vpop.eup %6328  ;;  %v3760_v16 = vadd.f32 1.0, %v6327_v8  ;;  %v3998_v8 = vld [vmem:[%s8912_s6 + $0x60] sm:$0xff] }
 0x995   :  { %v6331_v50 = vpop.eup %6330  ;;  %6344 = vrcp.f32 %v3759_v14  ;;  %v3771_v24 = vadd.f32 1.0, %v6329_v15  ;;  %v4000_v15 = vld [vmem:[%s8912_s6 + $0x70] sm:$0xff] }
 0x996   :  { %6346 = vrcp.f32 %v3760_v16  ;;  %v3772_v47 = vadd.f32 1.0, %v6331_v50  ;;  %v6333_v20 = vpop.eup %6332  ;;  %v4001_v16 = vld [vmem:[%s8912_s6 + $0x78] sm:$0xff] }
 0x997   :  { %6348 = vrcp.f32 %v3771_v24  ;;  %v6335_v7 = vpop.eup %6334  ;;  %v5970_v50 = vpack.c.bf16 %v4001_v16, %v4000_v15 }
 0x998   :  { %6350 = vrcp.f32 %v3772_v47  ;;  %v3578_v27 = vmul.f32 %v6335_v7, %v6333_v20  ;;  %v6337_v28 = vpop.eup %6336 }
 0x999   :  { %v6339_v39 = vpop.eup %6338 }
 0x99a   :  { %v3811_v32 = vrot.slane %v3578_v27, 1  ;;  %v6341_v40 = vpop.eup %6340 }
 0x99b   :  { %v6343_v56 = vpop.eup %6342  ;;  %v3785_v17 = vadd.f32 1.0, %v6341_v40 }
 0x99c   :  { %v3816_v46 = vrot.slane %v3811_v32, 7  ;;  %v3786_v34 = vadd.f32 1.0, %v6343_v56 }
 0x99d   :  { %6352 = vrcp.f32 %v3785_v17 }
 0x99e   :  { %3884 = vmatprep.mubr.f32.mxu0 %v3816_v46  ;;  %3955 = vmatprep.mubr.f32.mxu1 %v3816_v46  ;;  %6354 = vrcp.f32 %v3786_v34 }
 0x99f   :  { %v6345_v57 = vpop.eup %6344 }
 0x9a0   :  { %v6347_v63 = vpop.eup %6346  ;;  %v3799_v9 = vmul.f32 %v6345_v57, %v6337_v28 }
 0x9a1   :  { %v6349_v21 = vpop.eup %6348  ;;  %v3800_v22 = vmul.f32 %v6347_v63, %v6339_v39 }
 0x9a2   :  { %v6351_v0 = vpop.eup %6350  ;;  %v3797_v60 = vmul.f32 %v6349_v21, %v3793_v10 }
 0x9a3   :  { %v3798_v61 = vmul.f32 %v6351_v0, %v3794_v29 }
 0x9a4   :  { %v3801_v12 = vadd.f32 %v3799_v9, %v3797_v60 }
 0x9a5   :  { %v3802_v43 = vadd.f32 %v3800_v22, %v3798_v61  ;;  %v4167_v61 = vld [vmem:[%s8913_s7] ss:$0 sm:$0xff] }
 0x9a6   :  { %6356 = vtanh.f32 %v3801_v12 }
 0x9a7   :  { %6358 = vtanh.f32 %v3802_v43  ;;  %v6353_v35 = vpop.eup %6352 }
 0x9a8   :  { %v6355_v5 = vpop.eup %6354 }
 0x9b0   :  { %v6357_v18 = vpop.eup %6356 }
 0x9b1   :  { %v6359_v33 = vpop.eup %6358  ;;  %v3805_v62 = vmul.f32 %v6357_v18, %v6353_v35 }
 0x9b2   :  { %v3806_v41 = vmul.f32 %v6359_v33, %v6355_v5 }
 0x9b3   :  { %v3813_v31 = vrot.slane %v3805_v62, 7 }
 0x9b4   :  { %v4163_v48 = vrot.slane %v3806_v41, 14 }
 0x9b6   :  { %v3815_v30 = vsel %vm3812_vm7, %v3813_v31, %v4163_v48 }
 0x9b7   :  { %3885 = vmatmul.mubr.f32.vlgmr.msra.gmra.mrb[34].mxu0 %v3815_v30  ;;  %3956 = vmatmul.mubr.f32.vlgmr.msra.gmra.mrb[34].mxu1 %v3815_v30 }
 0x9b8   :  { %5950 = vmatpush3.bf16.msra.mxu0 %v5949_v13  ;;  %4217 = vmatprep.mubr.msk.f32.mxu0 %vm6402_vm8, %v9134_v1  ;;  %v3999_v1 = vld [vmem:[%s8912_s6 + $0x68] sm:$0xff] }
 0x9b9   :  { %5951 = vmatprep.subr.bf16.mxu0 %v6401_v51  ;;  %v5967_v14 = vpack.c.bf16 %v3999_v1, %v3998_v8 }
 0x9bc   :  { %5953 = vmatpush3.bf16.msra.mxu0 %v5952_v49 }
 0x9bd   :  { %5954 = vmatprep.subr.bf16.mxu0 %v6401_v51 }
 0x9c0   :  { %5956 = vmatpush3.bf16.msra.mxu0 %v5955_v54 }
 0x9c1   :  { %5957 = vmatprep.subr.bf16.mxu0 %v6401_v51 }
 0x9c4   :  { %5959 = vmatpush3.bf16.msra.mxu0 %v5958_v45 }
 0x9c5   :  { %5960 = vmatprep.subr.bf16.mxu0 %v6401_v51 }
 0x9c8   :  { %5962 = vmatpush3.bf16.msra.mxu0 %v5961_v52 }
 0x9c9   :  { %5963 = vmatprep.subr.bf16.mxu0 %v6401_v51 }
 0x9cc   :  { %5965 = vmatpush3.bf16.msra.mxu0 %v5964_v4 }
 0x9cd   :  { %5966 = vmatprep.subr.bf16.mxu0 %v6401_v51 }
 0x9d0   :  { %5968 = vmatpush3.bf16.msra.mxu0 %v5967_v14 }
 0x9d1   :  { %5969 = vmatprep.subr.bf16.mxu0 %v6401_v51 }
 0x9d4   :  { %5971 = vmatpush3.bf16.msra.mxu0 %v5970_v50 }
 0xa8a   :  { %v3886_v24 = vpop.f32.mrb[34].mxu0  ;;  %v3957_v47 = vpop.f32.mrb[34].mxu1 }
 0xa8b   :  { %v3887_v20 = vadd.f32 %v3886_v24, %v9608_v26  ;;  %v3888_v7 = vpop.f32.mrb[35].mxu0  ;;  %v3959_v27 = vpop.f32.mrb[35].mxu1  ;;  %v3958_v56 = vadd.f32 %v3957_v47, %v9610_v55 }
 0xa8c   :  { %v3889_v28 = vadd.f32 %v3888_v7, %v9609_v38  ;;  %v3960_v40 = vadd.f32 %v3959_v27, %v9611_v11 }
 0xa8d   :  { %v4164_v32 = vmul.f32 -1.442695, %v3887_v20 }
 0xa8e   :  { %v4165_v39 = vmul.f32 -1.442695, %v3889_v28  ;;  %v4166_v46 = vmul.f32 -1.442695, %v3960_v40 }
 0xa8f   :  { %6360 = vpow2.f32 %v4164_v32 }
 0xa90   :  { %6362 = vpow2.f32 %v4165_v39 }
 0xa91   :  { %6364 = vpow2.f32 %v4166_v46 }
 0xa92   :  { %6366 = vtanh.f32 %v3958_v56 }
 0xa99   :  { %v6361_v57 = vpop.eup %6360 }
 0xa9a   :  { %v6363_v63 = vpop.eup %6362  ;;  %v3965_v9 = vadd.f32 1.0, %v6361_v57 }
 0xa9b   :  { %v3971_v10 = vadd.f32 1.0, %v6363_v63  ;;  %v6365_v26 = vpop.eup %6364 }
 0xa9c   :  { %6368 = vrcp.f32 %v3965_v9  ;;  %v6367_v17 = vpop.eup %6366  ;;  %v3978_v29 = vadd.f32 1.0, %v6365_v26 }
 0xa9d   :  { %6370 = vrcp.f32 %v3971_v10 }
 0xa9e   :  { %6372 = vrcp.f32 %v3978_v29 }
 0xaa6   :  { %v6369_v38 = vpop.eup %6368 }
 0xaa7   :  { %v6371_v21 = vpop.eup %6370  ;;  %v3982_v22 = vmul.f32 %v6369_v38, %v6367_v17 }
 0xaa8   :  { %v3981_v34 = vmul.f32 %v6371_v21, %v8824_v6  ;;  %v6373_v55 = vpop.eup %6372 }
 0xaaa   :  { %v3983_v11 = vadd.f32 %v3982_v22, %v3981_v34 }
 0xaac   :  { %6374 = vtanh.f32 %v3983_v11 }
 0xab6   :  { %v6375_v0 = vpop.eup %6374 }
 0xab7   :  { %v3985_v60 = vmul.f32 %v6375_v0, %v6373_v55 }
 0xab9   :  { %4218 = vmatmul.mubr.f32.vlgmr.msra.gmra.mrb[36].mxu0 %v3985_v60 }
 0xb8c   :  { %v4075_v12 = vpop.f32.mrb[36].mxu0 }
 0xb8d   :  { %v4076_v43 = vadd.f32 %v4167_v61, %v4075_v12  ;;  %v4219_v35 = vpop.f32.mrb[37].mxu0 }
 0xb8f   :  { %4079 = vst [vmem:[#allocation2] sm:$0x3] %v4076_v43 }
 0xb90   :  { %6387 = shalt.err (!%p6384_p4)
}
 0xb91   :  { %s6388_s28 = scalar_lea.hbm %s8914_s8, 32 }
 0xb92   :  { %p6389_p5 = scmp.ne.s32.totalorder %s8914_s8, %s6388_s28  ;;  %p6392_p6 = scmp.lt.u32.totalorder %s6388_s28, %s8914_s8 }
 0xb94   :  { %p6394_p7 = pnand %p6392_p6, %p6389_p5 }
 0xb96   :  { %6397 = shalt.err (!%p6394_p7)
}
 0xb97   :  { %4089 = dma.vmem_to_hbm [thread:$0]  %s4087_s25, 32, %s8914_s8, [#allocation3]  }
 0xb98   :  { %6398 = dma.done.wait [#allocation3], 32  }
 0xb99   :  { %6399 = vsyncadd [#allocation3], 4294967264 }
 0xb9a   :  { %4093 = vsyncpa [#allocation3], 1 }

</bundles_post_ra>
